<compile_context>
chip_gen: v7x
topology: tpu7x:2x2x1
jax: 0.10.0
libtpu: 0.0.40
codegen_flags: <defaults>
</compile_context>

<pallas_src>
import functools

import jax
import jax.numpy as jnp
from jax.experimental import pallas as pl
from jax.experimental.pallas import tpu as pltpu


# ----------------------------------------------------------------------------
# In-kernel helpers
# ----------------------------------------------------------------------------
def _silu(y):
    return y * jax.nn.sigmoid(y)


def _mask_rows(f, gstart, H):
    """Zero rows whose global row index (gstart + i) lies outside [0, H).

    This reproduces the zero 'same' padding of each conv at the image
    top/bottom when working on an overlapping row slab.
    """
    R = f.shape[0]
    rows = jax.lax.broadcasted_iota(jnp.int32, (R, 1, 1), 0) + gstart
    valid = jnp.logical_and(rows >= 0, rows < H)
    return jnp.where(valid, f, jnp.zeros_like(f))


def _conv1x1(f, w, b):
    """f: (R, W, Cin) f32; w: (Cin, Cout) compute dtype; b: (1, Cout) f32."""
    acc = jax.lax.dot_general(
        f.astype(w.dtype), w,
        dimension_numbers=(((2,), (0,)), ((), ())),
        preferred_element_type=jnp.float32)
    return acc + b


def _conv3x3(f, w9, b):
    """3x3 conv: 'valid' along rows (halo handled by caller), zero-'same' in W.

    f : (R, W, Cin) f32; w9: (9*Cin, Cout) compute dtype; b: (1, Cout) f32
    returns (R-2, W, Cout) f32 pre-activation.
    """
    R, W, Cin = f.shape
    zcol = jnp.zeros((R, 1, Cin), f.dtype)
    fp = jnp.concatenate([zcol, f, zcol], axis=1)          # zero pad W in VMEM
    taps = [fp[i:i + R - 2, j:j + W, :] for i in range(3) for j in range(3)]
    cout = w9.shape[-1]
    if Cin >= 128:
        # Channels already fill the MXU contraction dim; per-tap matmuls fine.
        acc = jnp.zeros((R - 2, W, cout), jnp.float32)
        for k, t in enumerate(taps):
            acc = acc + jax.lax.dot_general(
                t.astype(w9.dtype), w9[k * Cin:(k + 1) * Cin, :],
                dimension_numbers=(((2,), (0,)), ((), ())),
                preferred_element_type=jnp.float32)
    else:
        # im2col: K = 9*Cin fills the MXU and issues 1 matmul instead of 9.
        stack = jnp.concatenate(taps, axis=-1).astype(w9.dtype)
        acc = jax.lax.dot_general(
            stack, w9,
            dimension_numbers=(((2,), (0,)), ((), ())),
            preferred_element_type=jnp.float32)
    return acc + b


# ----------------------------------------------------------------------------
# Fused C2f kernel: one (batch, row-tile) grid step per invocation.
# ----------------------------------------------------------------------------
def _c2f_kernel(x_top, x_mid, x_bot,
                w1a, w1b, b1a, b1b,
                wm, bm, w2, b2,
                o_ref, *, n, H, row_tile, halo, shortcut):
    t = pl.program_id(1)
    s0 = t * row_tile - halo            # global row index of slab row 0

    # Row slab of the input (row_tile + 2*halo rows).  Halo views are clamped
    # at the image boundary; their out-of-image rows are neutralized by the
    # row masks applied to every intermediate feature map below.
    x_slab = jnp.concatenate([x_top[0], x_mid[0], x_bot[0]], axis=0)

    # cv1 (1x1 conv + folded BN bias + SiLU), channel split folded into the
    # weights: y0 is only needed on the centre rows (straight to cv2); y1 is
    # needed on the full slab (feeds the bottleneck chain).
    y0 = _silu(_conv1x1(x_mid[0], w1a[...], b1a[...]))      # (T, W, c)
    y1 = _silu(_conv1x1(x_slab, w1b[...], b1b[...]))        # (T+2*halo, W, c)
    y1 = _mask_rows(y1, s0, H)          # zero 'same' padding rows for 3x3

    # Bottleneck chain; each 3x3 conv consumes one halo row per side.
    feats = [y1]
    f = y1
    for i in range(n):
        g = _silu(_conv3x3(f, wm[i, 0], bm[i, 0]))
        g = _mask_rows(g, s0 + 2 * i + 1, H)
        h = _silu(_conv3x3(g, wm[i, 1], bm[i, 1]))
        h = _mask_rows(h, s0 + 2 * i + 2, H)
        if shortcut:                    # Bottleneck.add (c1 == c2)
            h = h + f[2:f.shape[0] - 2]
        feats.append(h)
        f = h

    # cv2 (1x1 + bias + SiLU) over the channel concat [y0, y1, m_1..m_n]:
    # instead of materializing the concat, sum partial matmuls per branch.
    acc = _conv1x1(y0, w2[0], b2[...])
    for k, fk in enumerate(feats):
        start = halo - 2 * k            # centre rows of this branch
        fk_c = fk[start:start + row_tile]
        wk = w2[k + 1]
        acc = acc + jax.lax.dot_general(
            fk_c.astype(wk.dtype), wk,
            dimension_numbers=(((2,), (0,)), ((), ())),
            preferred_element_type=jnp.float32)
    o_ref[0] = _silu(acc).astype(o_ref.dtype)


# ----------------------------------------------------------------------------
# Host-side parameter construction / packing
# ----------------------------------------------------------------------------
def _make_conv_params(key, kh, kw, cin, cout):
    kw_key, s_key, b_key = jax.random.split(key, 3)
    w = jax.random.normal(kw_key, (kh, kw, cin, cout), jnp.float32) * 0.1
    # Folded BN (eval): scale = gamma/sqrt(var+eps), bias = beta - mean*scale.
    scale = 1.0 + 0.05 * jax.random.normal(s_key, (cout,), jnp.float32)
    bias = 0.05 * jax.random.normal(b_key, (cout,), jnp.float32)
    return {"w": w, "scale": scale, "bias": bias}


def make_c2f_params(key, in_ch, out_ch, n=1, e=0.5):
    c = int(out_ch * e)
    keys = jax.random.split(key, 2 + 2 * n)
    params = {
        "c": c,
        "cv1": _make_conv_params(keys[0], 1, 1, in_ch, 2 * c),
        "cv2": _make_conv_params(keys[1], 1, 1, (2 + n) * c, out_ch),
        "m": [],
    }
    for i in range(n):
        # Bottleneck(c, c, shortcut, g=1, k=((3,3),(3,3)), e=1.0) -> c_ = c
        params["m"].append({
            "cv1": _make_conv_params(keys[2 + 2 * i], 3, 3, c, c),
            "cv2": _make_conv_params(keys[3 + 2 * i], 3, 3, c, c),
        })
    return params
    # TODO(synk): grouped conv (g>1) not implemented; C2f default g=1 is used.


def _fold_bn(p):
    # Fold the BN scale into the conv weight (exact, per-Cout); keep bias.
    return p["w"] * p["scale"][None, None, None, :], p["bias"]


def pack_c2f_params(params, compute_dtype=jnp.bfloat16):
    """Fold BN scale into weights, pre-split cv1/cv2 weights, cast to bf16."""
    c = params["c"]
    n = len(params["m"])
    assert n >= 1, "C2f with n >= 1 bottlenecks is supported"

    w1, b1 = _fold_bn(params["cv1"])                 # (1,1,Cin,2c), (2c,)
    cin = w1.shape[2]
    w1 = w1.reshape(cin, 2 * c)
    packed = {
        "w1a": w1[:, :c].astype(compute_dtype),
        "w1b": w1[:, c:].astype(compute_dtype),
        "b1a": b1[:c].reshape(1, c).astype(jnp.float32),
        "b1b": b1[c:].reshape(1, c).astype(jnp.float32),
    }

    wm, bm = [], []
    for mp in params["m"]:
        wa, ba = _fold_bn(mp["cv1"])                 # (3,3,c,c)
        wb, bb = _fold_bn(mp["cv2"])
        wm.append(jnp.stack([wa.reshape(9 * c, c), wb.reshape(9 * c, c)]))
        bm.append(jnp.stack([ba.reshape(1, c), bb.reshape(1, c)]))
    packed["wm"] = jnp.stack(wm).astype(compute_dtype)     # (n, 2, 9c, c)
    packed["bm"] = jnp.stack(bm).astype(jnp.float32)       # (n, 2, 1, c)

    w2, b2 = _fold_bn(params["cv2"])                 # (1,1,(2+n)c, out_ch)
    out_ch = w2.shape[3]
    packed["w2"] = w2.reshape(2 + n, c, out_ch).astype(compute_dtype)
    packed["b2"] = b2.reshape(1, out_ch).astype(jnp.float32)
    packed.update(c=c, n=n, cin=cin, out_ch=out_ch)
    return packed


def _choose_row_tile(H, W, cin, c, out_ch, n, requested=None,
                     vmem_block_budget=8 * 1024 * 1024):
    """Largest row tile (divisor of H, multiple of the 2*n halo) whose per-block
    footprint stays a few MiB so double-buffering fits every generation
    (v7x has only 64 MiB VMEM)."""
    halo = 2 * n
    assert H % halo == 0, "H must be a multiple of 2*n for halo row tiling"
    if requested is None:
        per_row = W * 4 * (2 * cin + 2 * out_ch + (2 + n) * c + 10 * c)
        target = max(halo, min(H, vmem_block_budget // max(per_row, 1)))
        cands = [d for d in range(halo, H + 1, halo)
                 if H % d == 0 and d <= target]
        requested = max(cands) if cands else H
    assert H % requested == 0 and requested % halo == 0, (H, requested, halo)
    return requested


# ----------------------------------------------------------------------------
# C2f forward (matches the PyTorch module's forward, NCHW in/out)
# ----------------------------------------------------------------------------
def c2f_forward(x_nchw, params, shortcut=False, *,
                compute_dtype=jnp.bfloat16, row_tile=None):
    packed = pack_c2f_params(params, compute_dtype)
    N, cin, H, W = x_nchw.shape
    c, n_blk, out_ch = packed["c"], packed["n"], packed["out_ch"]
    halo = 2 * n_blk
    th = _choose_row_tile(H, W, cin, c, out_ch, n_blk, row_tile)
    rr = th // halo                                   # halo blocks per row tile

    x = jnp.transpose(x_nchw, (0, 2, 3, 1))           # NCHW -> NHWC

    kernel = functools.partial(
        _c2f_kernel, n=n_blk, H=H, row_tile=th, halo=halo, shortcut=shortcut)

    def _full(rank):
        return lambda nb, t: (0,) * rank

    in_specs = [
        # top halo rows [t*th - halo, t*th): clamp at image top, masked in-kernel
        pl.BlockSpec((1, halo, W, cin),
                     lambda nb, t: (nb, jnp.maximum(t * rr - 1, 0), 0, 0)),
        # centre rows [t*th, (t+1)*th)
        pl.BlockSpec((1, th, W, cin), lambda nb, t: (nb, t, 0, 0)),
        # bottom halo rows [(t+1)*th, (t+1)*th + halo): clamp at image bottom
        pl.BlockSpec((1, halo, W, cin),
                     lambda nb, t: (nb, jnp.minimum(t * rr + rr, H // halo - 1),
                                    0, 0)),
        pl.BlockSpec(packed["w1a"].shape, _full(2)),
        pl.BlockSpec(packed["w1b"].shape, _full(2)),
        pl.BlockSpec(packed["b1a"].shape, _full(2)),
        pl.BlockSpec(packed["b1b"].shape, _full(2)),
        pl.BlockSpec(packed["wm"].shape, _full(4)),
        pl.BlockSpec(packed["bm"].shape, _full(4)),
        pl.BlockSpec(packed["w2"].shape, _full(3)),
        pl.BlockSpec(packed["b2"].shape, _full(2)),
    ]
    out_spec = pl.BlockSpec((1, th, W, out_ch), lambda nb, t: (nb, t, 0, 0))

    out_nhwc = pl.pallas_call(
        kernel,
        out_shape=jax.ShapeDtypeStruct((N, H, W, out_ch), x.dtype),
        grid_spec=pltpu.PrefetchScalarGridSpec(
            num_scalar_prefetch=0,
            grid=(N, H // th),
            in_specs=in_specs,
            out_specs=out_spec,
        ),
        compiler_params=pltpu.CompilerParams(
            dimension_semantics=("parallel", "parallel"),
            vmem_limit_bytes=48 * 1024 * 1024,        # headroom under v7x 64MiB
        ),
    )(x, x, x,
      packed["w1a"], packed["w1b"], packed["b1a"], packed["b1b"],
      packed["wm"], packed["bm"], packed["w2"], packed["b2"])

    return jnp.transpose(out_nhwc, (0, 3, 1, 2))      # NHWC -> NCHW


# ----------------------------------------------------------------------------
# Pure-JAX reference (matches the PyTorch forward) for correctness checking
# ----------------------------------------------------------------------------
def _conv_bn_silu_ref(x, p):
    y = jax.lax.conv_general_dilated(
        x, p["w"], window_strides=(1, 1), padding="SAME",
        dimension_numbers=("NHWC", "HWIO", "NHWC"))
    y = y * p["scale"] + p["bias"]
    return y * jax.nn.sigmoid(y)


def c2f_reference(x_nchw, params, shortcut=False):
    c = params["c"]
    x = jnp.transpose(x_nchw, (0, 2, 3, 1))
    y = _conv_bn_silu_ref(x, params["cv1"])
    ys = [y[..., :c], y[..., c:]]
    for mp in params["m"]:
        h = ys[-1]
        t = _conv_bn_silu_ref(h, mp["cv1"])
        t = _conv_bn_silu_ref(t, mp["cv2"])
        if shortcut:
            t = h + t
        ys.append(t)
    cat = jnp.concatenate(ys, axis=-1)
    out = _conv_bn_silu_ref(cat, params["cv2"])
    return jnp.transpose(out, (0, 3, 1, 2))


if __name__ == "__main__":
    # Small shapes: batch=2, in_ch=4, out_ch=8, n=1, spatial=16x16
    N, IN_CH, OUT_CH, H, W, NBLK = 2, 4, 8, 16, 16, 1

    key = jax.random.PRNGKey(0)
    k_x, k_p = jax.random.split(key)
    x = jax.random.normal(k_x, (N, IN_CH, H, W), jnp.float32)   # NCHW
    params = make_c2f_params(k_p, IN_CH, OUT_CH, n=NBLK, e=0.5)

    # row_tile=8 -> 2 row tiles per image, exercising the halo/masking path.
    out = c2f_forward(x, params, shortcut=False, row_tile=8)    # C2f default
    out = jax.block_until_ready(out)

    assert out.shape == (N, OUT_CH, H, W), out.shape
    assert jnp.all(jnp.isfinite(out))

    ref = c2f_reference(x, params, shortcut=False)
    err = float(jnp.max(jnp.abs(out - ref)))
    assert err < 5e-2, f"max abs error vs reference: {err}"
    print("KERNEL_OK")
</pallas_src>

<mosaic_0001>
module attributes {stable_mosaic.version = 11 : i64} {
  func.func @_c2f_kernel(%arg0: i32, %arg1: i32, %arg2: memref<1x2x16x4xf32, #tpu.memory_space<vmem>>, %arg3: memref<1x8x16x4xf32, #tpu.memory_space<vmem>>, %arg4: memref<1x2x16x4xf32, #tpu.memory_space<vmem>>, %arg5: memref<4x4xbf16, #tpu.memory_space<vmem>>, %arg6: memref<4x4xbf16, #tpu.memory_space<vmem>>, %arg7: memref<1x4xf32, #tpu.memory_space<vmem>>, %arg8: memref<1x4xf32, #tpu.memory_space<vmem>>, %arg9: memref<1x2x36x4xbf16, #tpu.memory_space<vmem>>, %arg10: memref<1x2x1x4xf32, #tpu.memory_space<vmem>>, %arg11: memref<3x4x8xbf16, #tpu.memory_space<vmem>>, %arg12: memref<1x8xf32, #tpu.memory_space<vmem>>, %arg13: memref<1x8x16x8xf32, #tpu.memory_space<vmem>>) attributes {dimension_semantics = [#tpu.dimension_semantics<parallel>, #tpu.dimension_semantics<parallel>], iteration_bounds = array<i64: 2, 2>, scalar_prefetch = 0 : i64, scratch_operands = 0 : i64, tpu.core_type = #tpu.core_type<tc>, window_params = [{transform_indices = @transform_0, window_bounds = array<i64: 1, 2, 16, 4>}, {transform_indices = @transform_1, window_bounds = array<i64: 1, 8, 16, 4>}, {transform_indices = @transform_2, window_bounds = array<i64: 1, 2, 16, 4>}, {pipeline_mode = #tpu.pipeline_mode<synchronous>, transform_indices = @transform_3, window_bounds = array<i64: 4, 4>}, {pipeline_mode = #tpu.pipeline_mode<synchronous>, transform_indices = @transform_4, window_bounds = array<i64: 4, 4>}, {pipeline_mode = #tpu.pipeline_mode<synchronous>, transform_indices = @transform_5, window_bounds = array<i64: 1, 4>}, {pipeline_mode = #tpu.pipeline_mode<synchronous>, transform_indices = @transform_6, window_bounds = array<i64: 1, 4>}, {pipeline_mode = #tpu.pipeline_mode<synchronous>, transform_indices = @transform_7, window_bounds = array<i64: 1, 2, 36, 4>}, {pipeline_mode = #tpu.pipeline_mode<synchronous>, transform_indices = @transform_8, window_bounds = array<i64: 1, 2, 1, 4>}, {pipeline_mode = #tpu.pipeline_mode<synchronous>, transform_indices = @transform_9, window_bounds = array<i64: 3, 4, 8>}, {pipeline_mode = #tpu.pipeline_mode<synchronous>, transform_indices = @transform_10, window_bounds = array<i64: 1, 8>}, {transform_indices = @transform_11, window_bounds = array<i64: 1, 8, 16, 8>}]} {
    %c8_i32 = arith.constant 8 : i32
    %0 = arith.muli %arg1, %c8_i32 : i32
    %c2_i32 = arith.constant 2 : i32
    %1 = arith.subi %0, %c2_i32 : i32
    %c0 = arith.constant 0 : index
    %c0_0 = arith.constant 0 : index
    %c0_1 = arith.constant 0 : index
    %c0_2 = arith.constant 0 : index
    %2 = vector.load %arg2[%c0, %c0_0, %c0_1, %c0_2] : memref<1x2x16x4xf32, #tpu.memory_space<vmem>>, vector<1x2x16x4xf32>
    %3 = vector.shape_cast %2 : vector<1x2x16x4xf32> to vector<2x16x4xf32>
    %c0_3 = arith.constant 0 : index
    %c0_4 = arith.constant 0 : index
    %c0_5 = arith.constant 0 : index
    %c0_6 = arith.constant 0 : index
    %4 = vector.load %arg3[%c0_3, %c0_4, %c0_5, %c0_6] : memref<1x8x16x4xf32, #tpu.memory_space<vmem>>, vector<1x8x16x4xf32>
    %5 = vector.shape_cast %4 : vector<1x8x16x4xf32> to vector<8x16x4xf32>
    %c0_7 = arith.constant 0 : index
    %c0_8 = arith.constant 0 : index
    %c0_9 = arith.constant 0 : index
    %c0_10 = arith.constant 0 : index
    %6 = vector.load %arg4[%c0_7, %c0_8, %c0_9, %c0_10] : memref<1x2x16x4xf32, #tpu.memory_space<vmem>>, vector<1x2x16x4xf32>
    %7 = vector.shape_cast %6 : vector<1x2x16x4xf32> to vector<2x16x4xf32>
    %8 = tpu.concatenate %3, %5, %7 in 0 : vector<2x16x4xf32>, vector<8x16x4xf32>, vector<2x16x4xf32> -> vector<12x16x4xf32>
    %c0_11 = arith.constant 0 : index
    %c0_12 = arith.constant 0 : index
    %c0_13 = arith.constant 0 : index
    %c0_14 = arith.constant 0 : index
    %9 = vector.load %arg3[%c0_11, %c0_12, %c0_13, %c0_14] : memref<1x8x16x4xf32, #tpu.memory_space<vmem>>, vector<1x8x16x4xf32>
    %10 = vector.shape_cast %9 : vector<1x8x16x4xf32> to vector<8x16x4xf32>
    %c0_15 = arith.constant 0 : index
    %c0_16 = arith.constant 0 : index
    %11 = vector.load %arg5[%c0_15, %c0_16] : memref<4x4xbf16, #tpu.memory_space<vmem>>, vector<4x4xbf16>
    %c0_17 = arith.constant 0 : index
    %c0_18 = arith.constant 0 : index
    %12 = vector.load %arg7[%c0_17, %c0_18] : memref<1x4xf32, #tpu.memory_space<vmem>>, vector<1x4xf32>
    %13 = arith.truncf %10 : vector<8x16x4xf32> to vector<8x16x4xbf16>
    %cst = arith.constant dense<0.000000e+00> : vector<8x16x4xf32>
    %14 = tpu.matmul %13, %11, %cst {dimension_numbers = #tpu.dot_dimension_numbers<[2], [0], [0, 1], [1], [0, 0, 0, 1, 1, 1], [], []>} : vector<8x16x4xbf16>, vector<4x4xbf16>, vector<8x16x4xf32> -> vector<8x16x4xf32>
    %15 = vector.shape_cast %12 : vector<1x4xf32> to vector<1x1x4xf32>
    %16 = vector.broadcast %15 : vector<1x1x4xf32> to vector<8x16x4xf32>
    %17 = arith.addf %14, %16 : vector<8x16x4xf32>
    %18 = arith.negf %17 : vector<8x16x4xf32>
    %19 = math.exp %18 : vector<8x16x4xf32>
    %cst_19 = arith.constant 1.000000e+00 : f32
    %20 = vector.broadcast %cst_19 : f32 to vector<8x16x4xf32>
    %21 = arith.addf %20, %19 : vector<8x16x4xf32>
    %22 = arith.divf %20, %21 : vector<8x16x4xf32>
    %23 = arith.mulf %17, %22 : vector<8x16x4xf32>
    %c0_20 = arith.constant 0 : index
    %c0_21 = arith.constant 0 : index
    %24 = vector.load %arg6[%c0_20, %c0_21] : memref<4x4xbf16, #tpu.memory_space<vmem>>, vector<4x4xbf16>
    %c0_22 = arith.constant 0 : index
    %c0_23 = arith.constant 0 : index
    %25 = vector.load %arg8[%c0_22, %c0_23] : memref<1x4xf32, #tpu.memory_space<vmem>>, vector<1x4xf32>
    %26 = arith.truncf %8 : vector<12x16x4xf32> to vector<12x16x4xbf16>
    %cst_24 = arith.constant dense<0.000000e+00> : vector<12x16x4xf32>
    %27 = tpu.matmul %26, %24, %cst_24 {dimension_numbers = #tpu.dot_dimension_numbers<[2], [0], [0, 1], [1], [0, 0, 0, 1, 1, 1], [], []>} : vector<12x16x4xbf16>, vector<4x4xbf16>, vector<12x16x4xf32> -> vector<12x16x4xf32>
    %28 = vector.shape_cast %25 : vector<1x4xf32> to vector<1x1x4xf32>
    %29 = vector.broadcast %28 : vector<1x1x4xf32> to vector<12x16x4xf32>
    %30 = arith.addf %27, %29 : vector<12x16x4xf32>
    %31 = arith.negf %30 : vector<12x16x4xf32>
    %32 = math.exp %31 : vector<12x16x4xf32>
    %cst_25 = arith.constant 1.000000e+00 : f32
    %33 = vector.broadcast %cst_25 : f32 to vector<12x16x4xf32>
    %34 = arith.addf %33, %32 : vector<12x16x4xf32>
    %35 = arith.divf %33, %34 : vector<12x16x4xf32>
    %36 = arith.mulf %30, %35 : vector<12x16x4xf32>
    %37 = tpu.iota {dimensions = array<i32: 0>} : vector<12x1x1xi32>
    %38 = vector.broadcast %1 : i32 to vector<12x1x1xi32>
    %39 = arith.addi %37, %38 : vector<12x1x1xi32>
    %c0_i32 = arith.constant 0 : i32
    %40 = vector.broadcast %c0_i32 : i32 to vector<12x1x1xi32>
    %41 = arith.cmpi sge, %39, %40 : vector<12x1x1xi32>
    %c16_i32 = arith.constant 16 : i32
    %42 = vector.broadcast %c16_i32 : i32 to vector<12x1x1xi32>
    %43 = arith.cmpi slt, %39, %42 : vector<12x1x1xi32>
    %44 = arith.andi %41, %43 : vector<12x1x1xi1>
    %cst_26 = arith.constant 0.000000e+00 : f32
    %45 = vector.broadcast %cst_26 : f32 to vector<12x16x4xf32>
    %46 = vector.shape_cast %44 : vector<12x1x1xi1> to vector<12x1x1xi1>
    %47 = vector.broadcast %46 : vector<12x1x1xi1> to vector<12x16x4xi1>
    %48 = arith.select %47, %36, %45 : vector<12x16x4xi1>, vector<12x16x4xf32>
    %c0_27 = arith.constant 0 : index
    %c0_28 = arith.constant 0 : index
    %c0_29 = arith.constant 0 : index
    %c0_30 = arith.constant 0 : index
    %49 = vector.load %arg9[%c0_27, %c0_28, %c0_29, %c0_30] : memref<1x2x36x4xbf16, #tpu.memory_space<vmem>>, vector<1x1x36x4xbf16>
    %50 = vector.shape_cast %49 : vector<1x1x36x4xbf16> to vector<36x4xbf16>
    %c0_31 = arith.constant 0 : index
    %c0_32 = arith.constant 0 : index
    %c0_33 = arith.constant 0 : index
    %c0_34 = arith.constant 0 : index
    %51 = vector.load %arg10[%c0_31, %c0_32, %c0_33, %c0_34] : memref<1x2x1x4xf32, #tpu.memory_space<vmem>>, vector<1x1x1x4xf32>
    %52 = vector.shape_cast %51 : vector<1x1x1x4xf32> to vector<1x4xf32>
    %cst_35 = arith.constant 0.000000e+00 : f32
    %53 = vector.broadcast %cst_35 : f32 to vector<12x1x4xf32>
    %54 = tpu.concatenate %53, %48, %53 in 1 : vector<12x1x4xf32>, vector<12x16x4xf32>, vector<12x1x4xf32> -> vector<12x18x4xf32>
    %55 = vector.extract_strided_slice %54 {offsets = [0, 0, 0], sizes = [10, 16, 4], strides = [1, 1, 1]} : vector<12x18x4xf32> to vector<10x16x4xf32>
    %56 = vector.extract_strided_slice %54 {offsets = [0, 1, 0], sizes = [10, 16, 4], strides = [1, 1, 1]} : vector<12x18x4xf32> to vector<10x16x4xf32>
    %57 = vector.extract_strided_slice %54 {offsets = [0, 2, 0], sizes = [10, 16, 4], strides = [1, 1, 1]} : vector<12x18x4xf32> to vector<10x16x4xf32>
    %58 = vector.extract_strided_slice %54 {offsets = [1, 0, 0], sizes = [10, 16, 4], strides = [1, 1, 1]} : vector<12x18x4xf32> to vector<10x16x4xf32>
    %59 = vector.extract_strided_slice %54 {offsets = [1, 1, 0], sizes = [10, 16, 4], strides = [1, 1, 1]} : vector<12x18x4xf32> to vector<10x16x4xf32>
    %60 = vector.extract_strided_slice %54 {offsets = [1, 2, 0], sizes = [10, 16, 4], strides = [1, 1, 1]} : vector<12x18x4xf32> to vector<10x16x4xf32>
    %61 = vector.extract_strided_slice %54 {offsets = [2, 0, 0], sizes = [10, 16, 4], strides = [1, 1, 1]} : vector<12x18x4xf32> to vector<10x16x4xf32>
    %62 = vector.extract_strided_slice %54 {offsets = [2, 1, 0], sizes = [10, 16, 4], strides = [1, 1, 1]} : vector<12x18x4xf32> to vector<10x16x4xf32>
    %63 = vector.extract_strided_slice %54 {offsets = [2, 2, 0], sizes = [10, 16, 4], strides = [1, 1, 1]} : vector<12x18x4xf32> to vector<10x16x4xf32>
    %64 = tpu.concatenate %55, %56, %57, %58, %59, %60, %61, %62, %63 in 2 : vector<10x16x4xf32>, vector<10x16x4xf32>, vector<10x16x4xf32>, vector<10x16x4xf32>, vector<10x16x4xf32>, vector<10x16x4xf32>, vector<10x16x4xf32>, vector<10x16x4xf32>, vector<10x16x4xf32> -> vector<10x16x36xf32>
    %65 = arith.truncf %64 : vector<10x16x36xf32> to vector<10x16x36xbf16>
    %cst_36 = arith.constant dense<0.000000e+00> : vector<10x16x4xf32>
    %66 = tpu.matmul %65, %50, %cst_36 {dimension_numbers = #tpu.dot_dimension_numbers<[2], [0], [0, 1], [1], [0, 0, 0, 1, 1, 1], [], []>} : vector<10x16x36xbf16>, vector<36x4xbf16>, vector<10x16x4xf32> -> vector<10x16x4xf32>
    %67 = vector.shape_cast %52 : vector<1x4xf32> to vector<1x1x4xf32>
    %68 = vector.broadcast %67 : vector<1x1x4xf32> to vector<10x16x4xf32>
    %69 = arith.addf %66, %68 : vector<10x16x4xf32>
    %70 = arith.negf %69 : vector<10x16x4xf32>
    %71 = math.exp %70 : vector<10x16x4xf32>
    %cst_37 = arith.constant 1.000000e+00 : f32
    %72 = vector.broadcast %cst_37 : f32 to vector<10x16x4xf32>
    %73 = arith.addf %72, %71 : vector<10x16x4xf32>
    %74 = arith.divf %72, %73 : vector<10x16x4xf32>
    %75 = arith.mulf %69, %74 : vector<10x16x4xf32>
    %c0_i32_38 = arith.constant 0 : i32
    %76 = arith.addi %1, %c0_i32_38 : i32
    %c1_i32 = arith.constant 1 : i32
    %77 = arith.addi %76, %c1_i32 : i32
    %78 = tpu.iota {dimensions = array<i32: 0>} : vector<10x1x1xi32>
    %79 = vector.broadcast %77 : i32 to vector<10x1x1xi32>
    %80 = arith.addi %78, %79 : vector<10x1x1xi32>
    %c0_i32_39 = arith.constant 0 : i32
    %81 = vector.broadcast %c0_i32_39 : i32 to vector<10x1x1xi32>
    %82 = arith.cmpi sge, %80, %81 : vector<10x1x1xi32>
    %c16_i32_40 = arith.constant 16 : i32
    %83 = vector.broadcast %c16_i32_40 : i32 to vector<10x1x1xi32>
    %84 = arith.cmpi slt, %80, %83 : vector<10x1x1xi32>
    %85 = arith.andi %82, %84 : vector<10x1x1xi1>
    %cst_41 = arith.constant 0.000000e+00 : f32
    %86 = vector.broadcast %cst_41 : f32 to vector<10x16x4xf32>
    %87 = vector.shape_cast %85 : vector<10x1x1xi1> to vector<10x1x1xi1>
    %88 = vector.broadcast %87 : vector<10x1x1xi1> to vector<10x16x4xi1>
    %89 = arith.select %88, %75, %86 : vector<10x16x4xi1>, vector<10x16x4xf32>
    %c0_42 = arith.constant 0 : index
    %c1 = arith.constant 1 : index
    %c0_43 = arith.constant 0 : index
    %c0_44 = arith.constant 0 : index
    %90 = vector.load %arg9[%c0_42, %c1, %c0_43, %c0_44] : memref<1x2x36x4xbf16, #tpu.memory_space<vmem>>, vector<1x1x36x4xbf16>
    %91 = vector.shape_cast %90 : vector<1x1x36x4xbf16> to vector<36x4xbf16>
    %c0_45 = arith.constant 0 : index
    %c1_46 = arith.constant 1 : index
    %c0_47 = arith.constant 0 : index
    %c0_48 = arith.constant 0 : index
    %92 = vector.load %arg10[%c0_45, %c1_46, %c0_47, %c0_48] : memref<1x2x1x4xf32, #tpu.memory_space<vmem>>, vector<1x1x1x4xf32>
    %93 = vector.shape_cast %92 : vector<1x1x1x4xf32> to vector<1x4xf32>
    %cst_49 = arith.constant 0.000000e+00 : f32
    %94 = vector.broadcast %cst_49 : f32 to vector<10x1x4xf32>
    %95 = tpu.concatenate %94, %89, %94 in 1 : vector<10x1x4xf32>, vector<10x16x4xf32>, vector<10x1x4xf32> -> vector<10x18x4xf32>
    %96 = vector.extract_strided_slice %95 {offsets = [0, 0, 0], sizes = [8, 16, 4], strides = [1, 1, 1]} : vector<10x18x4xf32> to vector<8x16x4xf32>
    %97 = vector.extract_strided_slice %95 {offsets = [0, 1, 0], sizes = [8, 16, 4], strides = [1, 1, 1]} : vector<10x18x4xf32> to vector<8x16x4xf32>
    %98 = vector.extract_strided_slice %95 {offsets = [0, 2, 0], sizes = [8, 16, 4], strides = [1, 1, 1]} : vector<10x18x4xf32> to vector<8x16x4xf32>
    %99 = vector.extract_strided_slice %95 {offsets = [1, 0, 0], sizes = [8, 16, 4], strides = [1, 1, 1]} : vector<10x18x4xf32> to vector<8x16x4xf32>
    %100 = vector.extract_strided_slice %95 {offsets = [1, 1, 0], sizes = [8, 16, 4], strides = [1, 1, 1]} : vector<10x18x4xf32> to vector<8x16x4xf32>
    %101 = vector.extract_strided_slice %95 {offsets = [1, 2, 0], sizes = [8, 16, 4], strides = [1, 1, 1]} : vector<10x18x4xf32> to vector<8x16x4xf32>
    %102 = vector.extract_strided_slice %95 {offsets = [2, 0, 0], sizes = [8, 16, 4], strides = [1, 1, 1]} : vector<10x18x4xf32> to vector<8x16x4xf32>
    %103 = vector.extract_strided_slice %95 {offsets = [2, 1, 0], sizes = [8, 16, 4], strides = [1, 1, 1]} : vector<10x18x4xf32> to vector<8x16x4xf32>
    %104 = vector.extract_strided_slice %95 {offsets = [2, 2, 0], sizes = [8, 16, 4], strides = [1, 1, 1]} : vector<10x18x4xf32> to vector<8x16x4xf32>
    %105 = tpu.concatenate %96, %97, %98, %99, %100, %101, %102, %103, %104 in 2 : vector<8x16x4xf32>, vector<8x16x4xf32>, vector<8x16x4xf32>, vector<8x16x4xf32>, vector<8x16x4xf32>, vector<8x16x4xf32>, vector<8x16x4xf32>, vector<8x16x4xf32>, vector<8x16x4xf32> -> vector<8x16x36xf32>
    %106 = arith.truncf %105 : vector<8x16x36xf32> to vector<8x16x36xbf16>
    %cst_50 = arith.constant dense<0.000000e+00> : vector<8x16x4xf32>
    %107 = tpu.matmul %106, %91, %cst_50 {dimension_numbers = #tpu.dot_dimension_numbers<[2], [0], [0, 1], [1], [0, 0, 0, 1, 1, 1], [], []>} : vector<8x16x36xbf16>, vector<36x4xbf16>, vector<8x16x4xf32> -> vector<8x16x4xf32>
    %108 = vector.shape_cast %93 : vector<1x4xf32> to vector<1x1x4xf32>
    %109 = vector.broadcast %108 : vector<1x1x4xf32> to vector<8x16x4xf32>
    %110 = arith.addf %107, %109 : vector<8x16x4xf32>
    %111 = arith.negf %110 : vector<8x16x4xf32>
    %112 = math.exp %111 : vector<8x16x4xf32>
    %cst_51 = arith.constant 1.000000e+00 : f32
    %113 = vector.broadcast %cst_51 : f32 to vector<8x16x4xf32>
    %114 = arith.addf %113, %112 : vector<8x16x4xf32>
    %115 = arith.divf %113, %114 : vector<8x16x4xf32>
    %116 = arith.mulf %110, %115 : vector<8x16x4xf32>
    %c0_i32_52 = arith.constant 0 : i32
    %117 = arith.addi %1, %c0_i32_52 : i32
    %c2_i32_53 = arith.constant 2 : i32
    %118 = arith.addi %117, %c2_i32_53 : i32
    %119 = tpu.iota {dimensions = array<i32: 0>} : vector<8x1x1xi32>
    %120 = vector.broadcast %118 : i32 to vector<8x1x1xi32>
    %121 = arith.addi %119, %120 : vector<8x1x1xi32>
    %c0_i32_54 = arith.constant 0 : i32
    %122 = vector.broadcast %c0_i32_54 : i32 to vector<8x1x1xi32>
    %123 = arith.cmpi sge, %121, %122 : vector<8x1x1xi32>
    %c16_i32_55 = arith.constant 16 : i32
    %124 = vector.broadcast %c16_i32_55 : i32 to vector<8x1x1xi32>
    %125 = arith.cmpi slt, %121, %124 : vector<8x1x1xi32>
    %126 = arith.andi %123, %125 : vector<8x1x1xi1>
    %cst_56 = arith.constant 0.000000e+00 : f32
    %127 = vector.broadcast %cst_56 : f32 to vector<8x16x4xf32>
    %128 = vector.shape_cast %126 : vector<8x1x1xi1> to vector<8x1x1xi1>
    %129 = vector.broadcast %128 : vector<8x1x1xi1> to vector<8x16x4xi1>
    %130 = arith.select %129, %116, %127 : vector<8x16x4xi1>, vector<8x16x4xf32>
    %c0_57 = arith.constant 0 : index
    %c0_58 = arith.constant 0 : index
    %c0_59 = arith.constant 0 : index
    %131 = vector.load %arg11[%c0_57, %c0_58, %c0_59] : memref<3x4x8xbf16, #tpu.memory_space<vmem>>, vector<1x4x8xbf16>
    %132 = vector.shape_cast %131 : vector<1x4x8xbf16> to vector<4x8xbf16>
    %c0_60 = arith.constant 0 : index
    %c0_61 = arith.constant 0 : index
    %133 = vector.load %arg12[%c0_60, %c0_61] : memref<1x8xf32, #tpu.memory_space<vmem>>, vector<1x8xf32>
    %134 = arith.truncf %23 : vector<8x16x4xf32> to vector<8x16x4xbf16>
    %cst_62 = arith.constant dense<0.000000e+00> : vector<8x16x8xf32>
    %135 = tpu.matmul %134, %132, %cst_62 {dimension_numbers = #tpu.dot_dimension_numbers<[2], [0], [0, 1], [1], [0, 0, 0, 1, 1, 1], [], []>} : vector<8x16x4xbf16>, vector<4x8xbf16>, vector<8x16x8xf32> -> vector<8x16x8xf32>
    %136 = vector.shape_cast %133 : vector<1x8xf32> to vector<1x1x8xf32>
    %137 = vector.broadcast %136 : vector<1x1x8xf32> to vector<8x16x8xf32>
    %138 = arith.addf %135, %137 : vector<8x16x8xf32>
    %139 = vector.extract_strided_slice %48 {offsets = [2, 0, 0], sizes = [8, 16, 4], strides = [1, 1, 1]} : vector<12x16x4xf32> to vector<8x16x4xf32>
    %c1_63 = arith.constant 1 : index
    %c0_64 = arith.constant 0 : index
    %c0_65 = arith.constant 0 : index
    %140 = vector.load %arg11[%c1_63, %c0_64, %c0_65] : memref<3x4x8xbf16, #tpu.memory_space<vmem>>, vector<1x4x8xbf16>
    %141 = vector.shape_cast %140 : vector<1x4x8xbf16> to vector<4x8xbf16>
    %142 = arith.truncf %139 : vector<8x16x4xf32> to vector<8x16x4xbf16>
    %cst_66 = arith.constant dense<0.000000e+00> : vector<8x16x8xf32>
    %143 = tpu.matmul %142, %141, %cst_66 {dimension_numbers = #tpu.dot_dimension_numbers<[2], [0], [0, 1], [1], [0, 0, 0, 1, 1, 1], [], []>} : vector<8x16x4xbf16>, vector<4x8xbf16>, vector<8x16x8xf32> -> vector<8x16x8xf32>
    %144 = arith.addf %138, %143 : vector<8x16x8xf32>
    %c2 = arith.constant 2 : index
    %c0_67 = arith.constant 0 : index
    %c0_68 = arith.constant 0 : index
    %145 = vector.load %arg11[%c2, %c0_67, %c0_68] : memref<3x4x8xbf16, #tpu.memory_space<vmem>>, vector<1x4x8xbf16>
    %146 = vector.shape_cast %145 : vector<1x4x8xbf16> to vector<4x8xbf16>
    %147 = arith.truncf %130 : vector<8x16x4xf32> to vector<8x16x4xbf16>
    %cst_69 = arith.constant dense<0.000000e+00> : vector<8x16x8xf32>
    %148 = tpu.matmul %147, %146, %cst_69 {dimension_numbers = #tpu.dot_dimension_numbers<[2], [0], [0, 1], [1], [0, 0, 0, 1, 1, 1], [], []>} : vector<8x16x4xbf16>, vector<4x8xbf16>, vector<8x16x8xf32> -> vector<8x16x8xf32>
    %149 = arith.addf %144, %148 : vector<8x16x8xf32>
    %150 = arith.negf %149 : vector<8x16x8xf32>
    %151 = math.exp %150 : vector<8x16x8xf32>
    %cst_70 = arith.constant 1.000000e+00 : f32
    %152 = vector.broadcast %cst_70 : f32 to vector<8x16x8xf32>
    %153 = arith.addf %152, %151 : vector<8x16x8xf32>
    %154 = arith.divf %152, %153 : vector<8x16x8xf32>
    %155 = arith.mulf %149, %154 : vector<8x16x8xf32>
    %c0_71 = arith.constant 0 : index
    %c0_72 = arith.constant 0 : index
    %c0_73 = arith.constant 0 : index
    %c0_74 = arith.constant 0 : index
    %156 = vector.load %arg13[%c0_71, %c0_72, %c0_73, %c0_74] : memref<1x8x16x8xf32, #tpu.memory_space<vmem>>, vector<1x8x16x8xf32>
    %157 = vector.shape_cast %156 : vector<1x8x16x8xf32> to vector<8x16x8xf32>
    %158 = vector.shape_cast %155 : vector<8x16x8xf32> to vector<1x8x16x8xf32>
    tpu.vector_store %arg13[%c0_71, %c0_72, %c0_73, %c0_74], %158 {strides = array<i32>} : memref<1x8x16x8xf32, #tpu.memory_space<vmem>>, vector<1x8x16x8xf32>,
    return
  }
  func.func @transform_0(%arg0: i32, %arg1: i32) -> (i32, i32, i32, i32) {
    %c4_i32 = arith.constant 4 : i32
    %0 = arith.muli %arg1, %c4_i32 : i32
    %c1_i32 = arith.constant 1 : i32
    %1 = arith.subi %0, %c1_i32 : i32
    %c0_i32 = arith.constant 0 : i32
    %2 = arith.maxsi %1, %c0_i32 : i32
    %c0_i32_0 = arith.constant 0 : i32
    %c0_i32_1 = arith.constant 0 : i32
    %c0_i32_2 = arith.constant 0 : i32
    return %arg0, %2, %c0_i32_0, %c0_i32_1 : i32, i32, i32, i32
  }
  func.func @transform_1(%arg0: i32, %arg1: i32) -> (i32, i32, i32, i32) {
    %c0_i32 = arith.constant 0 : i32
    %c0_i32_0 = arith.constant 0 : i32
    %c0_i32_1 = arith.constant 0 : i32
    return %arg0, %arg1, %c0_i32, %c0_i32_0 : i32, i32, i32, i32
  }
  func.func @transform_2(%arg0: i32, %arg1: i32) -> (i32, i32, i32, i32) {
    %c4_i32 = arith.constant 4 : i32
    %0 = arith.muli %arg1, %c4_i32 : i32
    %c4_i32_0 = arith.constant 4 : i32
    %1 = arith.addi %0, %c4_i32_0 : i32
    %c7_i32 = arith.constant 7 : i32
    %2 = arith.minsi %1, %c7_i32 : i32
    %c0_i32 = arith.constant 0 : i32
    %c0_i32_1 = arith.constant 0 : i32
    %c0_i32_2 = arith.constant 0 : i32
    return %arg0, %2, %c0_i32, %c0_i32_1 : i32, i32, i32, i32
  }
  func.func @transform_3(%arg0: i32, %arg1: i32) -> (i32, i32) {
    %c0_i32 = arith.constant 0 : i32
    %c0_i32_0 = arith.constant 0 : i32
    %c0_i32_1 = arith.constant 0 : i32
    return %c0_i32, %c0_i32_0 : i32, i32
  }
  func.func @transform_4(%arg0: i32, %arg1: i32) -> (i32, i32) {
    %c0_i32 = arith.constant 0 : i32
    %c0_i32_0 = arith.constant 0 : i32
    %c0_i32_1 = arith.constant 0 : i32
    return %c0_i32, %c0_i32_0 : i32, i32
  }
  func.func @transform_5(%arg0: i32, %arg1: i32) -> (i32, i32) {
    %c0_i32 = arith.constant 0 : i32
    %c0_i32_0 = arith.constant 0 : i32
    %c0_i32_1 = arith.constant 0 : i32
    return %c0_i32, %c0_i32_0 : i32, i32
  }
  func.func @transform_6(%arg0: i32, %arg1: i32) -> (i32, i32) {
    %c0_i32 = arith.constant 0 : i32
    %c0_i32_0 = arith.constant 0 : i32
    %c0_i32_1 = arith.constant 0 : i32
    return %c0_i32, %c0_i32_0 : i32, i32
  }
  func.func @transform_7(%arg0: i32, %arg1: i32) -> (i32, i32, i32, i32) {
    %c0_i32 = arith.constant 0 : i32
    %c0_i32_0 = arith.constant 0 : i32
    %c0_i32_1 = arith.constant 0 : i32
    %c0_i32_2 = arith.constant 0 : i32
    %c0_i32_3 = arith.constant 0 : i32
    return %c0_i32, %c0_i32_0, %c0_i32_1, %c0_i32_2 : i32, i32, i32, i32
  }
  func.func @transform_8(%arg0: i32, %arg1: i32) -> (i32, i32, i32, i32) {
    %c0_i32 = arith.constant 0 : i32
    %c0_i32_0 = arith.constant 0 : i32
    %c0_i32_1 = arith.constant 0 : i32
    %c0_i32_2 = arith.constant 0 : i32
    %c0_i32_3 = arith.constant 0 : i32
    return %c0_i32, %c0_i32_0, %c0_i32_1, %c0_i32_2 : i32, i32, i32, i32
  }
  func.func @transform_9(%arg0: i32, %arg1: i32) -> (i32, i32, i32) {
    %c0_i32 = arith.constant 0 : i32
    %c0_i32_0 = arith.constant 0 : i32
    %c0_i32_1 = arith.constant 0 : i32
    %c0_i32_2 = arith.constant 0 : i32
    return %c0_i32, %c0_i32_0, %c0_i32_1 : i32, i32, i32
  }
  func.func @transform_10(%arg0: i32, %arg1: i32) -> (i32, i32) {
    %c0_i32 = arith.constant 0 : i32
    %c0_i32_0 = arith.constant 0 : i32
    %c0_i32_1 = arith.constant 0 : i32
    return %c0_i32, %c0_i32_0 : i32, i32
  }
  func.func @transform_11(%arg0: i32, %arg1: i32) -> (i32, i32, i32, i32) {
    %c0_i32 = arith.constant 0 : i32
    %c0_i32_0 = arith.constant 0 : i32
    %c0_i32_1 = arith.constant 0 : i32
    return %arg0, %arg1, %c0_i32, %c0_i32_0 : i32, i32, i32, i32
  }
}

</mosaic_0001>

<bundles_post_ra>
// kernel: tpu_custom_call.1
= control target key start
LH: loop header
LB: loop body
LE: loop exit
PB: predicated region body
PF: predicated region fallthrough
CT: control target
= control target key end

     0   :  { %s6091_s17 = smov 0   ;;  %s6093_s18 = smov 0   ;;  %s8312_s0 = inlined_call_operand.vmem [shape: f32[2,16,16,4], index: 0, kind: input, shape index: {}]   ;;  %s8313_s1 = inlined_call_operand.vmem [shape: f32[2,16,16,4], index: 1, kind: input, shape index: {}]   ;;  %s8314_s2 = inlined_call_operand.vmem [shape: f32[2,16,16,4], index: 2, kind: input, shape index: {}]   ;;  %s8315_s3 = inlined_call_operand.vmem [shape: bf16[4,4], index: 3, kind: input, shape index: {}]   ;;  %s8316_s4 = inlined_call_operand.vmem [shape: bf16[4,4], index: 4, kind: input, shape index: {}]   ;;  %s8317_s5 = inlined_call_operand.vmem [shape: f32[1,4], index: 5, kind: input, shape index: {}]   ;;  %s8318_s6 = inlined_call_operand.vmem [shape: f32[1,4], index: 6, kind: input, shape index: {}]   ;;  %s8319_s7 = inlined_call_operand.vmem [shape: bf16[1,2,36,4], index: 7, kind: input, shape index: {}]   ;;  %s8320_s8 = inlined_call_operand.vmem [shape: f32[1,2,1,4], index: 8, kind: input, shape index: {}]   ;;  %s8321_s9 = inlined_call_operand.vmem [shape: bf16[3,4,8], index: 9, kind: input, shape index: {}]   ;;  %s8322_s10 = inlined_call_operand.vmem [shape: f32[1,8], index: 10, kind: input, shape index: {}]   ;;  %s8323_s11 = inlined_call_operand.vmem [shape: f32[2,16,16,8], index: 11, kind: output, shape index: {}]  }
   0x1   :  { %s6095_s19 = smov 0   ;;  %s6097_s20 = smov 0  }
   0x2   :  { %s6099_s21 = smov 0  }
   0x3 LB: > { %s30_s22 = sadd.s32 1, %s6013_s19  ;;  %s33_s23 = sadd.s32 1, %s6017_s20  ;;  %s6021_s21 = sphi %s6099_s21, %s21_s21   ;;  %s6017_s20 = sphi %s6097_s20, %s8413_s20   ;;  %s6013_s19 = sphi %s6095_s19, %s8412_s19   ;;  %s6009_s18 = sphi %s6093_s18, %s8411_s18   ;;  %s6005_s17 = sphi %s6091_s17, %s8410_s17  }
   0x4   : > { %p31_p0 = scmp.ge.s32.totalorder %s30_s22, 2  ;;  %p4369_p1 = scmp.ge.s32.totalorder %s6021_s21, 1 }
   0x5   : > { %p427_p2 = scmp.lt.s32.totalorder %s6021_s21, 5 }
   0x6   : > { %s8415_s22 = smov (%p31_p0, %s30_s22), 0  ;;  %s8417_s23 = smov (!%p31_p0, %s33_s23), %s6017_s20 }
   0x7   : > { %p428_p3 = pnand %p4369_p1, %p427_p2  ;;  %p35_p4 = scmp.ge.s32.totalorder %s8417_s23, 2 }
   0x8   : > { %v592_v0 = vld [vmem:[%s8315_s3] sm:$0x3] (!%p428_p3)  ;;  %vm633_vm0 = vcmask (!%p428_p3), 1041408   ;;  %p510_p5 = scmp.lt.s32.totalorder (!%p428_p3), %s6009_s18, 1  ;;  %s6127_s26 = sshll.u32 (!%p428_p3), %s6005_s17, 3  ;;  %vm608_vm1 = vcmask (!%p428_p3), 31744  }
   0x9   : > { %s8419_s23 = smov (%p35_p4, %s8417_s23), 0  ;;  %431 = sbr.rel (%p428_p3) target bundleno = 1479 (0x5c7), region = 64 }
   0xa   : > { %4833 = vmatprep.subr.msk.bf16.mxu0 (!%p428_p3), %vm633_vm0, %v592_v0  ;;  %v635_v1 = vsel (!%p428_p3), %vm633_vm0, %v592_v0, 0  ;;  %p527_p6 = scmp.lt.s32.totalorder (!%p428_p3), %s6127_s26, 15  ;;  %v846_v2 = vld [vmem:[%s8316_s4] sm:$0x3] (!%p428_p3)  ;;  %s4370_s29 = sshll.u32 (!%p428_p3), %s6005_s17, 2  ;;  %vm1296_vm6 = vcmask (!%p428_p3), 1040384  }
   0xb   : > { %4640 = vmatpush3.bf16.msra.mxu0 (!%p428_p3), %v635_v1  ;;  %4834 = vmatprep.subr.msk.bf16.mxu1 (!%p428_p3), %vm633_vm0, %v846_v2  ;;  %v871_v3 = vsel (!%p428_p3), %vm633_vm0, %v846_v2, 0  ;;  %s4371_s13 = sadd.s32 (!%p428_p3), 4294967295, %s4370_s29  ;;  %v3650_v40 = vld [vmem:[%s8321_s9] sm:$0x3] (!%p428_p3)  ;;  %v6208_v42 = vld [vmem:[%s8321_s9 + $0x2] sm:$0x3] (!%p428_p3) }
   0xc   : > { %4658 = vmatpush3.bf16.msra.mxu1 (!%p428_p3), %v871_v3  ;;  %p507_p7 = scmp.gt.s32.totalorder (!%p428_p3), %s4371_s13, 0  ;;  %4837 = vmatprep.subr.msk.bf16.mxu0 (!%p428_p3), %vm633_vm0, %v3650_v40  ;;  %v3691_v41 = vsel (!%p428_p3), %vm633_vm0, %v3650_v40, 0  ;;  %v6215_v43 = vld [vmem:[%s8317_s5] ss:$0 sm:$0xff] (!%p428_p3)  ;;  %vm1522_vm11 = vcmask (!%p428_p3), 1045504   ;;  %vm1411_vm14 = vcmask (!%p428_p3), 1046528  }
   0xd   : > { %v6236_v57 = vld [vmem:[%s8318_s6] ss:$0 sm:$0xff] (!%p428_p3)  ;;  %s6027_s24 = smov (!%p428_p3), 24   ;;  %s6028_s25 = smov (!%p428_p3), 20  }
  0x10   : > { %s8421_s18 = smov (!%p510_p5, %s6009_s18), 1  ;;  %s8423_s13 = smov (!%p507_p7, %s4371_s13), 0 }
  0x11   : > { %s528_s30 = scalar_select %p527_p6, %s6127_s26, 15 }
  0x12   : > { %s6139_s12 = sshll.u32 %s8421_s18, 5  ;;  %s4372_s18 = sshll.u32 %s8423_s13, 1 }
  0x13   : > { %s4377_s14 = sshll.u32 %s528_s30, 1  ;;  %p512_p8 = scmp.lt.s32.totalorder %s4372_s18, 15 }
  0x14   : > { %s6144_s15 = sadd.s32 %s4377_s14, %s6139_s12  ;;  %s536_s30 = sadd.s32 4, %s4370_s29 }
  0x15   : > { %s8324_s16 = sshll.u32 %s6144_s15, 3  ;;  %s8425_s18 = smov (!%p512_p8, %s4372_s18), 15 }
  0x16   : > { %s6152_s27 = scalar_lea.vmem %s8313_s1, %s8324_s16  ;;  %s4373_s28 = sshll.u32 %s8425_s18, 1 }
  0x17   : > { %v572_v4 = vld [vmem:[%s6152_s27] sm:$0xff]  ;;  %v573_v5 = vld [vmem:[%s6152_s27 + $0x8] sm:$0xff]  ;;  %v574_v6 = vld [vmem:[%s6152_s27 + $0x10] sm:$0xff]  ;;  %s516_s14 = sadd.s32 %s6139_s12, %s4373_s28  ;;  %p537_p9 = scmp.lt.s32.totalorder %s536_s30, 7 }
  0x18   : > { %v594_v7 = vpack.c.bf16 %v573_v5, %v572_v4  ;;  %v575_v8 = vld [vmem:[%s6152_s27 + $0x18] sm:$0xff]  ;;  %v576_v9 = vld [vmem:[%s6152_s27 + $0x20] sm:$0xff]  ;;  %v577_v10 = vld [vmem:[%s6152_s27 + $0x28] sm:$0xff]  ;;  %s4375_s13 = sshll.u32 %s516_s14, 3  ;;  %s6023_s28 = smov 12  }
  0x19   : > { %v595_v11 = vpack.c.bf16 %v575_v8, %v574_v6  ;;  %v596_v12 = vpack.c.bf16 %v577_v10, %v576_v9  ;;  %v578_v13 = vld [vmem:[%s6152_s27 + $0x30] sm:$0xff]  ;;  %v579_v14 = vld [vmem:[%s6152_s27 + $0x38] sm:$0xff]  ;;  %v580_v15 = vld [vmem:[%s6152_s27 + $0x40] sm:$0xff]  ;;  %s518_s16 = scalar_lea.vmem %s8312_s0, %s4375_s13  ;;  %s8427_s30 = smov (!%p537_p9, %s536_s30), 7 }
  0x1a   : > { %4641 = vmatprep.mubr.msk.bf16.mxu0 %vm608_vm1, %v594_v7  ;;  %v581_v16 = vld [vmem:[%s6152_s27 + $0x48] sm:$0xff]  ;;  %v597_v17 = vpack.c.bf16 %v579_v14, %v578_v13  ;;  %v568_v19 = vld [vmem:[%s518_s16] sm:$0xff]  ;;  %v570_v21 = vld [vmem:[%s518_s16 + $0x10] sm:$0xff]  ;;  %s4381_s17 = sshll.u32 %s8427_s30, 1  ;;  %s6024_s30 = smov 8  }
  0x1b   : > { %4642 = vmatmul.mubr.msk.bf16.vlgmr.msra.gmra.mrb[0].mxu0 %vm608_vm1, %v595_v11  ;;  %v598_v18 = vpack.c.bf16 %v581_v16, %v580_v15  ;;  %v569_v20 = vld [vmem:[%s518_s16 + $0x8] sm:$0xff]  ;;  %v571_v23 = vld [vmem:[%s518_s16 + $0x18] sm:$0xff]  ;;  %v582_v25 = vld [vmem:[%s6152_s27 + $0x50] sm:$0xff]  ;;  %p542_p10 = scmp.lt.s32.totalorder %s4381_s17, 15 }
  0x1c   : > { %4645 = vmatprep.mubr.msk.bf16.mxu0 %vm608_vm1, %v596_v12  ;;  %v848_v22 = vpack.c.bf16 %v569_v20, %v568_v19  ;;  %v849_v24 = vpack.c.bf16 %v571_v23, %v570_v21  ;;  %v583_v26 = vld [vmem:[%s6152_s27 + $0x58] sm:$0xff]  ;;  %v584_v27 = vld [vmem:[%s6152_s27 + $0x60] sm:$0xff]  ;;  %v585_v28 = vld [vmem:[%s6152_s27 + $0x68] sm:$0xff]  ;;  %4732 = vmatpush3.bf16.msra.mxu0 %v3691_v41 }
  0x1d   : > { %v599_v29 = vpack.c.bf16 %v583_v26, %v582_v25  ;;  %v600_v30 = vpack.c.bf16 %v585_v28, %v584_v27  ;;  %v586_v31 = vld [vmem:[%s6152_s27 + $0x70] sm:$0xff]  ;;  %v587_v32 = vld [vmem:[%s6152_s27 + $0x78] sm:$0xff]  ;;  %s8429_s17 = smov (!%p542_p10, %s4381_s17), 15  ;;  %4838 = vmatprep.subr.msk.bf16.mxu0 %vm633_vm0, %v6208_v42 }
  0x1e   : > { %4659 = vmatprep.mubr.msk.bf16.mxu1 %vm608_vm1, %v848_v22  ;;  %v601_v33 = vpack.c.bf16 %v587_v32, %v586_v31  ;;  %s4382_s29 = sshll.u32 %s8429_s17, 1  ;;  %s6029_s17 = smov 28  }
  0x1f   : > { %4660 = vmatmul.mubr.msk.bf16.vlgmr.msra.gmra.mrb[0].mxu1 %vm608_vm1, %v849_v24  ;;  %s546_s16 = sadd.s32 %s4382_s29, %s6139_s12  ;;  %s6026_s12 = smov 16  }
  0x20   : > { %4663 = vmatprep.mubr.msk.bf16.mxu1 %vm608_vm1, %v594_v7  ;;  %s4384_s18 = sshll.u32 %s546_s16, 3  ;;  %s6030_s29 = smov 32  }
  0x21   : > { %s548_s14 = scalar_lea.vmem %s8314_s2, %s4384_s18  ;;  %s4390_s18 = sadd.s32 4294967294, %s6127_s26 }
  0x22   : > { %v588_v34 = vld [vmem:[%s548_s14] sm:$0xff]  ;;  %v589_v35 = vld [vmem:[%s548_s14 + $0x8] sm:$0xff]  ;;  %v590_v37 = vld [vmem:[%s548_s14 + $0x10] sm:$0xff]  ;;  %v6278_v32 = vstv %s4390_s18  ;;  %s2502_s16 = sadd.s32 4294967295, %s6127_s26 }
  0x23   : > { %4646 = vmatmul.mubr.msk.bf16.gmra.mrb[4].mxu0 %vm608_vm1, %v597_v17  ;;  %v850_v36 = vpack.c.bf16 %v589_v35, %v588_v34  ;;  %v591_v38 = vld [vmem:[%s548_s14 + $0x18] sm:$0xff]  ;;  %vm1182_vm4 = vcmp.ge.s32.totalorder %v6278_v32, 0  ;;  %vm1194_vm5 = vcmp.lt.s32.totalorder %v6278_v32, 16  ;;  %s6025_s14 = smov 4  }
  0x24   : > { %4649 = vmatprep.mubr.msk.bf16.mxu0 %vm608_vm1, %v598_v18  ;;  %v851_v39 = vpack.c.bf16 %v591_v38, %v590_v37  ;;  %vm6398_vm8 = vmand %vm1182_vm4, %vm1194_vm5 }
  0x27   : > { %4664 = vmatmul.mubr.msk.bf16.gmra.mrb[4].mxu1 %vm608_vm1, %v595_v11 }
  0x28   : > { %4667 = vmatprep.mubr.msk.bf16.mxu1 %vm608_vm1, %v596_v12 }
  0x2b   : > { %4650 = vmatmul.mubr.msk.bf16.gmra.mrb[8].mxu0 %vm608_vm1, %v599_v29 }
  0x2c   : > { %4653 = vmatprep.mubr.msk.bf16.mxu0 %vm608_vm1, %v600_v30 }
  0x2f   : > { %4668 = vmatmul.mubr.msk.bf16.gmra.mrb[8].mxu1 %vm608_vm1, %v597_v17 }
  0x30   : > { %4671 = vmatprep.mubr.msk.bf16.mxu1 %vm608_vm1, %v598_v18 }
  0x33   : > { %4654 = vmatmul.mubr.msk.bf16.gmra.mrb[12].mxu0 %vm608_vm1, %v601_v33 }
  0x37   : > { %4672 = vmatmul.mubr.msk.bf16.gmra.mrb[12].mxu1 %vm608_vm1, %v599_v29 }
  0x38   : > { %4675 = vmatprep.mubr.msk.bf16.mxu1 %vm608_vm1, %v600_v30 }
  0x3f   : > { %4676 = vmatmul.mubr.msk.bf16.gmra.mrb[16].mxu1 %vm608_vm1, %v601_v33 }
  0x40   : > { %4679 = vmatprep.mubr.msk.bf16.mxu1 %vm608_vm1, %v850_v36 }
  0x47   : > { %4680 = vmatmul.mubr.msk.bf16.gmra.mrb[20].mxu1 %vm608_vm1, %v851_v39  ;;  %v6285_v39 = vadd.s32 1, %v6278_v32 }
  0x49   : > { %vm1183_vm2 = vcmp.ge.s32.totalorder %v6285_v39, 0  ;;  %vm1195_vm3 = vcmp.lt.s32.totalorder %v6285_v39, 16 }
  0x4a   : > { %vm6375_vm7 = vmand %vm1183_vm2, %vm1195_vm3 }
  0xee   : > { %v4643_v44 = vpop.f32.mrb[0].mxu0 }
  0xef   : > { %v6218_v45 = vadd.f32 %v4643_v44, %v6215_v43  ;;  %v671_v46 = vpop.f32.mrb[1].mxu0 }
  0xf0   : > { %v6221_v47 = vadd.f32 %v6215_v43, %v671_v46  ;;  %v4644_v48 = vpop.f32.mrb[2].mxu0 }
  0xf1   : > { %v4402_v49 = vmul.f32 -1.442695, %v6218_v45  ;;  %v6225_v50 = vadd.f32 %v4644_v48, %v6215_v43  ;;  %v674_v51 = vpop.f32.mrb[3].mxu0 }
  0xf2   : > { %v4400_v52 = vmul.f32 -1.442695, %v6221_v47  ;;  %v6229_v53 = vadd.f32 %v6215_v43, %v674_v51  ;;  %v4661_v62 = vpop.f32.mrb[0].mxu1 }
  0xf3   : > { %5614 = vpow2.f32 %v4402_v49  ;;  %v4403_v54 = vmul.f32 -1.442695, %v6225_v50  ;;  %v6249_v2 = vadd.f32 %v4661_v62, %v6236_v57  ;;  %v907_v3 = vpop.f32.mrb[1].mxu1 }
  0xf4   : > { %5616 = vpow2.f32 %v4400_v52  ;;  %v4401_v55 = vmul.f32 -1.442695, %v6229_v53  ;;  %v6253_v5 = vadd.f32 %v6236_v57, %v907_v3  ;;  %v4662_v6 = vpop.f32.mrb[2].mxu1 }
  0xf5   : > { %5618 = vpow2.f32 %v4403_v54  ;;  %v4431_v8 = vmul.f32 -1.442695, %v6249_v2  ;;  %v6258_v9 = vadd.f32 %v4662_v6, %v6236_v57  ;;  %v910_v10 = vpop.f32.mrb[3].mxu1  ;;  %v6302_v6 = vadd.s32 3, %v6278_v32 }
  0xf6   : > { %5620 = vpow2.f32 %v4401_v55  ;;  %v4647_v56 = vpop.f32.mrb[4].mxu0  ;;  %v4429_v12 = vmul.f32 -1.442695, %v6253_v5  ;;  %v6262_v13 = vadd.f32 %v6236_v57, %v910_v10 }
  0xf7   : > { %v6239_v58 = vadd.f32 %v4647_v56, %v6215_v43  ;;  %v687_v59 = vpop.f32.mrb[5].mxu0  ;;  %v4432_v23 = vmul.f32 -1.442695, %v6258_v9  ;;  %vm1185_vm9 = vcmp.ge.s32.totalorder %v6302_v6, 0  ;;  %vm1197_vm10 = vcmp.lt.s32.totalorder %v6302_v6, 16 }
  0xf8   : > { %v6242_v60 = vadd.f32 %v6215_v43, %v687_v59  ;;  %v4648_v61 = vpop.f32.mrb[6].mxu0  ;;  %v4430_v26 = vmul.f32 -1.442695, %v6262_v13  ;;  %vm6485_vm15 = vmand %vm1185_vm9, %vm1197_vm10 }
  0xf9   : > { %v4406_v63 = vmul.f32 -1.442695, %v6239_v58  ;;  %v6246_v0 = vadd.f32 %v4648_v61, %v6215_v43  ;;  %v690_v1 = vpop.f32.mrb[7].mxu0 }
  0xfa   : > { %v4404_v4 = vmul.f32 -1.442695, %v6242_v60  ;;  %v6265_v16 = vadd.f32 %v6215_v43, %v690_v1  ;;  %v4665_v27 = vpop.f32.mrb[4].mxu1 }
  0xfb   : > { %5622 = vpow2.f32 %v4406_v63  ;;  %v4407_v7 = vmul.f32 -1.442695, %v6246_v0  ;;  %v6276_v30 = vadd.f32 %v4665_v27, %v6236_v57  ;;  %v923_v31 = vpop.f32.mrb[5].mxu1 }
  0xfc   : > { %5624 = vpow2.f32 %v4404_v4  ;;  %v4405_v29 = vmul.f32 -1.442695, %v6265_v16  ;;  %v4666_v33 = vpop.f32.mrb[6].mxu1  ;;  %v6282_v37 = vadd.f32 %v6236_v57, %v923_v31 }
  0xfd   : > { %v5615_v11 = vpop.eup %5614  ;;  %5626 = vpow2.f32 %v4407_v7  ;;  %v4435_v34 = vmul.f32 -1.442695, %v6276_v30  ;;  %v926_v35 = vpop.f32.mrb[7].mxu1  ;;  %v6291_v49 = vadd.f32 %v4666_v33, %v6236_v57 }
  0xfe   : > { %v5617_v14 = vpop.eup %5616  ;;  %v784_v15 = vadd.f32 1.0, %v5615_v11  ;;  %5628 = vpow2.f32 %v4431_v8  ;;  %v4651_v17 = vpop.f32.mrb[8].mxu0  ;;  %v4433_v62 = vmul.f32 -1.442695, %v6282_v37 }
  0xff   : > { %v5619_v18 = vpop.eup %5618  ;;  %v782_v19 = vadd.f32 1.0, %v5617_v14  ;;  %5630 = vpow2.f32 %v4429_v12  ;;  %v703_v20 = vpop.f32.mrb[9].mxu0  ;;  %v6288_v41 = vadd.f32 %v4651_v17, %v6215_v43  ;;  %v6309_v12 = vadd.s32 2, %v6278_v32 }
 0x100   : > { %v5621_v21 = vpop.eup %5620  ;;  %5632 = vrcp.f32 %v784_v15  ;;  %v785_v22 = vadd.f32 1.0, %v5619_v18  ;;  %v6269_v24 = vpop.f32.mrb[10].mxu0  ;;  %v6294_v55 = vadd.f32 %v6215_v43, %v703_v20  ;;  %v4436_v14 = vmul.f32 -1.442695, %v6291_v49 }
 0x101   : > { %5634 = vrcp.f32 %v782_v19  ;;  %v783_v25 = vadd.f32 1.0, %v5621_v21  ;;  %v6272_v28 = vpop.f32.mrb[11].mxu0  ;;  %v4410_v7 = vmul.f32 -1.442695, %v6288_v41  ;;  %v6332_v27 = vadd.f32 %v6269_v24, %v6215_v43 }
 0x102   : > { %5636 = vrcp.f32 %v785_v22  ;;  %v6297_v1 = vpop.f32.mrb[8].mxu1  ;;  %v4408_v19 = vmul.f32 -1.442695, %v6294_v55  ;;  %vm1184_vm12 = vcmp.ge.s32.totalorder %v6309_v12, 0  ;;  %vm1196_vm13 = vcmp.lt.s32.totalorder %v6309_v12, 16 }
 0x103   : > { %5638 = vrcp.f32 %v783_v25  ;;  %v6305_v8 = vpop.f32.mrb[9].mxu1  ;;  %vm6536_vm2 = vmand %vm1184_vm12, %vm1196_vm13 }
 0x104   : > { %5640 = vpow2.f32 %v4432_v23  ;;  %v6312_v15 = vpop.f32.mrb[10].mxu1  ;;  %v6325_v23 = vadd.f32 %v6236_v57, %v926_v35 }
 0x105   : > { %v5623_v36 = vpop.eup %5622  ;;  %5642 = vpow2.f32 %v4430_v26  ;;  %v6321_v20 = vpop.f32.mrb[11].mxu1 }
 0x106   : > { %v5625_v38 = vpop.eup %5624  ;;  %v788_v40 = vadd.f32 1.0, %v5623_v36  ;;  %5644 = vpow2.f32 %v4405_v29  ;;  %v4655_v44 = vpop.f32.mrb[12].mxu0  ;;  %v6336_v29 = vadd.f32 %v6215_v43, %v6272_v28  ;;  %v4434_v28 = vmul.f32 -1.442695, %v6325_v23 }
 0x107   : > { %v5627_v46 = vpop.eup %5626  ;;  %v786_v48 = vadd.f32 1.0, %v5625_v38  ;;  %5646 = vpow2.f32 %v4435_v34  ;;  %v719_v51 = vpop.f32.mrb[13].mxu0  ;;  %v6339_v34 = vadd.f32 %v4655_v44, %v6215_v43 }
 0x108   : > { %v5629_v52 = vpop.eup %5628  ;;  %5648 = vrcp.f32 %v788_v40  ;;  %v789_v54 = vadd.f32 1.0, %v5627_v46  ;;  %v4656_v56 = vpop.f32.mrb[14].mxu0 }
 0x109   : > { %v5631_v59 = vpop.eup %5630  ;;  %v1076_v61 = vadd.f32 1.0, %v5629_v52  ;;  %5650 = vrcp.f32 %v786_v48  ;;  %v722_v63 = vpop.f32.mrb[15].mxu0  ;;  %v6346_v40 = vadd.f32 %v4656_v56, %v6215_v43  ;;  %v4411_v52 = vmul.f32 -1.442695, %v6332_v27 }
 0x10a   : > { %v5633_v3 = vpop.eup %5632  ;;  %v1074_v4 = vadd.f32 1.0, %v5631_v59  ;;  %5652 = vrcp.f32 %v789_v54  ;;  %v4673_v46 = vpop.f32.mrb[12].mxu1  ;;  %v6350_v54 = vadd.f32 %v6215_v43, %v722_v63  ;;  %v4409_v56 = vmul.f32 -1.442695, %v6336_v29 }
 0x10b   : > { %v5635_v10 = vpop.eup %5634  ;;  %v832_v11 = vmul.f32 %v5633_v3, %v6218_v45  ;;  %5654 = vrcp.f32 %v1076_v61  ;;  %v6319_v45 = vadd.s32 5, %v6278_v32 }
 0x10c   : > { %v5637_v17 = vpop.eup %5636  ;;  %v830_v18 = vmul.f32 %v5635_v10, %v6221_v47  ;;  %5656 = vrcp.f32 %v1074_v4  ;;  %v3825_v47 = vsel %vm633_vm0, %v6208_v42, 0  ;;  %v4413_v39 = vmul.f32 -1.442695, %v6350_v54 }
 0x10d   : > { %v5639_v21 = vpop.eup %5638  ;;  %v833_v22 = vmul.f32 %v5637_v17, %v6225_v50  ;;  %5658 = vpow2.f32 %v4433_v62  ;;  %v6358_v62 = vadd.s32 4, %v6278_v32  ;;  %v4415_v17 = vmul.f32 -1.442695, %v6346_v40 }
 0x10e   : > { %v5641_v25 = vpop.eup %5640  ;;  %v831_v26 = vmul.f32 %v5639_v21, %v6229_v53  ;;  %5660 = vpow2.f32 %v4410_v7  ;;  %v6342_v53 = vadd.f32 %v6215_v43, %v719_v51  ;;  %v955_v51 = vpop.f32.mrb[13].mxu1  ;;  %v4414_v43 = vmul.f32 -1.442695, %v6339_v34 }
 0x10f   : > { %v5643_v50 = vpop.eup %5642  ;;  %v3653_v31 = vpack.c.bf16 %v833_v22, %v832_v11  ;;  %v1077_v33 = vadd.f32 1.0, %v5641_v25  ;;  %5662 = vpow2.f32 %v4436_v14  ;;  %v6361_v3 = vpop.f32.mrb[14].mxu1  ;;  %v6391_v21 = vadd.f32 %v6312_v15, %v6236_v57 }
 0x110   : > { %v5645_v42 = vpop.eup %5644  ;;  %v3652_v35 = vpack.c.bf16 %v831_v26, %v830_v18  ;;  %v1075_v36 = vadd.f32 1.0, %v5643_v50  ;;  %5664 = vpow2.f32 %v4408_v19  ;;  %v4412_v63 = vmul.f32 -1.442695, %v6342_v53  ;;  %v6369_v7 = vpop.f32.mrb[15].mxu1 }
 0x111   : > { %v5647_v24 = vpop.eup %5646  ;;  %5666 = vrcp.f32 %v1077_v33  ;;  %v787_v38 = vadd.f32 1.0, %v5645_v42  ;;  %vm1187_vm3 = vcmp.ge.s32.totalorder %v6319_v45, 0  ;;  %vm1199_vm4 = vcmp.lt.s32.totalorder %v6319_v45, 16 }
 0x112   : > { %v5649_v48 = vpop.eup %5648  ;;  %5668 = vrcp.f32 %v1075_v36  ;;  %v1080_v44 = vadd.f32 1.0, %v5647_v24  ;;  %4733 = vmatprep.mubr.msk.bf16.mxu0 %vm608_vm1, %v3652_v35  ;;  %v6417_v42 = vpop.f32.mrb[16].mxu1  ;;  %vm1186_vm5 = vcmp.ge.s32.totalorder %v6358_v62, 0 }
 0x113   : > { %v5651_v59 = vpop.eup %5650  ;;  %v6354_v61 = vmul.f32 %v5649_v48, %v6239_v58  ;;  %5670 = vrcp.f32 %v787_v38  ;;  %4734 = vmatmul.mubr.msk.bf16.vlgmr.msra.gmra.mrb[16].mxu0 %vm608_vm1, %v3653_v31  ;;  %v6367_v58 = vadd.f32 %v6297_v1, %v6236_v57  ;;  %v6385_v1 = vadd.f32 %v6236_v57, %v6305_v8 }
 0x114   : > { %v5653_v4 = vpop.eup %5652  ;;  %5672 = vrcp.f32 %v1080_v44  ;;  %4750 = vmatpush3.bf16.msra.mxu0 %v3825_v47  ;;  %v6406_v47 = vadd.f32 %v6236_v57, %v6321_v20  ;;  %v6415_v20 = vadd.f32 %v4673_v46, %v6236_v57  ;;  %v6422_v38 = vmul.f32 -1.442695, %v6391_v21 }
 0x115   : > { %v5655_v10 = vpop.eup %5654  ;;  %v6380_v14 = vmul.f32 %v5653_v4, %v6246_v0  ;;  %5674 = vpow2.f32 %v4434_v28  ;;  %v4439_v26 = vmul.f32 -1.442695, %v6367_v58  ;;  %v4437_v33 = vmul.f32 -1.442695, %v6385_v1  ;;  %v6424_v28 = vpop.f32.mrb[17].mxu1 }
 0x116   : > { %v5657_v18 = vpop.eup %5656  ;;  %v1148_v19 = vmul.f32 %v5655_v10, %v6249_v2  ;;  %5676 = vpow2.f32 %v4411_v52  ;;  %v6429_v46 = vmul.f32 -1.442695, %v6406_v47  ;;  %v6436_v10 = vadd.f32 %v6236_v57, %v955_v51 }
 0x117   : > { %v5659_v22 = vpop.eup %5658  ;;  %v1146_v0 = vmul.f32 %v5657_v18, %v6253_v5  ;;  %v3655_v2 = vpack.c.bf16 %v6380_v14, %v6354_v61  ;;  %5678 = vpow2.f32 %v4409_v56  ;;  %v6431_v56 = vpop.f32.mrb[18].mxu1  ;;  %v6449_v51 = vadd.f32 %v6361_v3, %v6236_v57 }
 0x118   : > { %v5661_v15 = vpop.eup %5660  ;;  %v1244_v5 = vsel %vm6375_vm7, %v1148_v19, 0.0  ;;  %v1078_v25 = vadd.f32 1.0, %v5659_v22  ;;  %5680 = vpow2.f32 %v4414_v43  ;;  %v6438_v18 = vpop.f32.mrb[19].mxu1 }
 0x119   : > { %v5663_v50 = vpop.eup %5662  ;;  %v792_v31 = vadd.f32 1.0, %v5661_v15  ;;  %5682 = vpow2.f32 %v4412_v63  ;;  %v1242_v36 = vsel %vm6398_vm8, %v1146_v0, 0.0  ;;  %v6426_v44 = vrot.slane %v1244_v5, 7 }
 0x11a   : > { %v5665_v35 = vpop.eup %5664  ;;  %5684 = vrcp.f32 %v1078_v25  ;;  %v1081_v24 = vadd.f32 1.0, %v5663_v50  ;;  %v834_v63 = vmul.f32 %v5651_v59, %v6242_v60  ;;  %v1297_v22 = vrot.slane %v1242_v36, 7 }
 0x11b   : > { %v5667_v48 = vpop.eup %5666  ;;  %5686 = vrcp.f32 %v792_v31  ;;  %v790_v52 = vadd.f32 1.0, %v5665_v35  ;;  %v6442_v15 = vmul.f32 -1.442695, %v6415_v20  ;;  %v6457_v11 = vsel %vm1296_vm6, 0.0, %v6426_v44 }
 0x11c   : > { %v5669_v4 = vpop.eup %5668  ;;  %v1149_v43 = vmul.f32 %v5667_v48, %v6258_v9  ;;  %5688 = vrcp.f32 %v1081_v24  ;;  %v6460_v35 = vsel %vm1296_vm6, 0.0, %v1297_v22  ;;  %v6463_v36 = vmul.f32 -1.442695, %v6436_v10  ;;  %v6465_v24 = vpop.f32.mrb[20].mxu1 }
 0x11d   : > { %v5671_v19 = vpop.eup %5670  ;;  %v1147_v0 = vmul.f32 %v5669_v4, %v6262_v13  ;;  %5690 = vrcp.f32 %v790_v52  ;;  %v6479_v4 = vpop.f32.mrb[21].mxu1 }
 0x11e   : > { %v5673_v5 = vpop.eup %5672  ;;  %v1245_v9 = vsel %vm6375_vm7, %v1149_v43, 0.0  ;;  %v835_v60 = vmul.f32 %v5671_v19, %v6265_v16  ;;  %5692 = vpow2.f32 %v4415_v17  ;;  %v6495_v19 = vmul.f32 -1.442695, %v6449_v51 }
 0x11f   : > { %v5675_v59 = vpop.eup %5674  ;;  %v1301_v25 = vrot.slane %v1245_v9, 7  ;;  %v1243_v13 = vsel %vm6398_vm8, %v1147_v0, 0.0  ;;  %5694 = vpow2.f32 %v4413_v39  ;;  %vm1198_vm7 = vcmp.lt.s32.totalorder %v6358_v62, 16  ;;  %vm6631_vm8 = vmand %vm1187_vm3, %vm1199_vm4 }
 0x120   : > { %v5677_v16 = vpop.eup %5676  ;;  %v1298_v17 = vrot.slane %v1243_v13, 7  ;;  %v3654_v50 = vpack.c.bf16 %v835_v60, %v834_v63  ;;  %v1079_v31 = vadd.f32 1.0, %v5675_v59  ;;  %5696 = vpow2.f32 %v4439_v26  ;;  %vm6645_vm9 = vmand %vm1186_vm5, %vm1198_vm7 }
 0x121   : > { %v5679_v3 = vpop.eup %5678  ;;  %v793_v8 = vadd.f32 1.0, %v5677_v16  ;;  %5698 = vpow2.f32 %v4437_v33  ;;  %v6468_v48 = vsel %vm1296_vm6, %v1301_v25, 0.0  ;;  %v1152_v26 = vmul.f32 %v5673_v5, %v6276_v30 }
 0x122   : > { %v5681_v39 = vpop.eup %5680  ;;  %v6471_v52 = vsel %vm1296_vm6, %v1297_v22, %v1298_v17  ;;  %4737 = vmatprep.mubr.msk.bf16.mxu0 %vm608_vm1, %v3654_v50  ;;  %v6477_v33 = vadd.f32 %v6236_v57, %v6369_v7  ;;  %5700 = vrcp.f32 %v1079_v31  ;;  %v791_v30 = vadd.f32 1.0, %v5679_v3  ;;  %v6497_v22 = vpop.f32.mrb[22].mxu1 }
 0x123   : > { %v5683_v43 = vpop.eup %5682  ;;  %4738 = vmatmul.mubr.msk.bf16.gmra.mrb[20].mxu0 %vm608_vm1, %v3655_v2  ;;  %v1528_v7 = vrot.slane %v6457_v11, 2  ;;  %5702 = vrcp.f32 %v793_v8  ;;  %v796_v5 = vadd.f32 1.0, %v5681_v39  ;;  %v6500_v60 = vpop.f32.mrb[23].mxu1  ;;  %v6504_v61 = vsel %vm1296_vm6, %v6426_v44, %v1301_v25 }
 0x124   : > { %v5685_v0 = vpop.eup %5684  ;;  %v794_v9 = vadd.f32 1.0, %v5683_v43  ;;  %5704 = vrcp.f32 %v791_v30  ;;  %v1531_v14 = vrot.slane %v6468_v48, 2  ;;  %v1417_v2 = vrot.slane %v6457_v11, 1 }
 0x125   : > { %v5687_v59 = vpop.eup %5686  ;;  %v6510_v16 = vsel %vm6485_vm15, %v1152_v26, 0.0  ;;  %5706 = vrcp.f32 %v796_v5  ;;  %v4888_v50 = vpack.i.bf16 %v6504_v61, %v6457_v11  ;;  %v1529_v31 = vrot.slane %v6504_v61, 2 }
 0x126   : > { %v5689_v13 = vpop.eup %5688  ;;  %v1420_v8 = vrot.slane %v6468_v48, 1  ;;  %v6517_v44 = vsel %vm1296_vm6, %v1298_v17, 0.0  ;;  %5708 = vrcp.f32 %v794_v9  ;;  %v1150_v43 = vmul.f32 %v5685_v0, %v6282_v37 }
 0x127   : > { %v5691_v3 = vpop.eup %5690  ;;  %v1153_v25 = vmul.f32 %v5689_v13, %v6291_v49  ;;  %5710 = vpow2.f32 %v6422_v38  ;;  %4889 = vrot.lane.b32.xlu0 %v4888_v50, %s6023_s28  ;;  %v1530_v26 = vsel %vm1522_vm11, %v1528_v7, %v1529_v31  ;;  %v1418_v30 = vrot.slane %v6504_v61, 1 }
 0x128   : > { %v5693_v39 = vpop.eup %5692  ;;  %5712 = vpow2.f32 %v6429_v46  ;;  %v1532_v49 = vsel %vm1522_vm11, %v1529_v31, %v1531_v14  ;;  %v1306_v38 = vrot.slane %v6510_v16, 7  ;;  %v1526_v14 = vrot.slane %v6517_v44, 2 }
 0x129   : > { %v5695_v5 = vpop.eup %5694  ;;  %v6527_v17 = vsel %vm6485_vm15, %v1153_v25, 0.0  ;;  %v797_v48 = vadd.f32 1.0, %v5693_v39  ;;  %v6544_v50 = vpack.i.bf16 %v1532_v49, %v1530_v26  ;;  %v840_v31 = vmul.f32 %v5687_v59, %v6288_v41 }
 0x12a   : > { %v5697_v37 = vpop.eup %5696  ;;  %v1307_v63 = vrot.slane %v6527_v17, 7  ;;  %v3793_v0 = vpack.c.bf16 %v6527_v17, %v6510_v16  ;;  %v795_v9 = vadd.f32 1.0, %v5695_v5  ;;  %v6552_v6 = vsel %vm6536_vm2, %v1150_v43, 0.0 }
 0x12b   : > { %v5699_v46 = vpop.eup %5698  ;;  %5714 = vrcp.f32 %v797_v48  ;;  %v1084_v13 = vadd.f32 1.0, %v5697_v37  ;;  %v838_v5 = vmul.f32 %v5691_v3, %v6294_v55  ;;  %4899 = vrot.lane.b32.xlu1 %v6544_v50, %s6024_s30  ;;  %v1419_v26 = vsel %vm1411_vm14, %v1417_v2, %v1418_v30 }
 0x12c   : > { %v6548_v12 = vsel %vm1296_vm6, %v1306_v38, %v1307_v63  ;;  %5716 = vrcp.f32 %v795_v9  ;;  %v1082_v25 = vadd.f32 1.0, %v5699_v46  ;;  %v5701_v39 = vpop.eup %5700  ;;  %v1421_v48 = vsel %vm1411_vm14, %v1418_v30, %v1420_v8 }
 0x12d   : > { %5718 = vrcp.f32 %v1084_v13  ;;  %v5703_v41 = vpop.eup %5702  ;;  %v1151_v59 = vmul.f32 %v5701_v39, %v6325_v23  ;;  %v1524_v49 = vrot.slane %v6471_v52, 2  ;;  %v1412_v43 = vrot.slane %v6460_v35, 1 }
 0x12e   : > { %5720 = vrcp.f32 %v1082_v25  ;;  %v5705_v37 = vpop.eup %5704  ;;  %v841_v55 = vmul.f32 %v5703_v41, %v6332_v27  ;;  %v4893_v3 = vpack.i.bf16 %v1421_v48, %v1419_v26  ;;  %v4442_v2 = vmul.f32 -1.442695, %v6477_v33 }
 0x12f   : > { %v5707_v9 = vpop.eup %5706  ;;  %v6568_v23 = vsel %vm6536_vm2, %v1151_v59, 0.0  ;;  %v839_v8 = vmul.f32 %v5705_v37, %v6336_v29  ;;  %v8336_v30 = vrot.slane %v6460_v35, 2  ;;  %v1527_v46 = vsel %vm1522_vm11, %v1524_v49, %v1526_v14 }
 0x130   : > { %v5709_v13 = vpop.eup %5708  ;;  %v1303_v25 = vrot.slane %v6552_v6, 7  ;;  %v1304_v39 = vrot.slane %v6568_v23, 7  ;;  %v3792_v7 = vpack.c.bf16 %v6568_v23, %v6552_v6  ;;  %v3657_v26 = vpack.c.bf16 %v841_v55, %v840_v31  ;;  %4894 = vrot.lane.b32.xlu0 %v4893_v3, %s6025_s14 }
 0x131   : > { %v1525_v27 = vsel %vm1522_vm11, %v8336_v30, %v1524_v49  ;;  %v5711_v29 = vpop.eup %5710  ;;  %v1415_v41 = vrot.slane %v6517_v44, 1  ;;  %v3656_v59 = vpack.c.bf16 %v839_v8, %v838_v5  ;;  %5722 = vpow2.f32 %v6442_v15 }
 0x132   : > { %v4918_v48 = vpack.i.bf16 %v1527_v46, %v1525_v27  ;;  %v5713_v14 = vpop.eup %5712  ;;  %v6584_v49 = vsel %vm1296_vm6, %v1303_v25, %v1304_v39  ;;  %v1085_v37 = vadd.f32 1.0, %v5711_v29  ;;  %5724 = vpow2.f32 %v6463_v36  ;;  %v5608_v36 = vld [vmem:[%s8319_s7] sm:$0xff]  }
 0x133   : > { %v6588_v30 = vsel %vm1296_vm6, %v1307_v63, 0.0  ;;  %v844_v31 = vmul.f32 %v5707_v9, %v6339_v34  ;;  %v1083_v55 = vadd.f32 1.0, %v5713_v14  ;;  %4741 = vmatprep.mubr.msk.bf16.mxu0 %vm608_vm1, %v3656_v59  ;;  %5726 = vpow2.f32 %v6495_v19  ;;  %4683 = vmatprep.subr.bf16.mxu1 %v5608_v36 }
 0x134   : > { %4919 = vrot.lane.b32.xlu1 %v4918_v48, %s6024_s30  ;;  %v6595_v44 = vsel %vm1296_vm6, 0.0, %v1306_v38  ;;  %v842_v5 = vmul.f32 %v5709_v13, %v6342_v53  ;;  %5728 = vrcp.f32 %v1085_v37  ;;  %4742 = vmatmul.mubr.msk.bf16.gmra.mrb[24].mxu0 %vm608_vm1, %v3657_v26  ;;  %v1413_v34 = vrot.slane %v6471_v52, 1 }
 0x135   : > { %v5715_v15 = vpop.eup %5714  ;;  %4904 = vrot.lane.b32.xlu0 %v4893_v3, %s6026_s12  ;;  %5730 = vrcp.f32 %v1083_v55  ;;  %v6607_v38 = vpack.i.bf16 %v6548_v12, %v6595_v44  ;;  %v1430_v9 = vrot.slane %v6588_v30, 1  ;;  %v1428_v3 = vrot.slane %v6548_v12, 1  ;;  %4684 = vmatpush3.bf16.msra.mxu1 %v5608_v36 }
 0x136   : > { %v5717_v63 = vpop.eup %5716  ;;  %v845_v19 = vmul.f32 %v5715_v15, %v6346_v40  ;;  %5732 = vpow2.f32 %v4442_v2  ;;  %v1414_v40 = vsel %vm1411_vm14, %v1412_v43, %v1413_v34  ;;  %v1416_v13 = vsel %vm1411_vm14, %v1413_v34, %v1415_v41 }
 0x137   : > { %v5719_v53 = vpop.eup %5718  ;;  %v843_v8 = vmul.f32 %v5717_v63, %v6350_v54  ;;  %v6618_v26 = vsel %vm1296_vm6, 0.0, %v1303_v25  ;;  %v1427_v29 = vrot.slane %v6595_v44, 1  ;;  %v6625_v59 = vsel %vm1296_vm6, %v1304_v39, 0.0 }
 0x138   : > { %v5721_v27 = vpop.eup %5720  ;;  %v3659_v46 = vpack.c.bf16 %v845_v19, %v844_v31  ;;  %4924 = vrot.lane.b32.xlu1 %v6607_v38, %s6027_s24  ;;  %v1156_v2 = vmul.f32 %v5719_v53, %v6367_v58  ;;  %v6637_v58 = vadd.s32 7, %v6278_v32  ;;  %v4913_v45 = vpack.i.bf16 %v1416_v13, %v1414_v40 }
 0x139   : > { %v3658_v54 = vpack.c.bf16 %v843_v8, %v842_v5  ;;  %4909 = vrot.lane.b32.xlu0 %v6544_v50, %s6028_s25  ;;  %v1154_v25 = vmul.f32 %v5721_v27, %v6385_v1  ;;  %v4933_v50 = vpack.i.bf16 %v6584_v49, %v6618_v26  ;;  %v1429_v1 = vsel %vm1411_vm14, %v1427_v29, %v1428_v3 }
 0x13a   : > { %v1431_v41 = vsel %vm1411_vm14, %v1428_v3, %v1430_v9  ;;  %v6653_v14 = vadd.s32 6, %v6278_v32  ;;  %v6658_v62 = vadd.f32 %v6417_v42, %v6236_v57  ;;  %v6662_v37 = vadd.f32 %v6236_v57, %v6424_v28 }
 0x13b   : > { %4745 = vmatprep.mubr.msk.bf16.mxu0 %vm608_vm1, %v3658_v54  ;;  %v5723_v48 = vpop.eup %5722  ;;  %v1541_v55 = vrot.slane %v6588_v30, 2  ;;  %v1425_v15 = vrot.slane %v6625_v59, 1  ;;  %v6668_v5 = vsel %vm6631_vm8, %v1156_v2, 0.0  ;;  %v6674_v36 = vsel %vm6645_vm9, %v1154_v25, 0.0 }
 0x13c   : > { %4934 = vrot.lane.b32.xlu1 %v4933_v50, %s6023_s28  ;;  %v5725_v31 = vpop.eup %5724  ;;  %v1088_v34 = vadd.f32 1.0, %v5723_v48  ;;  %4746 = vmatmul.mubr.msk.bf16.gmra.mrb[28].mxu0 %vm608_vm1, %v3659_v46  ;;  %vm1189_vm10 = vcmp.ge.s32.totalorder %v6637_v58, 0  ;;  %vm1201_vm12 = vcmp.lt.s32.totalorder %v6637_v58, 16  ;;  %v6682_v30 = vpack.i.bf16 %v1431_v41, %v1429_v1 }
 0x13d   : > { %4914 = vrot.lane.b32.xlu0 %v4913_v45, %s6025_s14  ;;  %v5727_v42 = vpop.eup %5726  ;;  %v1086_v28 = vadd.f32 1.0, %v5725_v31  ;;  %4751 = vmatprep.mubr.msk.bf16.mxu0 %vm608_vm1, %v3792_v7  ;;  %v1539_v63 = vrot.slane %v6548_v12, 2  ;;  %v1538_v3 = vrot.slane %v6595_v44, 2  ;;  %v1312_v23 = vrot.slane %v6668_v5, 7  ;;  %vm6755_vm2 = vmand %vm1189_vm10, %vm1201_vm12 }
 0x13e   : > { %v5729_v19 = vpop.eup %5728  ;;  %5734 = vrcp.f32 %v1088_v34  ;;  %v1089_v53 = vadd.f32 1.0, %v5727_v42  ;;  %v1309_v7 = vrot.slane %v6674_v36, 7  ;;  %v1423_v13 = vrot.slane %v6584_v49, 1 }
 0x13f   : > { %v5731_v9 = vpop.eup %5730  ;;  %v1157_v8 = vmul.f32 %v5729_v19, %v6391_v21  ;;  %5736 = vrcp.f32 %v1086_v28  ;;  %v1540_v40 = vsel %vm1522_vm11, %v1538_v3, %v1539_v63  ;;  %v1422_v25 = vrot.slane %v6618_v26, 1 }
 0x140   : > { %4944 = vrot.lane.b32.xlu1 %v6682_v30, %s6029_s17  ;;  %v5733_v6 = vpop.eup %5732  ;;  %v1155_v27 = vmul.f32 %v5731_v9, %v6406_v47  ;;  %5738 = vrcp.f32 %v1089_v53  ;;  %vm1188_vm13 = vcmp.ge.s32.totalorder %v6653_v14, 0  ;;  %vm1200_vm15 = vcmp.lt.s32.totalorder %v6653_v14, 16 }
 0x141   : > { %4929 = vrot.lane.b32.xlu0 %v6607_v38, %s6023_s28  ;;  %v6696_v21 = vsel %vm6631_vm8, %v1157_v8, 0.0  ;;  %v1087_v46 = vadd.f32 1.0, %v5733_v6  ;;  %v1542_v38 = vsel %vm1522_vm11, %v1539_v63, %v1541_v55  ;;  %v4447_v45 = vmul.f32 -1.442695, %v6658_v62  ;;  %vm6769_vm3 = vmand %vm1188_vm13, %vm1200_vm15 }
 0x142   : > { %v1313_v54 = vrot.slane %v6696_v21, 7  ;;  %v3795_v2 = vpack.c.bf16 %v6696_v21, %v6668_v5  ;;  %v6705_v47 = vsel %vm6645_vm9, %v1155_v27, 0.0  ;;  %v4958_v41 = vpack.i.bf16 %v1542_v38, %v1540_v40 }
 0x143   : > { %v1310_v29 = vrot.slane %v6705_v47, 7  ;;  %v3794_v43 = vpack.c.bf16 %v6705_v47, %v6674_v36  ;;  %5740 = vrcp.f32 %v1087_v46  ;;  %v1424_v48 = vsel %vm1411_vm14, %v1422_v25, %v1423_v13 }
 0x144   : > { %4954 = vrot.lane.b32.xlu1 %v6682_v30, %s6025_s14  ;;  %v6719_v39 = vsel %vm1296_vm6, %v1312_v23, %v1313_v54  ;;  %4752 = vmatmul.mubr.msk.bf16.vlgmr.msra.gmra.mrb[16].mxu0 %vm608_vm1, %v3793_v0  ;;  %v1426_v16 = vsel %vm1411_vm14, %v1423_v13, %v1425_v15  ;;  %v1536_v17 = vrot.slane %v6625_v59, 2  ;;  %v1534_v0 = vrot.slane %v6584_v49, 2 }
 0x145   : > { %4939 = vrot.lane.b32.xlu0 %v4933_v50, %s6027_s24  ;;  %v6734_v1 = vsel %vm1296_vm6, %v1309_v7, %v1310_v29  ;;  %4755 = vmatprep.mubr.msk.bf16.mxu0 %vm608_vm1, %v3794_v43  ;;  %5742 = vpow2.f32 %v4447_v45  ;;  %v4445_v50 = vmul.f32 -1.442695, %v6662_v37  ;;  %v6745_v31 = vadd.f32 %v6431_v56, %v6236_v57 }
 0x146   : > { %v6749_v55 = vadd.f32 %v6236_v57, %v6438_v18  ;;  %v4973_v15 = vpack.i.bf16 %v1426_v16, %v1424_v48  ;;  %v1533_v56 = vrot.slane %v6618_v26, 2  ;;  %v5609_v57 = vld [vmem:[%s8319_s7 + $0x8] sm:$0xff]   ;;  %v6827_v48 = vsel %vm1296_vm6, 0.0, %v1312_v23 }
 0x147   : > { %5744 = vpow2.f32 %v4445_v50  ;;  %v4448_v28 = vmul.f32 -1.442695, %v6745_v31  ;;  %4685 = vmatprep.subr.bf16.mxu1 %v5609_v57  ;;  %v1179_v5 = vadd.s32 9, %v6278_v32  ;;  %v5003_v50 = vpack.i.bf16 %v6719_v39, %v6827_v48 }
 0x148   : > { %4959 = vrot.lane.b32.xlu1 %v4958_v41, %s6024_s30  ;;  %v5735_v34 = vpop.eup %5734  ;;  %v4446_v63 = vmul.f32 -1.442695, %v6749_v55  ;;  %v1535_v9 = vsel %vm1522_vm11, %v1533_v56, %v1534_v0  ;;  %4686 = vmatpush3.bf16.msra.mxu1 %v5609_v57  ;;  %v1438_v59 = vrot.slane %v6719_v39, 1  ;;  %v1178_v36 = vadd.s32 8, %v6278_v32 }
 0x149   : > { %4949 = vrot.lane.b32.xlu0 %v4958_v41, %s6030_s29  ;;  %v5737_v18 = vpop.eup %5736  ;;  %v1160_v42 = vmul.f32 %v5735_v34, %v6415_v20  ;;  %v1537_v20 = vsel %vm1522_vm11, %v1534_v0, %v1536_v17  ;;  %5746 = vpow2.f32 %v4448_v28  ;;  %v1384_v0 = vsel %vm1296_vm6, %v1313_v54, 0.0  ;;  %v5982_v28 = vld [vmem:[%s8318_s6] ss:$0 sm:$0xff] }
 0x14a   : > { %v5739_v19 = vpop.eup %5738  ;;  %v1158_v53 = vmul.f32 %v5737_v18, %v6436_v10  ;;  %5748 = vpow2.f32 %v4446_v63  ;;  %v4978_v27 = vpack.i.bf16 %v1537_v20, %v1535_v9  ;;  %v6847_v54 = vsel %vm1296_vm6, 0.0, %v1309_v7 }
 0x14b   : > { %v6780_v14 = vsel %vm6755_vm2, %v1160_v42, 0.0  ;;  %v1161_v8 = vmul.f32 %v5739_v19, %v6449_v51  ;;  %v1437_v34 = vrot.slane %v6827_v48, 1  ;;  %v1440_v56 = vrot.slane %v1384_v0, 1 }
 0x14c   : > { %4974 = vrot.lane.b32.xlu1 %v4973_v15, %s6026_s12  ;;  %v1318_v3 = vrot.slane %v6780_v14, 7  ;;  %v6787_v10 = vsel %vm6769_vm3, %v1158_v53, 0.0  ;;  %4756 = vmatmul.mubr.msk.bf16.gmra.mrb[20].mxu0 %vm608_vm1, %v3795_v2  ;;  %v6803_v2 = vld [vmem:[%s8319_s7 + $0x10] ss:$0 sps:$4 sm:$0x33]   ;;  %vm1191_vm4 = vcmp.ge.s32.totalorder %v1179_v5, 0  ;;  %v5013_v7 = vpack.i.bf16 %v6734_v1, %v6847_v54 }
 0x14d   : > { %4964 = vrot.lane.b32.xlu0 %v6682_v30, %s6026_s12  ;;  %v5741_v6 = vpop.eup %5740  ;;  %v6794_v51 = vsel %vm6755_vm2, %v1161_v8, 0.0  ;;  %v1315_v30 = vrot.slane %v6787_v10, 7  ;;  %4835 = vmatprep.subr.msk.bf16.mxu1 %vm633_vm0, %v6803_v2  ;;  %vm1203_vm5 = vcmp.lt.s32.totalorder %v1179_v5, 16  ;;  %v1439_v42 = vsel %vm1411_vm14, %v1437_v34, %v1438_v59 }
 0x14e   : > { %v1319_v46 = vrot.slane %v6794_v51, 7  ;;  %v3797_v40 = vpack.c.bf16 %v6794_v51, %v6780_v14  ;;  %v1159_v13 = vmul.f32 %v5741_v6, %v6477_v33  ;;  %v1441_v58 = vsel %vm1411_vm14, %v1438_v59, %v1440_v56  ;;  %vm6885_vm9 = vmand %vm1191_vm4, %vm1203_vm5 }
 0x14f   : > { %v5743_v38 = vpop.eup %5742  ;;  %v6864_v63 = vadd.f32 %v5982_v28, %v6465_v24  ;;  %v6867_v19 = vadd.f32 %v5982_v28, %v6479_v4  ;;  %v6870_v53 = vadd.f32 %v5982_v28, %v6497_v22  ;;  %v1551_v9 = vrot.slane %v1384_v0, 2 }
 0x150   : > { %4979 = vrot.lane.b32.xlu1 %v4978_v27, %s6028_s25  ;;  %v6812_v43 = vsel %vm1296_vm6, %v1318_v3, %v1319_v46  ;;  %v6816_v33 = vsel %vm6769_vm3, %v1159_v13, 0.0  ;;  %v1092_v16 = vadd.f32 1.0, %v5743_v38  ;;  %v1548_v20 = vrot.slane %v6827_v48, 2 }
 0x151   : > { %4969 = vrot.lane.b32.xlu0 %v4958_v41, %s6028_s25  ;;  %v1316_v25 = vrot.slane %v6816_v33, 7  ;;  %v3796_v45 = vpack.c.bf16 %v6816_v33, %v6787_v10  ;;  %v5745_v17 = vpop.eup %5744  ;;  %v1549_v8 = vrot.slane %v6719_v39, 2  ;;  %v6876_v6 = vadd.f32 %v5982_v28, %v6500_v60 }
 0x152   : > { %5750 = vrcp.f32 %v1092_v16  ;;  %v1090_v23 = vadd.f32 1.0, %v5745_v17  ;;  %v4451_v24 = vmul.f32 -1.442695, %v6864_v63  ;;  %v4449_v4 = vmul.f32 -1.442695, %v6867_v19 }
 0x153   : > { %v6837_v41 = vsel %vm1296_vm6, %v1315_v30, %v1316_v25  ;;  %4759 = vmatprep.mubr.msk.bf16.mxu0 %vm608_vm1, %v3796_v45  ;;  %v5747_v21 = vpop.eup %5746  ;;  %vm1190_vm7 = vcmp.ge.s32.totalorder %v1178_v36, 0  ;;  %vm1202_vm8 = vcmp.lt.s32.totalorder %v1178_v36, 16  ;;  %v5023_v22 = vpack.i.bf16 %v1441_v58, %v1439_v42 }
 0x154   : > { %4994 = vrot.lane.b32.xlu1 %v4973_v15, %s6025_s14  ;;  %4760 = vmatmul.mubr.msk.bf16.gmra.mrb[24].mxu0 %vm608_vm1, %v3797_v40  ;;  %5752 = vrcp.f32 %v1090_v23  ;;  %v1093_v57 = vadd.f32 1.0, %v5747_v21  ;;  %v4452_v40 = vmul.f32 -1.442695, %v6870_v53  ;;  %v4450_v13 = vmul.f32 -1.442695, %v6876_v6  ;;  %vm6894_vm10 = vmand %vm1190_vm7, %vm1202_vm8 }
 0x155   : > { %4984 = vrot.lane.b32.xlu0 %v4973_v15, %s6029_s17  ;;  %v5749_v15 = vpop.eup %5748  ;;  %v1383_v60 = vsel %vm1296_vm6, %v1310_v29, 0.0  ;;  %v1550_v0 = vsel %vm1522_vm11, %v1548_v20, %v1549_v8  ;;  %v1552_v5 = vsel %vm1522_vm11, %v1549_v8, %v1551_v9  ;;  %v1432_v47 = vrot.slane %v6847_v54, 1 }
 0x156   : > { %v1091_v18 = vadd.f32 1.0, %v5749_v15  ;;  %5754 = vrcp.f32 %v1093_v57  ;;  %v1433_v23 = vrot.slane %v6734_v1, 1  ;;  %v1435_v34 = vrot.slane %v1383_v60, 1 }
 0x157   : > { %v5038_v57 = vpack.i.bf16 %v1552_v5, %v1550_v0  ;;  %v1543_v36 = vrot.slane %v6847_v54, 2  ;;  %v1448_v51 = vrot.slane %v6812_v43, 1  ;;  %v2247_v10 = vsel %vm633_vm0, %v6803_v2, 0 }
 0x158   : > { %5004 = vrot.lane.b32.xlu1 %v5003_v50, %s6027_s24  ;;  %5756 = vrcp.f32 %v1091_v18  ;;  %v1434_v28 = vsel %vm1411_vm14, %v1432_v47, %v1433_v23  ;;  %4688 = vmatpush3.bf16.msra.mxu1 %v2247_v10  ;;  %vm2037_vm5 = vcmask 64512   ;;  %vm2058_vm7 = vcmask 97280  }
 0x159   : > { %4989 = vrot.lane.b32.xlu0 %v4978_v27, %s6030_s29  ;;  %5758 = vpow2.f32 %v4451_v24  ;;  %vm2079_vm8 = vcmask 130048  }
 0x15a   : > { %5760 = vpow2.f32 %v4449_v4 }
 0x15b   : > { %5762 = vpow2.f32 %v4452_v40 }
 0x15c   : > { %5014 = vrot.lane.b32.xlu1 %v5013_v7, %s6023_s28  ;;  %v5751_v38 = vpop.eup %5750  ;;  %5764 = vpow2.f32 %v4450_v13 }
 0x15d   : > { %4999 = vrot.lane.b32.xlu0 %v4978_v27, %s6024_s30  ;;  %v1164_v27 = vmul.f32 %v5751_v38, %v6658_v62 }
 0x15e   : > { %v5753_v16 = vpop.eup %5752 }
 0x15f   : > { %v6904_v62 = vsel %vm6885_vm9, %v1164_v27, 0.0  ;;  %v1162_v29 = vmul.f32 %v5753_v16, %v6662_v37 }
 0x160   : > { %5024 = vrot.lane.b32.xlu1 %v5023_v22, %s6029_s17  ;;  %v5755_v21 = vpop.eup %5754  ;;  %v1324_v18 = vrot.slane %v6904_v62, 7 }
 0x161   : > { %5009 = vrot.lane.b32.xlu0 %v5003_v50, %s6023_s28  ;;  %v1546_v50 = vrot.slane %v1383_v60, 2  ;;  %v6910_v15 = vsel %vm6894_vm10, %v1162_v29, 0.0  ;;  %v1165_v56 = vmul.f32 %v5755_v21, %v6745_v31  ;;  %v1544_v31 = vrot.slane %v6734_v1, 2 }
 0x162   : > { %v5757_v59 = vpop.eup %5756  ;;  %v1321_v42 = vrot.slane %v6910_v15, 7  ;;  %v1181_v21 = vadd.s32 11, %v6278_v32 }
 0x163   : > { %v1163_v37 = vmul.f32 %v5757_v59, %v6749_v55  ;;  %v6921_v58 = vsel %vm6885_vm9, %v1165_v56, 0.0  ;;  %v5759_v4 = vpop.eup %5758  ;;  %v1545_v27 = vsel %vm1522_vm11, %v1543_v36, %v1544_v31  ;;  %v1547_v16 = vsel %vm1522_vm11, %v1544_v31, %v1546_v50 }
 0x164   : > { %5034 = vrot.lane.b32.xlu1 %v5023_v22, %s6025_s14  ;;  %v1325_v9 = vrot.slane %v6921_v58, 7  ;;  %v3799_v20 = vpack.c.bf16 %v6921_v58, %v6904_v62  ;;  %v5761_v13 = vpop.eup %5760  ;;  %v1096_v17 = vadd.f32 1.0, %v5759_v4  ;;  %v6965_v59 = vsel %vm1296_vm6, 0.0, %v1318_v3 }
 0x165   : > { %5019 = vrot.lane.b32.xlu0 %v5013_v7, %s6027_s24  ;;  %v6930_v55 = vsel %vm6894_vm10, %v1163_v37, 0.0  ;;  %v1436_v7 = vsel %vm1411_vm14, %v1433_v23, %v1435_v34  ;;  %v5763_v60 = vpop.eup %5762  ;;  %v1094_v0 = vadd.f32 1.0, %v5761_v13  ;;  %v5058_v23 = vpack.i.bf16 %v1547_v16, %v1545_v27 }
 0x166   : > { %v1322_v8 = vrot.slane %v6930_v55, 7  ;;  %v3798_v24 = vpack.c.bf16 %v6930_v55, %v6910_v15  ;;  %v6942_v40 = vsel %vm1296_vm6, %v1324_v18, %v1325_v9  ;;  %v5053_v45 = vpack.i.bf16 %v1436_v7, %v1434_v28  ;;  %v5765_v5 = vpop.eup %5764 }
 0x167   : > { %v1097_v47 = vadd.f32 1.0, %v5763_v60  ;;  %5766 = vrcp.f32 %v1096_v17  ;;  %v1095_v29 = vadd.f32 1.0, %v5765_v5  ;;  %v1180_v34 = vadd.s32 10, %v6278_v32 }
 0x168   : > { %5039 = vrot.lane.b32.xlu1 %v5038_v57, %s6024_s30  ;;  %v6950_v38 = vsel %vm1296_vm6, %v1321_v42, %v1322_v8  ;;  %4763 = vmatprep.mubr.msk.bf16.mxu0 %vm608_vm1, %v3798_v24  ;;  %5768 = vrcp.f32 %v1094_v0  ;;  %vm1193_vm12 = vcmp.ge.s32.totalorder %v1181_v21, 0  ;;  %v6973_v50 = vsel %vm1296_vm6, %v1316_v25, 0.0 }
 0x169   : > { %5029 = vrot.lane.b32.xlu0 %v5038_v57, %s6030_s29  ;;  %4764 = vmatmul.mubr.msk.bf16.gmra.mrb[28].mxu0 %vm608_vm1, %v3799_v20  ;;  %5770 = vrcp.f32 %v1097_v47  ;;  %vm1205_vm13 = vcmp.lt.s32.totalorder %v1181_v21, 16  ;;  %vm1192_vm15 = vcmp.ge.s32.totalorder %v1180_v34, 0  ;;  %vm1204_vm2 = vcmp.lt.s32.totalorder %v1180_v34, 16 }
 0x16a   : > { %5772 = vrcp.f32 %v1095_v29  ;;  %v6979_v32 = vsel %vm1296_vm6, 0.0, %v1315_v30  ;;  %v1447_v3 = vrot.slane %v6965_v59, 1  ;;  %v1558_v33 = vrot.slane %v6965_v59, 2  ;;  %vm6994_vm3 = vmand %vm1193_vm12, %vm1205_vm13 }
 0x16b   : > { %v1559_v25 = vrot.slane %v6812_v43, 2  ;;  %v1556_v37 = vrot.slane %v6973_v50, 2  ;;  %v5093_v31 = vpack.i.bf16 %v6837_v41, %v6979_v32  ;;  %vm7004_vm4 = vmand %vm1192_vm15, %vm1204_vm2  ;;  %v1443_v17 = vrot.slane %v6837_v41, 1 }
 0x16c   : > { %5054 = vrot.lane.b32.xlu1 %v5053_v45, %s6026_s12  ;;  %v1449_v24 = vsel %vm1411_vm14, %v1447_v3, %v1448_v51  ;;  %v7106_v62 = vsel %vm1296_vm6, 0.0, %v1321_v42  ;;  %v1453_v55 = vrot.slane %v6950_v38, 1  ;;  %vm2100_vm9 = vcmask 162816  }
 0x16d   : > { %5044 = vrot.lane.b32.xlu0 %v5023_v22, %s6026_s12  ;;  %v1386_v22 = vsel %vm1296_vm6, %v1319_v46, 0.0  ;;  %v5083_v46 = vpack.i.bf16 %v6812_v43, %v6965_v59  ;;  %v1560_v16 = vsel %vm1522_vm11, %v1558_v33, %v1559_v25  ;;  %v5173_v58 = vpack.i.bf16 %v6950_v38, %v7106_v62 }
 0x16e   : > { %v1450_v14 = vrot.slane %v1386_v22, 1  ;;  %v1561_v30 = vrot.slane %v1386_v22, 2  ;;  %vm2121_vm10 = vcmask 195584   ;;  %vm8327_vm12 = vcmask 228352  }
 0x16f   : > { %vm8326_vm13 = vcmask 261120   ;;  %vm8325_vm15 = vcmask 293888  }
 0x170   : > { %5059 = vrot.lane.b32.xlu1 %v5058_v23, %s6028_s25  ;;  %v1451_v4 = vsel %vm1411_vm14, %v1448_v51, %v1450_v14 }
 0x171   : > { %5049 = vrot.lane.b32.xlu0 %v5038_v57, %s6028_s25  ;;  %v5767_v56 = vpop.eup %5766  ;;  %v1445_v57 = vrot.slane %v6973_v50, 1  ;;  %v5103_v29 = vpack.i.bf16 %v1451_v4, %v1449_v24  ;;  %v1388_v50 = vsel %vm1296_vm6, %v1325_v9, 0.0 }
 0x172   : > { %v5769_v28 = vpop.eup %5768  ;;  %v1168_v2 = vmul.f32 %v5767_v56, %v6864_v63 }
 0x173   : > { %v5771_v7 = vpop.eup %5770  ;;  %v1166_v13 = vmul.f32 %v5769_v28, %v6867_v19  ;;  %v1562_v19 = vsel %vm1522_vm11, %v1559_v25, %v1561_v30 }
 0x174   : > { %5074 = vrot.lane.b32.xlu1 %v5053_v45, %s6025_s14  ;;  %v5773_v60 = vpop.eup %5772  ;;  %v1264_v63 = vsel %vm6994_vm3, %v1168_v2, 0.0  ;;  %v1169_v27 = vmul.f32 %v5771_v7, %v6870_v53  ;;  %v5118_v51 = vpack.i.bf16 %v1562_v19, %v1560_v16  ;;  %v1446_v19 = vsel %vm1411_vm14, %v1443_v17, %v1445_v57 }
 0x175   : > { %5064 = vrot.lane.b32.xlu0 %v5053_v45, %s6029_s17  ;;  %v1442_v45 = vrot.slane %v6979_v32, 1  ;;  %v1330_v0 = vrot.slane %v1264_v63, 7  ;;  %v1262_v5 = vsel %vm7004_vm4, %v1166_v13, 0.0  ;;  %v1167_v47 = vmul.f32 %v5773_v60, %v6876_v6 }
 0x176   : > { %v1327_v21 = vrot.slane %v1262_v5, 7  ;;  %v1265_v34 = vsel %vm6994_vm3, %v1169_v27, 0.0 }
 0x177   : > { %v1331_v53 = vrot.slane %v1265_v34, 7  ;;  %v1263_v22 = vsel %vm7004_vm4, %v1167_v47, 0.0  ;;  %v7029_v14 = vsel %vm1296_vm6, 0.0, %v1330_v0  ;;  %v1444_v25 = vsel %vm1411_vm14, %v1442_v45, %v1443_v17 }
 0x178   : > { %5084 = vrot.lane.b32.xlu1 %v5083_v46, %s6027_s24  ;;  %v1377_v6 = vsel %vm1296_vm6, 0.0, %v1327_v21  ;;  %v1328_v3 = vrot.slane %v1263_v22, 7  ;;  %v1952_v36 = vrot.slane %v7029_v14, 2  ;;  %v1554_v34 = vrot.slane %v6837_v41, 2 }
 0x179   : > { %5069 = vrot.lane.b32.xlu0 %v5058_v23, %s6030_s29  ;;  %v1390_v33 = vsel %vm1296_vm6, %v1331_v53, 0.0  ;;  %v7035_v10 = vsel %vm1296_vm6, %v1330_v0, %v1331_v53  ;;  %v1695_v24 = vrot.slane %v1377_v6, 1  ;;  %v1760_v60 = vrot.slane %v1377_v6, 2 }
 0x17a   : > { %v1890_v56 = vrot.slane %v1390_v33, 1  ;;  %v1389_v30 = vsel %vm1296_vm6, %v1328_v3, 0.0  ;;  %v5243_v28 = vpack.i.bf16 %v7035_v10, %v7029_v14  ;;  %v1955_v2 = vrot.slane %v1390_v33, 2 }
 0x17b   : > { %v1888_v20 = vrot.slane %v7035_v10, 1  ;;  %v1953_v7 = vrot.slane %v7035_v10, 2  ;;  %v1698_v4 = vrot.slane %v1389_v30, 1  ;;  %v1763_v13 = vrot.slane %v1389_v30, 2 }
 0x17c   : > { %5094 = vrot.lane.b32.xlu1 %v5093_v31, %s6023_s28  ;;  %v1329_v45 = vsel %vm1296_vm6, %v1327_v21, %v1328_v3  ;;  %v1553_v21 = vrot.slane %v6979_v32, 2  ;;  %v5133_v17 = vpack.i.bf16 %v1446_v19, %v1444_v25  ;;  %v1557_v30 = vsel %vm1522_vm11, %v1554_v34, %v1556_v37 }
 0x17d   : > { %5079 = vrot.lane.b32.xlu0 %v5058_v23, %s6024_s30  ;;  %v1887_v23 = vrot.slane %v7029_v14, 1  ;;  %v7047_v63 = vpack.i.bf16 %v1329_v45, %v1377_v6  ;;  %v7053_v16 = vsel %vm1411_vm14, %v1888_v20, %v1890_v56  ;;  %v1696_v0 = vrot.slane %v1329_v45, 1 }
 0x17e   : > { %v1761_v5 = vrot.slane %v1329_v45, 2  ;;  %v7059_v47 = vsel %vm1522_vm11, %v1952_v36, %v1953_v7  ;;  %v7068_v53 = vsel %vm1522_vm11, %v1953_v7, %v1955_v2  ;;  %v1555_v56 = vsel %vm1522_vm11, %v1553_v21, %v1554_v34 }
 0x17f   : > { %v7050_v27 = vsel %vm1411_vm14, %v1887_v23, %v1888_v20  ;;  %v1697_v22 = vsel %vm1411_vm14, %v1695_v24, %v1696_v0  ;;  %v1699_v6 = vsel %vm1411_vm14, %v1696_v0, %v1698_v4  ;;  %v5283_v57 = vpack.i.bf16 %v7068_v53, %v7059_v47 }
 0x180   : > { %5104 = vrot.lane.b32.xlu1 %v5103_v29, %s6029_s17  ;;  %v1762_v3 = vsel %vm1522_vm11, %v1760_v60, %v1761_v5  ;;  %v1764_v33 = vsel %vm1522_vm11, %v1761_v5, %v1763_v13  ;;  %v5138_v36 = vpack.i.bf16 %v1557_v30, %v1555_v56  ;;  %v7093_v2 = vsel %vm1296_vm6, 0.0, %v1324_v18 }
 0x181   : > { %5089 = vrot.lane.b32.xlu0 %v5083_v46, %s6023_s28  ;;  %v5258_v46 = vpack.i.bf16 %v7053_v16, %v7050_v27  ;;  %v7076_v23 = vpack.i.bf16 %v1764_v33, %v1762_v3  ;;  %v5163_v37 = vpack.i.bf16 %v6942_v40, %v7093_v2  ;;  %v1460_v18 = vrot.slane %v1388_v50, 1 }
 0x182   : > { %v1568_v20 = vrot.slane %v7093_v2, 2  ;;  %v1571_v7 = vrot.slane %v1388_v50, 2  ;;  %v1387_v24 = vsel %vm1296_vm6, %v1322_v8, 0.0  ;;  %v1569_v4 = vrot.slane %v6942_v40, 2 }
 0x183   : > { %v1455_v45 = vrot.slane %v1387_v24, 1  ;;  %v1452_v19 = vrot.slane %v7106_v62, 1  ;;  %v1566_v8 = vrot.slane %v1387_v24, 2  ;;  %v1563_v33 = vrot.slane %v7106_v62, 2 }
 0x184   : > { %5114 = vrot.lane.b32.xlu1 %v5103_v29, %s6025_s14  ;;  %v1570_v0 = vsel %vm1522_vm11, %v1568_v20, %v1569_v4  ;;  %v1572_v5 = vsel %vm1522_vm11, %v1569_v4, %v1571_v7 }
 0x185   : > { %5099 = vrot.lane.b32.xlu0 %v5093_v31, %s6027_s24  ;;  %v7074_v31 = vpack.i.bf16 %v1699_v6, %v1697_v22  ;;  %v5198_v34 = vpack.i.bf16 %v1572_v5, %v1570_v0  ;;  %v1454_v6 = vsel %vm1411_vm14, %v1452_v19, %v1453_v55  ;;  %v1456_v3 = vsel %vm1411_vm14, %v1453_v55, %v1455_v45 }
 0x186   : > { %v5213_v30 = vpack.i.bf16 %v1456_v3, %v1454_v6 }
 0x188   : > { %5119 = vrot.lane.b32.xlu1 %v5118_v51, %s6024_s30 }
 0x189   : > { %5109 = vrot.lane.b32.xlu0 %v5118_v51, %s6030_s29 }
 0x18c   : > { %5134 = vrot.lane.b32.xlu1 %v5133_v17, %s6026_s12 }
 0x18d   : > { %5124 = vrot.lane.b32.xlu0 %v5103_v29, %s6026_s12  ;;  %v1457_v29 = vrot.slane %v7093_v2, 1 }
 0x190   : > { %5139 = vrot.lane.b32.xlu1 %v5138_v36, %s6028_s25 }
 0x191   : > { %5129 = vrot.lane.b32.xlu0 %v5118_v51, %s6028_s25  ;;  %v1458_v51 = vrot.slane %v6942_v40, 1 }
 0x193   : > { %v1459_v9 = vsel %vm1411_vm14, %v1457_v29, %v1458_v51  ;;  %v1461_v25 = vsel %vm1411_vm14, %v1458_v51, %v1460_v18 }
 0x194   : > { %5154 = vrot.lane.b32.xlu1 %v5133_v17, %s6025_s14  ;;  %v5183_v42 = vpack.i.bf16 %v1461_v25, %v1459_v9 }
 0x195   : > { %5144 = vrot.lane.b32.xlu0 %v5133_v17, %s6029_s17  ;;  %v1564_v17 = vrot.slane %v6950_v38, 2 }
 0x197   : > { %v1565_v50 = vsel %vm1522_vm11, %v1563_v33, %v1564_v17 }
 0x198   : > { %5164 = vrot.lane.b32.xlu1 %v5163_v37, %s6027_s24 }
 0x199   : > { %5149 = vrot.lane.b32.xlu0 %v5138_v36, %s6030_s29  ;;  %v7117_v15 = vpop.permute.xlu0 %4889 }
 0x19c   : > { %5174 = vrot.lane.b32.xlu1 %v5173_v58, %s6023_s28 }
 0x19d   : > { %5159 = vrot.lane.b32.xlu0 %v5138_v36, %s6024_s30  ;;  %v7125_v13 = vpop.permute.xlu1 %4899 }
 0x19e   : > { %v4902_v14 = vunpack.i.h.bf16 %v7125_v13  ;;  %v4901_v10 = vunpack.i.l.bf16 %v7125_v13 }
 0x1a0   : > { %5184 = vrot.lane.b32.xlu1 %v5183_v42, %s6029_s17 }
 0x1a1   : > { %5169 = vrot.lane.b32.xlu0 %v5163_v37, %s6023_s28  ;;  %v1567_v37 = vsel %vm1522_vm11, %v1564_v17, %v1566_v8 }
 0x1a2   : > { %v4895_v60 = vpop.permute.xlu0 %4894  ;;  %v5218_v18 = vpack.i.bf16 %v1567_v37, %v1565_v50 }
 0x1a3   : > { %v4896_v7 = vunpack.i.l.bf16 %v4895_v60 }
 0x1a4   : > { %5194 = vrot.lane.b32.xlu1 %v5183_v42, %s6025_s14 }
 0x1a5   : > { %5179 = vrot.lane.b32.xlu0 %v5173_v58, %s6027_s24 }
 0x1a6   : > { %v7134_v21 = vpop.permute.xlu1 %4919 }
 0x1a7   : > { %v7136_v22 = vpop.permute.xlu0 %4904  ;;  %v4922_v3 = vunpack.i.h.bf16 %v7134_v21  ;;  %v4921_v13 = vunpack.i.l.bf16 %v7134_v21 }
 0x1a8   : > { %5199 = vrot.lane.b32.xlu1 %v5198_v34, %s6024_s30 }
 0x1a9   : > { %5189 = vrot.lane.b32.xlu0 %v5198_v34, %s6030_s29 }
 0x1aa   : > { %v7144_v56 = vpop.permute.xlu1 %4924 }
 0x1ab   : > { %v7146_v36 = vpop.permute.xlu0 %4909 }
 0x1ac   : > { %5214 = vrot.lane.b32.xlu1 %v5213_v30, %s6026_s12 }
 0x1ad   : > { %5204 = vrot.lane.b32.xlu0 %v5183_v42, %s6026_s12  ;;  %v4897_v42 = vunpack.i.h.bf16 %v4895_v60  ;;  %v2019_v60 = vsel %vm608_vm1, %v6457_v11, %v4896_v7  ;;  %v4892_v11 = vunpack.i.h.bf16 %v7117_v15 }
 0x1ae   : > { %v4935_v29 = vpop.permute.xlu1 %4934 }
 0x1af   : > { %v4915_v51 = vpop.permute.xlu0 %4914  ;;  %v4937_v19 = vunpack.i.h.bf16 %v4935_v29  ;;  %v4936_v55 = vunpack.i.l.bf16 %v4935_v29  ;;  %v4927_v29 = vunpack.i.h.bf16 %v7144_v56 }
 0x1b0   : > { %5219 = vrot.lane.b32.xlu1 %v5218_v18, %s6028_s25  ;;  %v4917_v4 = vunpack.i.h.bf16 %v4915_v51  ;;  %v4916_v45 = vunpack.i.l.bf16 %v4915_v51 }
 0x1b1   : > { %5209 = vrot.lane.b32.xlu0 %v5198_v34, %s6028_s25 }
 0x1b2   : > { %v7154_v58 = vpop.permute.xlu1 %4944  ;;  %v2018_v8 = vsel %vm608_vm1, %v6471_v52, %v4917_v4  ;;  %v2017_v34 = vsel %vm608_vm1, %v6460_v35, %v4916_v45  ;;  %v4891_v52 = vunpack.i.l.bf16 %v7117_v15  ;;  %v2040_v35 = vsel %vm2037_vm5, %v2019_v60, %v4901_v10 }
 0x1b3   : > { %v7156_v9 = vpop.permute.xlu0 %4929  ;;  %v2039_v17 = vsel %vm2037_vm5, %v2018_v8, %v4922_v3  ;;  %v2061_v16 = vsel %vm2058_vm7, %v2040_v35, %v4936_v55  ;;  %v4946_v60 = vunpack.i.l.bf16 %v7154_v58  ;;  %v4912_v3 = vunpack.i.h.bf16 %v7146_v36 }
 0x1b4   : > { %5234 = vrot.lane.b32.xlu1 %v5213_v30, %s6025_s14 }
 0x1b5   : > { %5224 = vrot.lane.b32.xlu0 %v5213_v30, %s6029_s17  ;;  %v2038_v30 = vsel %vm2037_vm5, %v2017_v34, %v4921_v13 }
 0x1b6   : > { %v7160_v25 = vpop.permute.xlu1 %4954  ;;  %v2059_v7 = vsel %vm2058_vm7, %v2038_v30, %v4891_v52 }
 0x1b7   : > { %v7162_v20 = vpop.permute.xlu0 %4939 }
 0x1b8   : > { %5244 = vrot.lane.b32.xlu1 %v5243_v28, %s6027_s24  ;;  %v2020_v28 = vsel %vm608_vm1, %v6504_v61, %v4897_v42  ;;  %v2060_v42 = vsel %vm2058_vm7, %v2039_v17, %v4892_v11  ;;  %v4942_v8 = vunpack.i.h.bf16 %v7162_v20 }
 0x1b9   : > { %5229 = vrot.lane.b32.xlu0 %v5218_v18, %s6030_s29  ;;  %v2041_v21 = vsel %vm2037_vm5, %v2020_v28, %v4902_v14  ;;  %v4906_v14 = vunpack.i.l.bf16 %v7136_v22  ;;  %v4947_v28 = vunpack.i.h.bf16 %v7154_v58  ;;  %v4911_v58 = vunpack.i.l.bf16 %v7146_v36 }
 0x1ba   : > { %v7169_v24 = vpop.permute.xlu1 %4959  ;;  %v2062_v27 = vsel %vm2058_vm7, %v2041_v21, %v4937_v19 }
 0x1bb   : > { %v7171_v0 = vpop.permute.xlu0 %4949  ;;  %v2080_v34 = vsel %vm2079_vm8, %v2059_v7, %v4906_v14  ;;  %v4957_v14 = vunpack.i.h.bf16 %v7160_v25 }
 0x1bc   : > { %5249 = vrot.lane.b32.xlu1 %v7047_v63, %s6023_s28  ;;  %v2101_v52 = vsel %vm2100_vm9, %v2080_v34, %v4911_v58  ;;  %v4952_v21 = vunpack.i.h.bf16 %v7171_v0  ;;  %v4951_v36 = vunpack.i.l.bf16 %v7171_v0 }
 0x1bd   : > { %5239 = vrot.lane.b32.xlu0 %v5218_v18, %s6024_s30 }
 0x1be   : > { %v4975_v5 = vpop.permute.xlu1 %4974 }
 0x1bf   : > { %v7186_v6 = vpop.permute.xlu0 %4964  ;;  %v4977_v33 = vunpack.i.h.bf16 %v4975_v5  ;;  %v4976_v61 = vunpack.i.l.bf16 %v4975_v5 }
 0x1c0   : > { %5259 = vrot.lane.b32.xlu1 %v5258_v46, %s6029_s17 }
 0x1c1   : > { %5254 = vrot.lane.b32.xlu0 %v7047_v63, %s6027_s24  ;;  %v4926_v63 = vunpack.i.l.bf16 %v7144_v56  ;;  %v2082_v18 = vsel %vm2079_vm8, %v2061_v16, %v4976_v61  ;;  %v2083_v51 = vsel %vm2079_vm8, %v2062_v27, %v4977_v33  ;;  %v4907_v56 = vunpack.i.h.bf16 %v7136_v22 }
 0x1c2   : > { %v4980_v50 = vpop.permute.xlu1 %4979 }
 0x1c3   : > { %v4982_v46 = vunpack.i.h.bf16 %v4980_v50  ;;  %v4981_v15 = vunpack.i.l.bf16 %v4980_v50  ;;  %v7204_v37 = vpop.permute.xlu0 %4969  ;;  %v2081_v22 = vsel %vm2079_vm8, %v2060_v42, %v4907_v56 }
 0x1c4   : > { %5264 = vrot.lane.b32.xlu1 %v7074_v31, %s6026_s12  ;;  %v2102_v35 = vsel %vm2100_vm9, %v2081_v22, %v4912_v3 }
 0x1c5   : > { %v2103_v4 = vsel %vm2100_vm9, %v2082_v18, %v4981_v15  ;;  %v2104_v45 = vsel %vm2100_vm9, %v2083_v51, %v4982_v46  ;;  %5274 = vrot.lane.b32.xlu0 %v7074_v31, %s6029_s17  ;;  %v4941_v31 = vunpack.i.l.bf16 %v7162_v20 }
 0x1c6   : > { %v7220_v10 = vpop.permute.xlu1 %4994  ;;  %v2124_v5 = vsel %vm2121_vm10, %v2103_v4, %v4926_v63  ;;  %v2125_v19 = vsel %vm2121_vm10, %v2104_v45, %v4927_v29 }
 0x1c7   : > { %v4985_v55 = vpop.permute.xlu0 %4984  ;;  %v2145_v61 = vsel %vm8327_vm12, %v2124_v5, %v4946_v60  ;;  %v2146_v20 = vsel %vm8327_vm12, %v2125_v19, %v4947_v28  ;;  %v2122_v30 = vsel %vm2121_vm10, %v2101_v52, %v4941_v31  ;;  %v4956_v28 = vunpack.i.l.bf16 %v7160_v25 }
 0x1c8   : > { %5269 = vrot.lane.b32.xlu1 %v7076_v23, %s6028_s25  ;;  %v4987_v13 = vunpack.i.h.bf16 %v4985_v55  ;;  %v4986_v33 = vunpack.i.l.bf16 %v4985_v55  ;;  %v2166_v16 = vsel %vm8326_vm13, %v2145_v61, %v4951_v36  ;;  %v2167_v46 = vsel %vm8326_vm13, %v2146_v20, %v4952_v21 }
 0x1c9   : > { %5279 = vrot.lane.b32.xlu0 %v7076_v23, %s6030_s29  ;;  %v2123_v23 = vsel %vm2121_vm10, %v2102_v35, %v4942_v8  ;;  %v2185_v7 = vpack.c.bf16 %v2167_v46, %v2166_v16  ;;  %v4997_v60 = vunpack.i.h.bf16 %v7220_v10  ;;  %v4996_v5 = vunpack.i.l.bf16 %v7220_v10 }
 0x1ca   : > { %v7238_v11 = vpop.permute.xlu1 %5004  ;;  %v2143_v15 = vsel %vm8327_vm12, %v2122_v30, %v4986_v33  ;;  %v2144_v0 = vsel %vm8327_vm12, %v2123_v23, %v4987_v13  ;;  %v4962_v19 = vunpack.i.h.bf16 %v7169_v24  ;;  %v4961_v55 = vunpack.i.l.bf16 %v7169_v24 }
 0x1cb   : > { %v4990_v17 = vpop.permute.xlu0 %4989  ;;  %v4932_v13 = vunpack.i.h.bf16 %v7156_v9  ;;  %v4931_v33 = vunpack.i.l.bf16 %v7156_v9  ;;  %v2024_v10 = vsel %vm608_vm1, %v6548_v12, %v4957_v14  ;;  %v2023_v20 = vsel %vm608_vm1, %v6595_v44, %v4956_v28 }
 0x1cc   : > { %v4992_v50 = vunpack.i.h.bf16 %v4990_v17  ;;  %v4991_v27 = vunpack.i.l.bf16 %v4990_v17  ;;  %5284 = vrot.lane.b32.xlu1 %v5283_v57, %s6030_s29  ;;  %v2022_v24 = vsel %vm608_vm1, %v6584_v49, %v4997_v60  ;;  %v2021_v52 = vsel %vm608_vm1, %v6618_v26, %v4996_v5 }
 0x1cd   : > { %v2044_v35 = vsel %vm2037_vm5, %v2023_v20, %v4961_v55  ;;  %v2045_v21 = vsel %vm2037_vm5, %v2024_v10, %v4962_v19  ;;  %v5007_v49 = vunpack.i.h.bf16 %v7238_v11  ;;  %v5006_v26 = vunpack.i.l.bf16 %v7238_v11 }
 0x1ce   : > { %v2164_v29 = vsel %vm8326_vm13, %v2143_v15, %v4991_v27  ;;  %v2165_v63 = vsel %vm8326_vm13, %v2144_v0, %v4992_v50  ;;  %v5015_v18 = vpop.permute.xlu1 %5014 }
 0x1cf   : > { %v5000_v51 = vpop.permute.xlu0 %4999  ;;  %v2184_v42 = vpack.c.bf16 %v2165_v63, %v2164_v29  ;;  %v5017_v22 = vunpack.i.h.bf16 %v5015_v18  ;;  %v5016_v3 = vunpack.i.l.bf16 %v5015_v18  ;;  %v4967_v63 = vunpack.i.h.bf16 %v7186_v6 }
 0x1d0   : > { %v5002_v8 = vunpack.i.h.bf16 %v5000_v51  ;;  %v5001_v31 = vunpack.i.l.bf16 %v5000_v51  ;;  %v4966_v18 = vunpack.i.l.bf16 %v7186_v6  ;;  %v4972_v6 = vunpack.i.h.bf16 %v7204_v37 }
 0x1d1   : > { %4689 = vmatprep.mubr.msk.bf16.mxu1 %vm8325_vm15, %v2184_v42  ;;  %v2065_v12 = vsel %vm2058_vm7, %v2044_v35, %v5016_v3  ;;  %v2066_v30 = vsel %vm2058_vm7, %v2045_v21, %v5017_v22 }
 0x1d2   : > { %v7257_v47 = vpop.permute.xlu1 %5024  ;;  %4690 = vmatmul.mubr.msk.bf16.vlgmr.msra.gmra.mrb[24].mxu1 %vm8325_vm15, %v2185_v7  ;;  %v2043_v9 = vsel %vm2037_vm5, %v2022_v24, %v5002_v8  ;;  %v2042_v36 = vsel %vm2037_vm5, %v2021_v52, %v5001_v31  ;;  %v4971_v8 = vunpack.i.l.bf16 %v7204_v37 }
 0x1d3   : > { %v7260_v53 = vpop.permute.xlu0 %5009  ;;  %v2063_v46 = vsel %vm2058_vm7, %v2042_v36, %v4931_v33  ;;  %v2064_v15 = vsel %vm2058_vm7, %v2043_v9, %v4932_v13  ;;  %v5027_v11 = vunpack.i.h.bf16 %v7257_v47  ;;  %v5026_v42 = vunpack.i.l.bf16 %v7257_v47 }
 0x1d4   : > { %v2084_v19 = vsel %vm2079_vm8, %v2063_v46, %v4966_v18  ;;  %v2085_v55 = vsel %vm2079_vm8, %v2064_v15, %v4967_v63 }
 0x1d5   : > { %v2105_v13 = vsel %vm2100_vm9, %v2084_v19, %v4971_v8  ;;  %v5012_v19 = vunpack.i.h.bf16 %v7260_v53 }
 0x1d6   : > { %v7262_v57 = vpop.permute.xlu1 %5034 }
 0x1d7   : > { %v7264_v4 = vpop.permute.xlu0 %5019  ;;  %v5037_v15 = vunpack.i.h.bf16 %v7262_v57 }
 0x1d8   : > { %v5022_v60 = vunpack.i.h.bf16 %v7264_v4  ;;  %v5021_v5 = vunpack.i.l.bf16 %v7264_v4  ;;  %v2106_v4 = vsel %vm2100_vm9, %v2085_v55, %v4972_v6  ;;  %v5011_v55 = vunpack.i.l.bf16 %v7260_v53 }
 0x1da   : > { %v7266_v45 = vpop.permute.xlu1 %5039  ;;  %v2126_v10 = vsel %vm2121_vm10, %v2105_v13, %v5021_v5  ;;  %v2127_v37 = vsel %vm2121_vm10, %v2106_v4, %v5022_v60 }
 0x1db   : > { %v7268_v56 = vpop.permute.xlu0 %5029  ;;  %v5042_v18 = vunpack.i.h.bf16 %v7266_v45 }
 0x1dc   : > { %v5032_v33 = vunpack.i.h.bf16 %v7268_v56 }
 0x1de   : > { %v5055_v34 = vpop.permute.xlu1 %5054 }
 0x1df   : > { %v7276_v58 = vpop.permute.xlu0 %5044  ;;  %v5057_v25 = vunpack.i.h.bf16 %v5055_v34  ;;  %v5056_v61 = vunpack.i.l.bf16 %v5055_v34 }
 0x1e1   : > { %v2086_v27 = vsel %vm2079_vm8, %v2065_v12, %v5056_v61  ;;  %v2087_v16 = vsel %vm2079_vm8, %v2066_v30, %v5057_v25  ;;  %v5031_v25 = vunpack.i.l.bf16 %v7268_v56 }
 0x1e2   : > { %v5060_v17 = vpop.permute.xlu1 %5059 }
 0x1e3   : > { %v5062_v44 = vunpack.i.h.bf16 %v5060_v17  ;;  %v5061_v23 = vunpack.i.l.bf16 %v5060_v17  ;;  %v7294_v50 = vpop.permute.xlu0 %5049 }
 0x1e5   : > { %v2107_v0 = vsel %vm2100_vm9, %v2086_v27, %v5061_v23  ;;  %v2108_v29 = vsel %vm2100_vm9, %v2087_v16, %v5062_v44 }
 0x1e6   : > { %v7306_v51 = vpop.permute.xlu1 %5074  ;;  %v2128_v7 = vsel %vm2121_vm10, %v2107_v0, %v5006_v26  ;;  %v2129_v14 = vsel %vm2121_vm10, %v2108_v29, %v5007_v49  ;;  %v5036_v0 = vunpack.i.l.bf16 %v7262_v57 }
 0x1e7   : > { %v5065_v28 = vpop.permute.xlu0 %5064  ;;  %v2149_v22 = vsel %vm8327_vm12, %v2128_v7, %v5026_v42  ;;  %v2150_v3 = vsel %vm8327_vm12, %v2129_v14, %v5027_v11  ;;  %v5077_v29 = vunpack.i.h.bf16 %v7306_v51  ;;  %v5076_v63 = vunpack.i.l.bf16 %v7306_v51 }
 0x1e8   : > { %v5067_v31 = vunpack.i.h.bf16 %v5065_v28  ;;  %v5066_v34 = vunpack.i.l.bf16 %v5065_v28  ;;  %v2170_v21 = vsel %vm8326_vm13, %v2149_v22, %v5031_v25  ;;  %v2171_v9 = vsel %vm8326_vm13, %v2150_v3, %v5032_v33 }
 0x1e9   : > { %v2187_v44 = vpack.c.bf16 %v2171_v9, %v2170_v21  ;;  %v5041_v11 = vunpack.i.l.bf16 %v7266_v45  ;;  %v2028_v51 = vsel %vm608_vm1, %v6719_v39, %v5037_v15  ;;  %v2027_v8 = vsel %vm608_vm1, %v6827_v48, %v5036_v0 }
 0x1ea   : > { %v7318_v47 = vpop.permute.xlu1 %5084  ;;  %v2147_v52 = vsel %vm8327_vm12, %v2126_v10, %v5066_v34  ;;  %v2148_v35 = vsel %vm8327_vm12, %v2127_v37, %v5067_v31  ;;  %v2026_v45 = vsel %vm608_vm1, %v6734_v1, %v5077_v29  ;;  %v2025_v31 = vsel %vm608_vm1, %v6847_v54, %v5076_v63 }
 0x1eb   : > { %v5070_v61 = vpop.permute.xlu0 %5069  ;;  %v2048_v34 = vsel %vm2037_vm5, %v2027_v8, %v5041_v11  ;;  %v2049_v22 = vsel %vm2037_vm5, %v2028_v51, %v5042_v18  ;;  %v5087_v1 = vunpack.i.h.bf16 %v7318_v47  ;;  %v5086_v54 = vunpack.i.l.bf16 %v7318_v47 }
 0x1ec   : > { %v5072_v20 = vunpack.i.h.bf16 %v5070_v61  ;;  %v5071_v24 = vunpack.i.l.bf16 %v5070_v61  ;;  %v5046_v21 = vunpack.i.l.bf16 %v7276_v58  ;;  %v5051_v29 = vunpack.i.l.bf16 %v7294_v50 }
 0x1ee   : > { %v2168_v36 = vsel %vm8326_vm13, %v2147_v52, %v5071_v24  ;;  %v2169_v17 = vsel %vm8326_vm13, %v2148_v35, %v5072_v20  ;;  %v5095_v56 = vpop.permute.xlu1 %5094  ;;  %v5047_v35 = vunpack.i.h.bf16 %v7276_v58  ;;  %v5052_v58 = vunpack.i.h.bf16 %v7294_v50 }
 0x1ef   : > { %v5080_v12 = vpop.permute.xlu0 %5079  ;;  %v2186_v30 = vpack.c.bf16 %v2169_v17, %v2168_v36  ;;  %v5097_v28 = vunpack.i.h.bf16 %v5095_v56  ;;  %v5096_v60 = vunpack.i.l.bf16 %v5095_v56 }
 0x1f0   : > { %v5082_v42 = vunpack.i.h.bf16 %v5080_v12  ;;  %v5081_v7 = vunpack.i.l.bf16 %v5080_v12 }
 0x1f1   : > { %4693 = vmatprep.mubr.msk.bf16.mxu1 %vm8325_vm15, %v2186_v30  ;;  %v2069_v39 = vsel %vm2058_vm7, %v2048_v34, %v5096_v60  ;;  %v2070_v4 = vsel %vm2058_vm7, %v2049_v22, %v5097_v28 }
 0x1f2   : > { %v7335_v23 = vpop.permute.xlu1 %5104  ;;  %4694 = vmatmul.mubr.msk.bf16.gmra.mrb[28].mxu1 %vm8325_vm15, %v2187_v44  ;;  %v2047_v53 = vsel %vm2037_vm5, %v2026_v45, %v5082_v42  ;;  %v2046_v3 = vsel %vm2037_vm5, %v2025_v31, %v5081_v7 }
 0x1f3   : > { %v7338_v49 = vpop.permute.xlu0 %5089  ;;  %v2067_v37 = vsel %vm2058_vm7, %v2046_v3, %v5011_v55  ;;  %v2068_v20 = vsel %vm2058_vm7, %v2047_v53, %v5012_v19  ;;  %v5107_v36 = vunpack.i.h.bf16 %v7335_v23  ;;  %v5106_v47 = vunpack.i.l.bf16 %v7335_v23 }
 0x1f4   : > { %v2088_v15 = vsel %vm2079_vm8, %v2067_v37, %v5046_v21  ;;  %v2089_v0 = vsel %vm2079_vm8, %v2068_v20, %v5047_v35 }
 0x1f5   : > { %v2109_v7 = vsel %vm2100_vm9, %v2088_v15, %v5051_v29 }
 0x1f6   : > { %v7340_v26 = vpop.permute.xlu1 %5114 }
 0x1f7   : > { %v7342_v27 = vpop.permute.xlu0 %5099 }
 0x1f8   : > { %v5102_v30 = vunpack.i.h.bf16 %v7342_v27  ;;  %v5101_v44 = vunpack.i.l.bf16 %v7342_v27  ;;  %v2110_v27 = vsel %vm2100_vm9, %v2089_v0, %v5052_v58  ;;  %v5092_v0 = vunpack.i.h.bf16 %v7338_v49 }
 0x1fa   : > { %v7344_v16 = vpop.permute.xlu1 %5119  ;;  %v2130_v19 = vsel %vm2121_vm10, %v2109_v7, %v5101_v44  ;;  %v2131_v50 = vsel %vm2121_vm10, %v2110_v27, %v5102_v30 }
 0x1fb   : > { %v7346_v46 = vpop.permute.xlu0 %5109  ;;  %v5121_v35 = vunpack.i.l.bf16 %v7344_v16 }
 0x1fc   : > { %v5111_v28 = vunpack.i.l.bf16 %v7346_v46 }
 0x1fe   : > { %v5135_v14 = vpop.permute.xlu1 %5134 }
 0x1ff   : > { %v7354_v5 = vpop.permute.xlu0 %5124  ;;  %v5137_v57 = vunpack.i.h.bf16 %v5135_v14  ;;  %v5136_v6 = vunpack.i.l.bf16 %v5135_v14  ;;  %v5112_v14 = vunpack.i.h.bf16 %v7346_v46 }
 0x200   : > { %v5127_v27 = vunpack.i.h.bf16 %v7354_v5 }
 0x201   : > { %v2090_v61 = vsel %vm2079_vm8, %v2069_v39, %v5136_v6  ;;  %v2091_v10 = vsel %vm2079_vm8, %v2070_v4, %v5137_v57 }
 0x202   : > { %v5140_v13 = vpop.permute.xlu1 %5139 }
 0x203   : > { %v5142_v48 = vunpack.i.h.bf16 %v5140_v13  ;;  %v5141_v33 = vunpack.i.l.bf16 %v5140_v13  ;;  %v7372_v25 = vpop.permute.xlu0 %5129 }
 0x205   : > { %v2111_v24 = vsel %vm2100_vm9, %v2090_v61, %v5141_v33  ;;  %v2112_v52 = vsel %vm2100_vm9, %v2091_v10, %v5142_v48 }
 0x206   : > { %v5155_v9 = vpop.permute.xlu1 %5154  ;;  %v2132_v17 = vsel %vm2121_vm10, %v2111_v24, %v5086_v54  ;;  %v2133_v56 = vsel %vm2121_vm10, %v2112_v52, %v5087_v1  ;;  %v5117_v1 = vunpack.i.h.bf16 %v7340_v26  ;;  %v5116_v54 = vunpack.i.l.bf16 %v7340_v26 }
 0x207   : > { %v5145_v12 = vpop.permute.xlu0 %5144  ;;  %v2153_v11 = vsel %vm8327_vm12, %v2132_v17, %v5106_v47  ;;  %v2154_v42 = vsel %vm8327_vm12, %v2133_v56, %v5107_v36  ;;  %v5157_v61 = vunpack.i.h.bf16 %v5155_v9  ;;  %v5156_v10 = vunpack.i.l.bf16 %v5155_v9 }
 0x208   : > { %v5147_v63 = vunpack.i.h.bf16 %v5145_v12  ;;  %v5146_v18 = vunpack.i.l.bf16 %v5145_v12  ;;  %v2174_v8 = vsel %vm8326_vm13, %v2153_v11, %v5111_v28  ;;  %v2175_v45 = vsel %vm8326_vm13, %v2154_v42, %v5112_v14 }
 0x209   : > { %v2189_v3 = vpack.c.bf16 %v2175_v45, %v2174_v8  ;;  %v5122_v52 = vunpack.i.h.bf16 %v7344_v16  ;;  %v2032_v17 = vsel %vm608_vm1, %v6812_v43, %v5117_v1  ;;  %v2031_v56 = vsel %vm608_vm1, %v6965_v59, %v5116_v54 }
 0x20a   : > { %v7394_v23 = vpop.permute.xlu1 %5164  ;;  %v2151_v6 = vsel %vm8327_vm12, %v2130_v19, %v5146_v18  ;;  %v2152_v51 = vsel %vm8327_vm12, %v2131_v50, %v5147_v63  ;;  %v2030_v26 = vsel %vm608_vm1, %v6837_v41, %v5157_v61  ;;  %v2029_v9 = vsel %vm608_vm1, %v6979_v32, %v5156_v10 }
 0x20b   : > { %v5150_v60 = vpop.permute.xlu0 %5149  ;;  %v5091_v43 = vunpack.i.l.bf16 %v7338_v49  ;;  %v2052_v59 = vsel %vm2037_vm5, %v2031_v56, %v5121_v35  ;;  %v2053_v58 = vsel %vm2037_vm5, %v2032_v17, %v5122_v52  ;;  %v5126_v49 = vunpack.i.l.bf16 %v7354_v5 }
 0x20c   : > { %v5152_v55 = vunpack.i.h.bf16 %v5150_v60  ;;  %v5151_v57 = vunpack.i.l.bf16 %v5150_v60  ;;  %v5167_v60 = vunpack.i.h.bf16 %v7394_v23  ;;  %v5166_v19 = vunpack.i.l.bf16 %v7394_v23 }
 0x20d   : > { %v5132_v23 = vunpack.i.h.bf16 %v7372_v25 }
 0x20e   : > { %v2172_v31 = vsel %vm8326_vm13, %v2151_v6, %v5151_v57  ;;  %v2173_v34 = vsel %vm8326_vm13, %v2152_v51, %v5152_v55  ;;  %v5175_v46 = vpop.permute.xlu1 %5174 }
 0x20f   : > { %v2188_v22 = vpack.c.bf16 %v2173_v34, %v2172_v31  ;;  %v5160_v53 = vpop.permute.xlu0 %5159  ;;  %v5177_v21 = vunpack.i.h.bf16 %v5175_v46  ;;  %v5176_v36 = vunpack.i.l.bf16 %v5175_v46  ;;  %v5131_v46 = vunpack.i.l.bf16 %v7372_v25 }
 0x210   : > { %v5162_v20 = vunpack.i.h.bf16 %v5160_v53  ;;  %v5161_v24 = vunpack.i.l.bf16 %v5160_v53 }
 0x211   : > { %4697 = vmatprep.mubr.msk.bf16.mxu1 %vm8325_vm15, %v2188_v22  ;;  %v2073_v41 = vsel %vm2058_vm7, %v2052_v59, %v5176_v36  ;;  %v2074_v32 = vsel %vm2058_vm7, %v2053_v58, %v5177_v21 }
 0x212   : > { %v7411_v13 = vpop.permute.xlu1 %5184  ;;  %4698 = vmatmul.mubr.msk.bf16.gmra.mrb[32].mxu1 %vm8325_vm15, %v2189_v3  ;;  %v2051_v30 = vsel %vm2037_vm5, %v2030_v26, %v5162_v20  ;;  %v2050_v16 = vsel %vm2037_vm5, %v2029_v9, %v5161_v24 }
 0x213   : > { %v7414_v39 = vpop.permute.xlu0 %5169  ;;  %v2071_v63 = vsel %vm2058_vm7, %v2050_v16, %v5091_v43  ;;  %v2072_v18 = vsel %vm2058_vm7, %v2051_v30, %v5092_v0  ;;  %v5187_v22 = vunpack.i.h.bf16 %v7411_v13  ;;  %v5186_v53 = vunpack.i.l.bf16 %v7411_v13 }
 0x214   : > { %v2092_v57 = vsel %vm2079_vm8, %v2071_v63, %v5126_v49  ;;  %v2093_v6 = vsel %vm2079_vm8, %v2072_v18, %v5127_v27  ;;  %v5171_v59 = vunpack.i.l.bf16 %v7414_v39 }
 0x215   : > { %v2113_v54 = vsel %vm2100_vm9, %v2092_v57, %v5131_v46  ;;  %v2114_v61 = vsel %vm2100_vm9, %v2093_v6, %v5132_v23 }
 0x216   : > { %v7416_v4 = vpop.permute.xlu1 %5194 }
 0x217   : > { %v7418_v48 = vpop.permute.xlu0 %5179  ;;  %v5196_v63 = vunpack.i.l.bf16 %v7416_v4 }
 0x218   : > { %v5182_v8 = vunpack.i.h.bf16 %v7418_v48  ;;  %v5181_v5 = vunpack.i.l.bf16 %v7418_v48 }
 0x21a   : > { %v7420_v33 = vpop.permute.xlu1 %5199  ;;  %v2134_v24 = vsel %vm2121_vm10, %v2113_v54, %v5181_v5  ;;  %v2135_v25 = vsel %vm2121_vm10, %v2114_v61, %v5182_v8 }
 0x21b   : > { %v7424_v37 = vpop.permute.xlu0 %5189  ;;  %v5201_v27 = vunpack.i.l.bf16 %v7420_v33 }
 0x21c   : > { %v5192_v52 = vunpack.i.h.bf16 %v7424_v37  ;;  %v5191_v13 = vunpack.i.l.bf16 %v7424_v37  ;;  %v5172_v37 = vunpack.i.h.bf16 %v7414_v39 }
 0x21e   : > { %v5215_v47 = vpop.permute.xlu1 %5214 }
 0x21f   : > { %v7436_v12 = vpop.permute.xlu0 %5204  ;;  %v5217_v44 = vunpack.i.h.bf16 %v5215_v47  ;;  %v5216_v15 = vunpack.i.l.bf16 %v5215_v47 }
 0x221   : > { %v2094_v14 = vsel %vm2079_vm8, %v2073_v41, %v5216_v15  ;;  %v2095_v28 = vsel %vm2079_vm8, %v2074_v32, %v5217_v44 }
 0x222   : > { %v5220_v29 = vpop.permute.xlu1 %5219 }
 0x223   : > { %v5222_v11 = vunpack.i.h.bf16 %v5220_v29  ;;  %v5221_v42 = vunpack.i.l.bf16 %v5220_v29  ;;  %v7448_v7 = vpop.permute.xlu0 %5209  ;;  %v5197_v29 = vunpack.i.h.bf16 %v7416_v4  ;;  %v5207_v4 = vunpack.i.h.bf16 %v7436_v12 }
 0x224   : > { %v5212_v57 = vunpack.i.h.bf16 %v7448_v7  ;;  %v5211_v6 = vunpack.i.l.bf16 %v7448_v7 }
 0x225   : > { %v2115_v50 = vsel %vm2100_vm9, %v2094_v14, %v5221_v42  ;;  %v2116_v55 = vsel %vm2100_vm9, %v2095_v28, %v5222_v11  ;;  %v5202_v42 = vunpack.i.h.bf16 %v7420_v33  ;;  %v2035_v33 = vsel %vm608_vm1, %v7093_v2, %v5196_v63 }
 0x226   : > { %v5235_v51 = vpop.permute.xlu1 %5234  ;;  %v2136_v45 = vsel %vm2121_vm10, %v2115_v50, %v5166_v19  ;;  %v2137_v31 = vsel %vm2121_vm10, %v2116_v55, %v5167_v60  ;;  %v2036_v19 = vsel %vm608_vm1, %v6942_v40, %v5197_v29  ;;  %v2056_v5 = vsel %vm2037_vm5, %v2035_v33, %v5201_v27 }
 0x227   : > { %v5225_v34 = vpop.permute.xlu0 %5224  ;;  %v2157_v10 = vsel %vm8327_vm12, %v2136_v45, %v5186_v53  ;;  %v2158_v20 = vsel %vm8327_vm12, %v2137_v31, %v5187_v22  ;;  %v5237_v21 = vunpack.i.h.bf16 %v5235_v51  ;;  %v5236_v36 = vunpack.i.l.bf16 %v5235_v51 }
 0x228   : > { %v5227_v3 = vunpack.i.h.bf16 %v5225_v34  ;;  %v5226_v1 = vunpack.i.l.bf16 %v5225_v34  ;;  %v2178_v9 = vsel %vm8326_vm13, %v2157_v10, %v5191_v13  ;;  %v2179_v30 = vsel %vm8326_vm13, %v2158_v20, %v5192_v52 }
 0x229   : > { %v2191_v32 = vpack.c.bf16 %v2179_v30, %v2178_v9  ;;  %v2034_v18 = vsel %vm608_vm1, %v6950_v38, %v5237_v21  ;;  %v2033_v11 = vsel %vm608_vm1, %v7106_v62, %v5236_v36  ;;  %v5206_v38 = vunpack.i.l.bf16 %v7436_v12 }
 0x22a   : > { %v7470_v48 = vpop.permute.xlu1 %5244  ;;  %v2155_v56 = vsel %vm8327_vm12, %v2134_v24, %v5226_v1  ;;  %v2156_v26 = vsel %vm8327_vm12, %v2135_v25, %v5227_v3  ;;  %v2057_v45 = vsel %vm2037_vm5, %v2036_v19, %v5202_v42 }
 0x22b   : > { %v5230_v35 = vpop.permute.xlu0 %5229  ;;  %v5247_v53 = vunpack.i.h.bf16 %v7470_v48  ;;  %v5246_v7 = vunpack.i.l.bf16 %v7470_v48 }
 0x22c   : > { %v5232_v47 = vunpack.i.h.bf16 %v5230_v35  ;;  %v5231_v17 = vunpack.i.l.bf16 %v5230_v35 }
 0x22e   : > { %v2176_v16 = vsel %vm8326_vm13, %v2155_v56, %v5231_v17  ;;  %v2177_v44 = vsel %vm8326_vm13, %v2156_v26, %v5232_v47  ;;  %v5250_v15 = vpop.permute.xlu1 %5249 }
 0x22f   : > { %v2190_v0 = vpack.c.bf16 %v2177_v44, %v2176_v16  ;;  %v5240_v43 = vpop.permute.xlu0 %5239  ;;  %v5252_v12 = vunpack.i.h.bf16 %v5250_v15  ;;  %v5251_v51 = vunpack.i.l.bf16 %v5250_v15 }
 0x230   : > { %v5242_v58 = vunpack.i.h.bf16 %v5240_v43  ;;  %v5241_v41 = vunpack.i.l.bf16 %v5240_v43 }
 0x231   : > { %4701 = vmatprep.mubr.msk.bf16.mxu1 %vm8325_vm15, %v2190_v0  ;;  %v2077_v54 = vsel %vm2058_vm7, %v2056_v5, %v5251_v51  ;;  %v2078_v61 = vsel %vm2058_vm7, %v2057_v45, %v5252_v12 }
 0x232   : > { %v2055_v39 = vsel %vm2037_vm5, %v2034_v18, %v5242_v58  ;;  %v2054_v49 = vsel %vm2037_vm5, %v2033_v11, %v5241_v41  ;;  %v5260_v14 = vpop.permute.xlu1 %5259  ;;  %4702 = vmatmul.mubr.msk.bf16.gmra.mrb[36].mxu1 %vm8325_vm15, %v2191_v32  ;;  %v7539_v11 = vld [vmem:[%s8320_s8] ss:$0 sm:$0xff] }
 0x233   : > { %v2075_v28 = vsel %vm2058_vm7, %v2054_v49, %v5171_v59  ;;  %v2076_v62 = vsel %vm2058_vm7, %v2055_v39, %v5172_v37  ;;  %v5255_v60 = vpop.permute.xlu0 %5254  ;;  %v5262_v10 = vunpack.i.h.bf16 %v5260_v14  ;;  %v5261_v20 = vunpack.i.l.bf16 %v5260_v14 }
 0x234   : > { %v2096_v50 = vsel %vm2079_vm8, %v2075_v28, %v5206_v38  ;;  %v2097_v55 = vsel %vm2079_vm8, %v2076_v62, %v5207_v4  ;;  %v5257_v31 = vunpack.i.h.bf16 %v5255_v60  ;;  %v5256_v40 = vunpack.i.l.bf16 %v5255_v60 }
 0x235   : > { %v2117_v2 = vsel %vm2100_vm9, %v2096_v50, %v5211_v6  ;;  %v2118_v23 = vsel %vm2100_vm9, %v2097_v55, %v5212_v57 }
 0x236   : > { %v5265_v8 = vpop.permute.xlu1 %5264  ;;  %v2138_v25 = vsel %vm2121_vm10, %v2117_v2, %v5256_v40  ;;  %v2139_v52 = vsel %vm2121_vm10, %v2118_v23, %v5257_v31 }
 0x237   : > { %v5275_v34 = vpop.permute.xlu0 %5274  ;;  %v5267_v46 = vunpack.i.h.bf16 %v5265_v8  ;;  %v5266_v22 = vunpack.i.l.bf16 %v5265_v8  ;;  %v7546_v8 = vstv %s2502_s16 }
 0x238   : > { %v5277_v3 = vunpack.i.h.bf16 %v5275_v34  ;;  %v5276_v1 = vunpack.i.l.bf16 %v5275_v34  ;;  %v2504_v31 = vadd.s32 1, %v7546_v8  ;;  %vm2513_vm4 = vcmp.ge.s32.totalorder %v7546_v8, 0 }
 0x239   : > { %v2098_v36 = vsel %vm2079_vm8, %v2077_v54, %v5266_v22  ;;  %v2099_v48 = vsel %vm2079_vm8, %v2078_v61, %v5267_v46 }
 0x23a   : > { %v5270_v24 = vpop.permute.xlu1 %5269  ;;  %v2159_v56 = vsel %vm8327_vm12, %v2138_v25, %v5276_v1  ;;  %v2160_v26 = vsel %vm8327_vm12, %v2139_v52, %v5277_v3  ;;  %vm2514_vm2 = vcmp.ge.s32.totalorder %v2504_v31, 0  ;;  %vm2524_vm3 = vcmp.lt.s32.totalorder %v2504_v31, 16 }
 0x23b   : > { %v5272_v13 = vunpack.i.h.bf16 %v5270_v24  ;;  %v5271_v35 = vunpack.i.l.bf16 %v5270_v24  ;;  %v5280_v21 = vpop.permute.xlu0 %5279 }
 0x23c   : > { %v5282_v47 = vunpack.i.h.bf16 %v5280_v21  ;;  %v5281_v17 = vunpack.i.l.bf16 %v5280_v21 }
 0x23d   : > { %v2119_v9 = vsel %vm2100_vm9, %v2098_v36, %v5271_v35  ;;  %v2120_v30 = vsel %vm2100_vm9, %v2099_v48, %v5272_v13 }
 0x23e   : > { %v2140_v16 = vsel %vm2121_vm10, %v2119_v9, %v5246_v7  ;;  %v2141_v44 = vsel %vm2121_vm10, %v2120_v30, %v5247_v53  ;;  %v2180_v15 = vsel %vm8326_vm13, %v2159_v56, %v5281_v17  ;;  %v2181_v37 = vsel %vm8326_vm13, %v2160_v26, %v5282_v47  ;;  %v5285_v0 = vpop.permute.xlu1 %5284 }
 0x23f   : > { %v2192_v43 = vpack.c.bf16 %v2181_v37, %v2180_v15  ;;  %v5287_v59 = vunpack.i.h.bf16 %v5285_v0  ;;  %v5286_v58 = vunpack.i.l.bf16 %v5285_v0  ;;  %v2161_v41 = vsel %vm8327_vm12, %v2140_v16, %v5261_v20 }
 0x240   : > { %v2162_v32 = vsel %vm8327_vm12, %v2141_v44, %v5262_v10 }
 0x241   : > { %v2182_v29 = vsel %vm8326_vm13, %v2161_v41, %v5286_v58  ;;  %v2183_v63 = vsel %vm8326_vm13, %v2162_v32, %v5287_v59  ;;  %4705 = vmatprep.mubr.msk.bf16.mxu1 %vm8325_vm15, %v2192_v43  ;;  %vm7551_vm13 = vmand %vm2514_vm2, %vm2524_vm3 }
 0x242   : > { %v2193_v18 = vpack.c.bf16 %v2183_v63, %v2182_v29 }
 0x244   : > { %4706 = vmatmul.mubr.msk.bf16.gmra.mrb[40].mxu1 %vm8325_vm15, %v2193_v18  ;;  %vm2523_vm15 = vcmp.lt.s32.totalorder %v7546_v8, 16 }
 0x245   : > { %vm7555_vm12 = vmand %vm2513_vm4, %vm2523_vm15 }
 0x2a5   : > { %v4691_v42 = vpop.f32.mrb[24].mxu1 }
 0x2a6   : > { %v2292_v27 = vadd.f32 %v4691_v42, %v7539_v11  ;;  %v2283_v39 = vpop.f32.mrb[25].mxu1 }
 0x2a7   : > { %v2284_v49 = vadd.f32 %v7539_v11, %v2283_v39  ;;  %v4692_v14 = vpop.f32.mrb[26].mxu1 }
 0x2a8   : > { %v4469_v4 = vmul.f32 -1.442695, %v2292_v27  ;;  %v2295_v38 = vadd.f32 %v4692_v14, %v7539_v11  ;;  %v2286_v28 = vpop.f32.mrb[27].mxu1 }
 0x2a9   : > { %v4467_v62 = vmul.f32 -1.442695, %v2284_v49  ;;  %v2287_v60 = vadd.f32 %v7539_v11, %v2286_v28 }
 0x2aa   : > { %5774 = vpow2.f32 %v4469_v4  ;;  %v4470_v19 = vmul.f32 -1.442695, %v2295_v38 }
 0x2ab   : > { %5776 = vpow2.f32 %v4467_v62  ;;  %v4468_v33 = vmul.f32 -1.442695, %v2287_v60 }
 0x2ac   : > { %5778 = vpow2.f32 %v4470_v19 }
 0x2ad   : > { %5780 = vpow2.f32 %v4468_v33 }
 0x2b4   : > { %v5775_v50 = vpop.eup %5774 }
 0x2b5   : > { %v5777_v55 = vpop.eup %5776  ;;  %v2424_v57 = vadd.f32 1.0, %v5775_v50 }
 0x2b6   : > { %v5779_v6 = vpop.eup %5778  ;;  %v2422_v12 = vadd.f32 1.0, %v5777_v55 }
 0x2b7   : > { %v5781_v51 = vpop.eup %5780  ;;  %5782 = vrcp.f32 %v2424_v57  ;;  %v2425_v5 = vadd.f32 1.0, %v5779_v6 }
 0x2b8   : > { %5784 = vrcp.f32 %v2422_v12  ;;  %v2423_v45 = vadd.f32 1.0, %v5781_v51 }
 0x2b9   : > { %5786 = vrcp.f32 %v2425_v5 }
 0x2ba   : > { %5788 = vrcp.f32 %v2423_v45 }
 0x2c1   : > { %v5783_v40 = vpop.eup %5782 }
 0x2c2   : > { %v5785_v2 = vpop.eup %5784  ;;  %v2484_v23 = vmul.f32 %v5783_v40, %v2292_v27 }
 0x2c3   : > { %v5787_v22 = vpop.eup %5786  ;;  %v2482_v53 = vmul.f32 %v5785_v2, %v2284_v49 }
 0x2c4   : > { %v5789_v7 = vpop.eup %5788  ;;  %v2565_v3 = vsel %vm7551_vm13, %v2484_v23, 0.0  ;;  %v2485_v1 = vmul.f32 %v5787_v22, %v2295_v38  ;;  %v2506_v22 = vadd.s32 3, %v7546_v8 }
 0x2c5   : > { %v2563_v54 = vsel %vm7555_vm12, %v2482_v53, 0.0  ;;  %v2483_v61 = vmul.f32 %v5789_v7, %v2287_v60  ;;  %v4695_v10 = vpop.f32.mrb[28].mxu1  ;;  %v2614_v20 = vrot.slane %v2565_v3, 7  ;;  %v2505_v3 = vadd.s32 2, %v7546_v8 }
 0x2c6   : > { %v2566_v24 = vsel %vm7551_vm13, %v2485_v1, 0.0  ;;  %v7566_v25 = vadd.f32 %v4695_v10, %v7539_v11  ;;  %v2299_v52 = vpop.f32.mrb[29].mxu1  ;;  %v2611_v48 = vrot.slane %v2563_v54, 7  ;;  %vm2526_vm13 = vcmp.lt.s32.totalorder %v2506_v22, 16 }
 0x2c7   : > { %v2615_v13 = vrot.slane %v2566_v24, 7  ;;  %v2564_v35 = vsel %vm7555_vm12, %v2483_v61, 0.0  ;;  %v7571_v21 = vadd.f32 %v7539_v11, %v2299_v52  ;;  %v4696_v36 = vpop.f32.mrb[30].mxu1  ;;  %v7580_v16 = vsel %vm1296_vm6, 0.0, %v2614_v20 }
 0x2c8   : > { %v2612_v47 = vrot.slane %v2564_v35, 7  ;;  %v4473_v17 = vmul.f32 -1.442695, %v7566_v25  ;;  %v7575_v56 = vadd.f32 %v4696_v36, %v7539_v11  ;;  %v2302_v26 = vpop.f32.mrb[31].mxu1  ;;  %v2710_v41 = vrot.slane %v7580_v16, 1 }
 0x2c9   : > { %v2680_v9 = vsel %vm1296_vm6, %v2615_v13, 0.0  ;;  %v4471_v30 = vmul.f32 -1.442695, %v7571_v21  ;;  %v7587_v43 = vadd.f32 %v7539_v11, %v2302_v26  ;;  %v7590_v59 = vsel %vm1296_vm6, %v2614_v20, %v2615_v13 }
 0x2ca   : > { %v7583_v44 = vsel %vm1296_vm6, %v2611_v48, %v2612_v47  ;;  %v2713_v15 = vrot.slane %v2680_v9, 1  ;;  %5790 = vpow2.f32 %v4473_v17  ;;  %v4474_v37 = vmul.f32 -1.442695, %v7575_v56 }
 0x2cb   : > { %v2801_v0 = vrot.slane %v2680_v9, 2  ;;  %5792 = vpow2.f32 %v4471_v30  ;;  %v5288_v58 = vpack.i.bf16 %v7590_v59, %v7580_v16  ;;  %v2711_v32 = vrot.slane %v7590_v59, 1 }
 0x2cc   : > { %5794 = vpow2.f32 %v4474_v37  ;;  %v4472_v29 = vmul.f32 -1.442695, %v7587_v43  ;;  %v2799_v63 = vrot.slane %v7590_v59, 2  ;;  %v2679_v18 = vsel %vm1296_vm6, %v2612_v47, 0.0 }
 0x2cd   : > { %5289 = vrot.lane.b32.xlu0 %v5288_v58, %s6023_s28  ;;  %v2712_v42 = vsel %vm1411_vm14, %v2710_v41, %v2711_v32  ;;  %v2714_v27 = vsel %vm1411_vm14, %v2711_v32, %v2713_v15  ;;  %v2798_v39 = vrot.slane %v7580_v16, 2  ;;  %v7604_v14 = vsel %vm1296_vm6, 0.0, %v2611_v48 }
 0x2ce   : > { %5796 = vpow2.f32 %v4472_v29  ;;  %v5293_v49 = vpack.i.bf16 %v2714_v27, %v2712_v42  ;;  %v2802_v38 = vsel %vm1522_vm11, %v2799_v63, %v2801_v0  ;;  %v2708_v28 = vrot.slane %v2679_v18, 1 }
 0x2cf   : > { %v2800_v4 = vsel %vm1522_vm11, %v2798_v39, %v2799_v63  ;;  %v2706_v62 = vrot.slane %v7583_v44, 1  ;;  %v2705_v60 = vrot.slane %v7604_v14, 1  ;;  %v2796_v50 = vrot.slane %v2679_v18, 2 }
 0x2d0   : > { %5294 = vrot.lane.b32.xlu1 %v5293_v49, %s6025_s14  ;;  %v5298_v19 = vpack.i.bf16 %v2802_v38, %v2800_v4  ;;  %v2794_v51 = vrot.slane %v7583_v44, 2  ;;  %v2793_v31 = vrot.slane %v7604_v14, 2  ;;  %vm2516_vm12 = vcmp.ge.s32.totalorder %v2506_v22, 0  ;;  %v5611_v22 = vld [vmem:[%s8319_s7 + $0x14] sm:$0xff]  }
 0x2d1   : > { %5304 = vrot.lane.b32.xlu0 %v5293_v49, %s6026_s12  ;;  %v2707_v6 = vsel %vm1411_vm14, %v2705_v60, %v2706_v62  ;;  %v2709_v12 = vsel %vm1411_vm14, %v2706_v62, %v2708_v28  ;;  %vm7624_vm15 = vmand %vm2516_vm12, %vm2526_vm13  ;;  %vm2515_vm2 = vcmp.ge.s32.totalorder %v2505_v3, 0  ;;  %vm2525_vm3 = vcmp.lt.s32.totalorder %v2505_v3, 16  ;;  %4709 = vmatprep.subr.bf16.mxu1 %v5611_v22 }
 0x2d2   : > { %v5313_v34 = vpack.i.bf16 %v2709_v12, %v2707_v6  ;;  %v2795_v23 = vsel %vm1522_vm11, %v2793_v31, %v2794_v51  ;;  %v2797_v46 = vsel %vm1522_vm11, %v2794_v51, %v2796_v50  ;;  %vm7632_vm4 = vmand %vm2515_vm2, %vm2525_vm3  ;;  %4710 = vmatpush3.bf16.msra.mxu1 %v5611_v22 }
 0x2d3   : > { %v5318_v7 = vpack.i.bf16 %v2797_v46, %v2795_v23 }
 0x2d4   : > { %v5791_v33 = vpop.eup %5790  ;;  %5299 = vrot.lane.b32.xlu1 %v5298_v19, %s6024_s30 }
 0x2d5   : > { %v5793_v55 = vpop.eup %5792  ;;  %v2428_v57 = vadd.f32 1.0, %v5791_v33  ;;  %5309 = vrot.lane.b32.xlu0 %v5298_v19, %s6028_s25 }
 0x2d6   : > { %v5795_v5 = vpop.eup %5794  ;;  %v2426_v45 = vadd.f32 1.0, %v5793_v55 }
 0x2d7   : > { %5798 = vrcp.f32 %v2428_v57  ;;  %v2429_v40 = vadd.f32 1.0, %v5795_v5 }
 0x2d8   : > { %5800 = vrcp.f32 %v2426_v45  ;;  %v5797_v2 = vpop.eup %5796 }
 0x2d9   : > { %5802 = vrcp.f32 %v2429_v40  ;;  %v2427_v53 = vadd.f32 1.0, %v5797_v2  ;;  %5314 = vrot.lane.b32.xlu0 %v5313_v34, %s6025_s14 }
 0x2db   : > { %5804 = vrcp.f32 %v2427_v53 }
 0x2dd   : > { %5319 = vrot.lane.b32.xlu0 %v5318_v7, %s6024_s30 }
 0x2e1   : > { %v5799_v1 = vpop.eup %5798 }
 0x2e2   : > { %v5801_v61 = vpop.eup %5800  ;;  %v2488_v10 = vmul.f32 %v5799_v1, %v7566_v25 }
 0x2e3   : > { %v5803_v20 = vpop.eup %5802  ;;  %v2486_v24 = vmul.f32 %v5801_v61, %v7571_v21 }
 0x2e4   : > { %v2569_v52 = vsel %vm7624_vm15, %v2488_v10, 0.0  ;;  %v2489_v35 = vmul.f32 %v5803_v20, %v7575_v56  ;;  %v2508_v10 = vadd.s32 5, %v7546_v8 }
 0x2e5   : > { %v4699_v36 = vpop.f32.mrb[32].mxu1  ;;  %v5805_v17 = vpop.eup %5804  ;;  %v2620_v26 = vrot.slane %v2569_v52, 7  ;;  %v2567_v30 = vsel %vm7632_vm4, %v2486_v24, 0.0  ;;  %v2507_v24 = vadd.s32 4, %v7546_v8 }
 0x2e6   : > { %v7638_v48 = vadd.f32 %v4699_v36, %v7539_v11  ;;  %v2315_v47 = vpop.f32.mrb[33].mxu1  ;;  %v2570_v25 = vsel %vm7624_vm15, %v2489_v35, 0.0  ;;  %v2487_v56 = vmul.f32 %v5805_v17, %v7587_v43  ;;  %v2617_v42 = vrot.slane %v2567_v30, 7  ;;  %v5612_v17 = vld [vmem:[%s8319_s7 + $0x1c] sm:$0xff]  }
 0x2e7   : > { %v7643_v21 = vadd.f32 %v7539_v11, %v2315_v47  ;;  %v4700_v9 = vpop.f32.mrb[34].mxu1  ;;  %v2621_v15 = vrot.slane %v2570_v25, 7  ;;  %v7663_v43 = vsel %vm1296_vm6, 0.0, %v2620_v26  ;;  %vm2518_vm12 = vcmp.ge.s32.totalorder %v2508_v10, 0  ;;  %4711 = vmatprep.subr.bf16.mxu1 %v5612_v17 }
 0x2e8   : > { %v4477_v37 = vmul.f32 -1.442695, %v7638_v48  ;;  %v2318_v0 = vpop.f32.mrb[35].mxu1  ;;  %v7651_v41 = vadd.f32 %v4700_v9, %v7539_v11  ;;  %v2568_v18 = vsel %vm7632_vm4, %v2487_v56, 0.0  ;;  %v7676_v19 = vsel %vm1296_vm6, 0.0, %v2617_v42  ;;  %4712 = vmatpush3.bf16.msra.mxu1 %v5612_v17 }
 0x2e9   : > { %v4475_v58 = vmul.f32 -1.442695, %v7643_v21  ;;  %v7654_v32 = vadd.f32 %v7539_v11, %v2318_v0  ;;  %v7657_v29 = vsel %vm1296_vm6, %v2620_v26, %v2621_v15  ;;  %v2682_v63 = vsel %vm1296_vm6, %v2621_v15, 0.0  ;;  %v5613_v15 = vld [vmem:[%s8319_s7 + $0x24] ss:$0 sps:$4 sm:$0x33]  }
 0x2ea   : > { %5806 = vpow2.f32 %v4477_v37  ;;  %v2618_v27 = vrot.slane %v2568_v18, 7  ;;  %v4478_v39 = vmul.f32 -1.442695, %v7651_v41  ;;  %v5323_v4 = vpack.i.bf16 %v7657_v29, %v7663_v43  ;;  %4836 = vmatprep.subr.msk.bf16.mxu1 %vm633_vm0, %v5613_v15 }
 0x2eb   : > { %5808 = vpow2.f32 %v4475_v58  ;;  %v4476_v49 = vmul.f32 -1.442695, %v7654_v32  ;;  %v2723_v38 = vrot.slane %v2682_v63, 1  ;;  %v2721_v62 = vrot.slane %v7657_v29, 1 }
 0x2ec   : > { %v7670_v28 = vsel %vm1296_vm6, %v2617_v42, %v2618_v27  ;;  %v2811_v60 = vrot.slane %v2682_v63, 2  ;;  %5810 = vpow2.f32 %v4478_v39  ;;  %5324 = vrot.lane.b32.xlu1 %v5323_v4, %s6027_s24  ;;  %5329 = vrot.lane.b32.xlu0 %v5323_v4, %s6023_s28  ;;  %v2720_v33 = vrot.slane %v7663_v43, 1 }
 0x2ed   : > { %5812 = vpow2.f32 %v4476_v49  ;;  %v5333_v50 = vpack.i.bf16 %v7670_v28, %v7676_v19  ;;  %v2808_v55 = vrot.slane %v7663_v43, 2  ;;  %v2809_v57 = vrot.slane %v7657_v29, 2 }
 0x2ee   : > { %v2722_v6 = vsel %vm1411_vm14, %v2720_v33, %v2721_v62  ;;  %v2724_v12 = vsel %vm1411_vm14, %v2721_v62, %v2723_v38  ;;  %v2681_v23 = vsel %vm1296_vm6, %v2618_v27, 0.0  ;;  %v2716_v54 = vrot.slane %v7670_v28, 1 }
 0x2ef   : > { %v2810_v51 = vsel %vm1522_vm11, %v2808_v55, %v2809_v57  ;;  %v2812_v5 = vsel %vm1522_vm11, %v2809_v57, %v2811_v60  ;;  %v5343_v31 = vpack.i.bf16 %v2724_v12, %v2722_v6  ;;  %v2718_v3 = vrot.slane %v2681_v23, 1 }
 0x2f0   : > { %5334 = vrot.lane.b32.xlu1 %v5333_v50, %s6023_s28  ;;  %5339 = vrot.lane.b32.xlu0 %v5333_v50, %s6027_s24  ;;  %v5348_v40 = vpack.i.bf16 %v2812_v5, %v2810_v51  ;;  %v2715_v20 = vrot.slane %v7676_v19, 1  ;;  %v2806_v52 = vrot.slane %v2681_v23, 2  ;;  %v2804_v36 = vrot.slane %v7670_v28, 2 }
 0x2f1   : > { %v2719_v35 = vsel %vm1411_vm14, %v2716_v54, %v2718_v3  ;;  %vm2528_vm13 = vcmp.lt.s32.totalorder %v2508_v10, 16  ;;  %v2803_v47 = vrot.slane %v7676_v19, 2  ;;  %vm2517_vm15 = vcmp.ge.s32.totalorder %v2507_v24, 0 }
 0x2f2   : > { %v2717_v13 = vsel %vm1411_vm14, %v2715_v20, %v2716_v54  ;;  %vm2527_vm2 = vcmp.lt.s32.totalorder %v2507_v24, 16  ;;  %v2807_v30 = vsel %vm1522_vm11, %v2804_v36, %v2806_v52  ;;  %vm7716_vm3 = vmand %vm2518_vm12, %vm2528_vm13 }
 0x2f3   : > { %v5373_v26 = vpack.i.bf16 %v2719_v35, %v2717_v13  ;;  %v2805_v9 = vsel %vm1522_vm11, %v2803_v47, %v2804_v36  ;;  %vm7723_vm4 = vmand %vm2517_vm15, %vm2527_vm2 }
 0x2f4   : > { %v5807_v45 = vpop.eup %5806  ;;  %5344 = vrot.lane.b32.xlu1 %v5343_v31, %s6029_s17  ;;  %5349 = vrot.lane.b32.xlu0 %v5348_v40, %s6030_s29  ;;  %v5378_v18 = vpack.i.bf16 %v2807_v30, %v2805_v9 }
 0x2f5   : > { %v5809_v34 = vpop.eup %5808  ;;  %v2432_v2 = vadd.f32 1.0, %v5807_v45 }
 0x2f6   : > { %v2430_v46 = vadd.f32 1.0, %v5809_v34  ;;  %v5811_v53 = vpop.eup %5810 }
 0x2f7   : > { %5814 = vrcp.f32 %v2432_v2  ;;  %v5813_v7 = vpop.eup %5812  ;;  %v2433_v1 = vadd.f32 1.0, %v5811_v53 }
 0x2f8   : > { %5816 = vrcp.f32 %v2430_v46  ;;  %v2431_v61 = vadd.f32 1.0, %v5813_v7  ;;  %5354 = vrot.lane.b32.xlu1 %v5343_v31, %s6025_s14  ;;  %5364 = vrot.lane.b32.xlu0 %v5343_v31, %s6026_s12 }
 0x2f9   : > { %5818 = vrcp.f32 %v2433_v1 }
 0x2fa   : > { %5820 = vrcp.f32 %v2431_v61 }
 0x2fc   : > { %5359 = vrot.lane.b32.xlu1 %v5348_v40, %s6024_s30  ;;  %5369 = vrot.lane.b32.xlu0 %v5348_v40, %s6028_s25 }
 0x300   : > { %5374 = vrot.lane.b32.xlu1 %v5373_v26, %s6026_s12  ;;  %5384 = vrot.lane.b32.xlu0 %v5373_v26, %s6029_s17 }
 0x301   : > { %v5815_v25 = vpop.eup %5814 }
 0x302   : > { %v5817_v56 = vpop.eup %5816  ;;  %v2492_v37 = vmul.f32 %v5815_v25, %v7638_v48  ;;  %v3375_v48 = vsel %vm633_vm0, %v5613_v15, 0 }
 0x303   : > { %v2490_v58 = vmul.f32 %v5817_v56, %v7643_v21  ;;  %v5819_v42 = vpop.eup %5818  ;;  %4714 = vmatpush3.bf16.msra.mxu1 %v3375_v48 }
 0x304   : > { %v5821_v39 = vpop.eup %5820  ;;  %v2573_v49 = vsel %vm7716_vm3, %v2492_v37, 0.0  ;;  %v2493_v21 = vmul.f32 %v5819_v42, %v7651_v41  ;;  %5379 = vrot.lane.b32.xlu1 %v5378_v18, %s6028_s25  ;;  %5389 = vrot.lane.b32.xlu0 %v5378_v18, %s6030_s29 }
 0x305   : > { %v4703_v27 = vpop.f32.mrb[36].mxu1  ;;  %v2571_v4 = vsel %vm7723_vm4, %v2490_v58, 0.0  ;;  %v2491_v60 = vmul.f32 %v5821_v39, %v7654_v32  ;;  %v2626_v41 = vrot.slane %v2573_v49, 7 }
 0x306   : > { %v7737_v38 = vadd.f32 %v4703_v27, %v7539_v11  ;;  %v2331_v62 = vpop.f32.mrb[37].mxu1  ;;  %v2574_v55 = vsel %vm7716_vm3, %v2493_v21, 0.0  ;;  %v2623_v6 = vrot.slane %v2571_v4, 7 }
 0x307   : > { %v7741_v33 = vadd.f32 %v7539_v11, %v2331_v62  ;;  %v4704_v50 = vpop.f32.mrb[38].mxu1  ;;  %v2627_v12 = vrot.slane %v2574_v55, 7  ;;  %v2572_v51 = vsel %vm7723_vm4, %v2491_v60, 0.0  ;;  %v7765_v46 = vsel %vm1296_vm6, 0.0, %v2626_v41 }
 0x308   : > { %v2334_v57 = vpop.f32.mrb[39].mxu1  ;;  %v2624_v5 = vrot.slane %v2572_v51, 7  ;;  %v4481_v45 = vmul.f32 -1.442695, %v7737_v38  ;;  %v7750_v31 = vadd.f32 %v4704_v50, %v7539_v11  ;;  %5394 = vrot.lane.b32.xlu1 %v5373_v26, %s6025_s14  ;;  %5399 = vrot.lane.b32.xlu0 %v5378_v18, %s6024_s30  ;;  %v2730_v10 = vrot.slane %v7765_v46, 1 }
 0x309   : > { %v4479_v32 = vmul.f32 -1.442695, %v7741_v33  ;;  %v7755_v40 = vsel %vm1296_vm6, %v2626_v41, %v2627_v12  ;;  %v7758_v34 = vadd.f32 %v7539_v11, %v2334_v57  ;;  %v2684_v2 = vsel %vm1296_vm6, %v2627_v12, 0.0 }
 0x30a   : > { %v7762_v23 = vsel %vm1296_vm6, %v2623_v6, %v2624_v5  ;;  %5822 = vpow2.f32 %v4481_v45  ;;  %v4482_v22 = vmul.f32 -1.442695, %v7750_v31  ;;  %v5403_v7 = vpack.i.bf16 %v7755_v40, %v7765_v46 }
 0x30b   : > { %5824 = vpow2.f32 %v4479_v32  ;;  %v4480_v53 = vmul.f32 -1.442695, %v7758_v34  ;;  %v2733_v3 = vrot.slane %v2684_v2, 1  ;;  %v2821_v1 = vrot.slane %v2684_v2, 2 }
 0x30c   : > { %5826 = vpow2.f32 %v4482_v22  ;;  %v2731_v54 = vrot.slane %v7755_v40, 1  ;;  %5404 = vrot.lane.b32.xlu1 %v5403_v7, %s6027_s24  ;;  %5409 = vrot.lane.b32.xlu0 %v5403_v7, %s6023_s28  ;;  %v2819_v61 = vrot.slane %v7755_v40, 2  ;;  %v2818_v20 = vrot.slane %v7765_v46, 2 }
 0x30d   : > { %5828 = vpow2.f32 %v4480_v53  ;;  %v7778_v24 = vsel %vm1296_vm6, 0.0, %v2623_v6  ;;  %v2683_v17 = vsel %vm1296_vm6, %v2624_v5, 0.0  ;;  %v2726_v63 = vrot.slane %v7762_v23, 1 }
 0x30e   : > { %v5413_v52 = vpack.i.bf16 %v7762_v23, %v7778_v24  ;;  %v2732_v13 = vsel %vm1411_vm14, %v2730_v10, %v2731_v54  ;;  %v2734_v35 = vsel %vm1411_vm14, %v2731_v54, %v2733_v3  ;;  %v2820_v36 = vsel %vm1522_vm11, %v2818_v20, %v2819_v61 }
 0x30f   : > { %v2822_v47 = vsel %vm1522_vm11, %v2819_v61, %v2821_v1  ;;  %v5423_v26 = vpack.i.bf16 %v2734_v35, %v2732_v13  ;;  %v2728_v56 = vrot.slane %v2683_v17, 1  ;;  %v2510_v57 = vadd.s32 7, %v7546_v8 }
 0x310   : > { %5414 = vrot.lane.b32.xlu1 %v5413_v52, %s6023_s28  ;;  %5419 = vrot.lane.b32.xlu0 %v5413_v52, %s6027_s24  ;;  %v5428_v25 = vpack.i.bf16 %v2822_v47, %v2820_v36  ;;  %v2509_v41 = vadd.s32 6, %v7546_v8  ;;  %v2725_v6 = vrot.slane %v7778_v24, 1  ;;  %v2816_v12 = vrot.slane %v2683_v17, 2 }
 0x311   : > { %v2729_v45 = vsel %vm1411_vm14, %v2726_v63, %v2728_v56  ;;  %v2814_v32 = vrot.slane %v7762_v23, 2  ;;  %vm2520_vm12 = vcmp.ge.s32.totalorder %v2510_v57, 0  ;;  %v2813_v2 = vrot.slane %v7778_v24, 2 }
 0x312   : > { %vm2530_vm13 = vcmp.lt.s32.totalorder %v2510_v57, 16  ;;  %vm2519_vm15 = vcmp.ge.s32.totalorder %v2509_v41, 0  ;;  %vm2529_vm2 = vcmp.lt.s32.totalorder %v2509_v41, 16  ;;  %v2512_v41 = vadd.s32 9, %v7546_v8 }
 0x313   : > { %v2815_v53 = vsel %vm1522_vm11, %v2813_v2, %v2814_v32  ;;  %v2817_v7 = vsel %vm1522_vm11, %v2814_v32, %v2816_v12  ;;  %vm7821_vm3 = vmand %vm2520_vm12, %vm2530_vm13 }
 0x314   : > { %v5823_v9 = vpop.eup %5822  ;;  %5424 = vrot.lane.b32.xlu1 %v5423_v26, %s6029_s17  ;;  %5429 = vrot.lane.b32.xlu0 %v5428_v25, %s6030_s29  ;;  %vm7828_vm4 = vmand %vm2519_vm15, %vm2529_vm2  ;;  %v5458_v13 = vpack.i.bf16 %v2817_v7, %v2815_v53  ;;  %vm2522_vm12 = vcmp.ge.s32.totalorder %v2512_v41, 0  ;;  %vm2532_vm13 = vcmp.lt.s32.totalorder %v2512_v41, 16 }
 0x315   : > { %v5825_v15 = vpop.eup %5824  ;;  %v2436_v37 = vadd.f32 1.0, %v5823_v9 }
 0x316   : > { %v5827_v18 = vpop.eup %5826  ;;  %v2434_v48 = vadd.f32 1.0, %v5825_v15 }
 0x317   : > { %v4707_v30 = vpop.f32.mrb[40].mxu1  ;;  %v5829_v39 = vpop.eup %5828  ;;  %5830 = vrcp.f32 %v2436_v37  ;;  %v2437_v49 = vadd.f32 1.0, %v5827_v18 }
 0x318   : > { %v7792_v0 = vadd.f32 %v4707_v30, %v7539_v11  ;;  %v2347_v58 = vpop.f32.mrb[41].mxu1  ;;  %5832 = vrcp.f32 %v2434_v48  ;;  %v2435_v60 = vadd.f32 1.0, %v5829_v39  ;;  %5434 = vrot.lane.b32.xlu1 %v5423_v26, %s6025_s14  ;;  %5444 = vrot.lane.b32.xlu0 %v5423_v26, %s6026_s12 }
 0x319   : > { %v7796_v42 = vadd.f32 %v7539_v11, %v2347_v58  ;;  %v4708_v27 = vpop.f32.mrb[42].mxu1  ;;  %5834 = vrcp.f32 %v2437_v49 }
 0x31a   : > { %v4485_v4 = vmul.f32 -1.442695, %v7792_v0  ;;  %v7800_v21 = vadd.f32 %v4708_v27, %v7539_v11  ;;  %v2350_v62 = vpop.f32.mrb[43].mxu1  ;;  %5836 = vrcp.f32 %v2435_v60 }
 0x31b   : > { %v4483_v50 = vmul.f32 -1.442695, %v7796_v42  ;;  %v7804_v55 = vadd.f32 %v7539_v11, %v2350_v62  ;;  %v2727_v11 = vsel %vm1411_vm14, %v2725_v6, %v2726_v63 }
 0x31c   : > { %v4486_v51 = vmul.f32 -1.442695, %v7800_v21  ;;  %5838 = vpow2.f32 %v4485_v4  ;;  %5439 = vrot.lane.b32.xlu1 %v5428_v25, %s6024_s30  ;;  %5449 = vrot.lane.b32.xlu0 %v5428_v25, %s6028_s25  ;;  %v5453_v22 = vpack.i.bf16 %v2729_v45, %v2727_v11  ;;  %v2511_v11 = vadd.s32 8, %v7546_v8 }
 0x31d   : > { %v4484_v5 = vmul.f32 -1.442695, %v7804_v55  ;;  %5840 = vpow2.f32 %v4483_v50 }
 0x31e   : > { %5842 = vpow2.f32 %v4486_v51  ;;  %vm2521_vm15 = vcmp.ge.s32.totalorder %v2511_v11, 0  ;;  %vm2531_vm2 = vcmp.lt.s32.totalorder %v2511_v11, 16 }
 0x31f   : > { %5844 = vpow2.f32 %v4484_v5 }
 0x320   : > { %5454 = vrot.lane.b32.xlu1 %v5453_v22, %s6026_s12  ;;  %5464 = vrot.lane.b32.xlu0 %v5453_v22, %s6029_s17 }
 0x321   : > { %v5831_v3 = vpop.eup %5830 }
 0x322   : > { %v5833_v54 = vpop.eup %5832  ;;  %v2496_v61 = vmul.f32 %v5831_v3, %v7737_v38 }
 0x323   : > { %v5835_v20 = vpop.eup %5834  ;;  %v2494_v52 = vmul.f32 %v5833_v54, %v7741_v33 }
 0x324   : > { %v5837_v35 = vpop.eup %5836  ;;  %v2577_v36 = vsel %vm7821_vm3, %v2496_v61, 0.0  ;;  %v2497_v47 = vmul.f32 %v5835_v20, %v7750_v31  ;;  %5459 = vrot.lane.b32.xlu1 %v5458_v13, %s6028_s25  ;;  %5469 = vrot.lane.b32.xlu0 %v5458_v13, %s6030_s29 }
 0x325   : > { %v2575_v26 = vsel %vm7828_vm4, %v2494_v52, 0.0  ;;  %v2495_v38 = vmul.f32 %v5837_v35, %v7758_v34  ;;  %v2632_v9 = vrot.slane %v2577_v36, 7 }
 0x326   : > { %v5839_v17 = vpop.eup %5838  ;;  %v2578_v33 = vsel %vm7821_vm3, %v2497_v47, 0.0  ;;  %v2629_v37 = vrot.slane %v2575_v26, 7  ;;  %vm7880_vm3 = vmand %vm2522_vm12, %vm2532_vm13 }
 0x327   : > { %v5841_v25 = vpop.eup %5840  ;;  %v2633_v30 = vrot.slane %v2578_v33, 7  ;;  %v2576_v15 = vsel %vm7828_vm4, %v2495_v38, 0.0  ;;  %v2440_v31 = vadd.f32 1.0, %v5839_v17  ;;  %v7855_v39 = vsel %vm1296_vm6, 0.0, %v2632_v9  ;;  %vm7886_vm4 = vmand %vm2521_vm15, %vm2531_vm2 }
 0x328   : > { %v5843_v56 = vpop.eup %5842  ;;  %v2630_v58 = vrot.slane %v2576_v15, 7  ;;  %v2438_v63 = vadd.f32 1.0, %v5841_v25  ;;  %5474 = vrot.lane.b32.xlu1 %v5453_v22, %s6025_s14  ;;  %5479 = vrot.lane.b32.xlu0 %v5458_v13, %s6024_s30  ;;  %v2740_v12 = vrot.slane %v7855_v39, 1  ;;  %v2828_v51 = vrot.slane %v7855_v39, 2 }
 0x329   : > { %v5845_v18 = vpop.eup %5844  ;;  %v7846_v34 = vsel %vm1296_vm6, %v2632_v9, %v2633_v30  ;;  %v2686_v48 = vsel %vm1296_vm6, %v2633_v30, 0.0  ;;  %5846 = vrcp.f32 %v2440_v31  ;;  %v2441_v49 = vadd.f32 1.0, %v5843_v56 }
 0x32a   : > { %v7852_v27 = vsel %vm1296_vm6, %v2629_v37, %v2630_v58  ;;  %5848 = vrcp.f32 %v2438_v63  ;;  %v2439_v4 = vadd.f32 1.0, %v5845_v18  ;;  %v5483_v62 = vpack.i.bf16 %v7846_v34, %v7855_v39 }
 0x32b   : > { %v2743_v60 = vrot.slane %v2686_v48, 1  ;;  %v2831_v50 = vrot.slane %v2686_v48, 2  ;;  %5850 = vrcp.f32 %v2441_v49  ;;  %v2741_v57 = vrot.slane %v7846_v34, 1 }
 0x32c   : > { %5852 = vrcp.f32 %v2439_v4  ;;  %5484 = vrot.lane.b32.xlu1 %v5483_v62, %s6027_s24  ;;  %5489 = vrot.lane.b32.xlu0 %v5483_v62, %s6023_s28  ;;  %v2829_v6 = vrot.slane %v7846_v34, 2  ;;  %v7867_v5 = vsel %vm1296_vm6, 0.0, %v2629_v37  ;;  %v2685_v7 = vsel %vm1296_vm6, %v2630_v58, 0.0 }
 0x32d   : > { %v5493_v45 = vpack.i.bf16 %v7852_v27, %v7867_v5  ;;  %v2742_v32 = vsel %vm1411_vm14, %v2740_v12, %v2741_v57  ;;  %v2744_v2 = vsel %vm1411_vm14, %v2741_v57, %v2743_v60  ;;  %v2736_v1 = vrot.slane %v7852_v27, 1 }
 0x32e   : > { %v2830_v22 = vsel %vm1522_vm11, %v2828_v51, %v2829_v6  ;;  %v2832_v53 = vsel %vm1522_vm11, %v2829_v6, %v2831_v50  ;;  %v5503_v8 = vpack.i.bf16 %v2744_v2, %v2742_v32  ;;  %v2738_v61 = vrot.slane %v2685_v7, 1 }
 0x32f   : > { %v5508_v3 = vpack.i.bf16 %v2832_v53, %v2830_v22  ;;  %v2735_v52 = vrot.slane %v7867_v5, 1  ;;  %v2826_v47 = vrot.slane %v2685_v7, 2  ;;  %v2824_v26 = vrot.slane %v7852_v27, 2 }
 0x330   : > { %5494 = vrot.lane.b32.xlu1 %v5493_v45, %s6023_s28  ;;  %5499 = vrot.lane.b32.xlu0 %v5493_v45, %s6027_s24  ;;  %v2739_v31 = vsel %vm1411_vm14, %v2736_v1, %v2738_v61 }
 0x331   : > { %v2737_v33 = vsel %vm1411_vm14, %v2735_v52, %v2736_v1  ;;  %v2827_v60 = vsel %vm1522_vm11, %v2824_v26, %v2826_v47 }
 0x332   : > { %v5533_v48 = vpack.i.bf16 %v2739_v31, %v2737_v33 }
 0x333   : > { %v5847_v54 = vpop.eup %5846 }
 0x334   : > { %v5849_v20 = vpop.eup %5848  ;;  %v2500_v13 = vmul.f32 %v5847_v54, %v7792_v0  ;;  %5504 = vrot.lane.b32.xlu1 %v5503_v8, %s6029_s17  ;;  %5509 = vrot.lane.b32.xlu0 %v5508_v3, %s6030_s29 }
 0x335   : > { %v5851_v36 = vpop.eup %5850  ;;  %v2498_v17 = vmul.f32 %v5849_v20, %v7796_v42  ;;  %v2823_v42 = vrot.slane %v7867_v5, 2 }
 0x336   : > { %v5853_v38 = vpop.eup %5852  ;;  %v2581_v25 = vsel %vm7880_vm3, %v2500_v13, 0.0  ;;  %v2501_v0 = vmul.f32 %v5851_v36, %v7800_v21 }
 0x337   : > { %v2638_v9 = vrot.slane %v2581_v25, 7  ;;  %v2579_v30 = vsel %vm7886_vm4, %v2498_v17, 0.0  ;;  %v2499_v15 = vmul.f32 %v5853_v38, %v7804_v55  ;;  %v2825_v49 = vsel %vm1522_vm11, %v2823_v42, %v2824_v26 }
 0x338   : > { %v2635_v56 = vrot.slane %v2579_v30, 7  ;;  %v2582_v37 = vsel %vm7880_vm3, %v2501_v0, 0.0  ;;  %5514 = vrot.lane.b32.xlu1 %v5503_v8, %s6025_s14  ;;  %5524 = vrot.lane.b32.xlu0 %v5503_v8, %s6026_s12  ;;  %v5538_v35 = vpack.i.bf16 %v2827_v60, %v2825_v49 }
 0x339   : > { %v2678_v21 = vsel %vm1296_vm6, 0.0, %v2638_v9  ;;  %v2639_v58 = vrot.slane %v2582_v37, 7  ;;  %v2580_v63 = vsel %vm7886_vm4, %v2499_v15, 0.0  ;;  %vm8381_vm4 = vcmask 293888  }
 0x33a   : > { %v2677_v55 = vsel %vm1296_vm6, 0.0, %v2635_v56  ;;  %v2636_v18 = vrot.slane %v2580_v63, 7  ;;  %v3087_v50 = vrot.slane %v2678_v21, 1  ;;  %v3140_v20 = vrot.slane %v2678_v21, 2 }
 0x33b   : > { %v2640_v4 = vsel %vm1296_vm6, %v2638_v9, %v2639_v58  ;;  %v2688_v62 = vsel %vm1296_vm6, %v2639_v58, 0.0  ;;  %v2931_v57 = vrot.slane %v2677_v55, 1  ;;  %v2984_v61 = vrot.slane %v2677_v55, 2 }
 0x33c   : > { %v3088_v41 = vrot.slane %v2640_v4, 1  ;;  %v3090_v6 = vrot.slane %v2688_v62, 1  ;;  %5519 = vrot.lane.b32.xlu1 %v5508_v3, %s6024_s30  ;;  %5529 = vrot.lane.b32.xlu0 %v5508_v3, %s6028_s25  ;;  %v3141_v12 = vrot.slane %v2640_v4, 2  ;;  %v3143_v51 = vrot.slane %v2688_v62, 2 }
 0x33d   : > { %v2637_v11 = vsel %vm1296_vm6, %v2635_v56, %v2636_v18  ;;  %v2687_v45 = vsel %vm1296_vm6, %v2636_v18, 0.0  ;;  %v5563_v22 = vpack.i.bf16 %v2640_v4, %v2678_v21  ;;  %vm8373_vm6 = vcmask 228352  }
 0x33e   : > { %v2934_v32 = vrot.slane %v2687_v45, 1  ;;  %v2987_v2 = vrot.slane %v2687_v45, 2  ;;  %v5573_v53 = vpack.i.bf16 %v2637_v11, %v2677_v55  ;;  %v2932_v8 = vrot.slane %v2637_v11, 1  ;;  %vm8377_vm13 = vmmov %vm8373_vm6 }
 0x33f   : > { %v5290_v7 = vpop.permute.xlu0 %5289  ;;  %v3089_v1 = vsel %vm1411_vm14, %v3087_v50, %v3088_v41  ;;  %v3091_v54 = vsel %vm1411_vm14, %v3088_v41, %v3090_v6  ;;  %v2985_v10 = vrot.slane %v2637_v11, 2  ;;  %v3142_v26 = vsel %vm1522_vm11, %v3140_v20, %v3141_v12  ;;  %vm8378_vm15 = vmmov %vm8373_vm6 }
 0x340   : > { %5534 = vrot.lane.b32.xlu1 %v5533_v48, %s6026_s12  ;;  %5544 = vrot.lane.b32.xlu0 %v5533_v48, %s6029_s17  ;;  %v5578_v3 = vpack.i.bf16 %v3091_v54, %v3089_v1  ;;  %v2933_v52 = vsel %vm1411_vm14, %v2931_v57, %v2932_v8  ;;  %v2935_v13 = vsel %vm1411_vm14, %v2932_v8, %v2934_v32  ;;  %vm8375_vm14 = vcmask 261120  }
 0x341   : > { %v5593_v36 = vpack.i.bf16 %v2935_v13, %v2933_v52  ;;  %v2986_v47 = vsel %vm1522_vm11, %v2984_v61, %v2985_v10  ;;  %v2988_v17 = vsel %vm1522_vm11, %v2985_v10, %v2987_v2  ;;  %v3144_v38 = vsel %vm1522_vm11, %v3141_v12, %v3143_v51  ;;  %vm8374_vm11 = vmmov %vm8373_vm6 }
 0x342   : > { %v5598_v25 = vpack.i.bf16 %v2988_v17, %v2986_v47  ;;  %v5603_v33 = vpack.i.bf16 %v3144_v38, %v3142_v26  ;;  %v5295_v30 = vpop.permute.xlu1 %5294  ;;  %v5292_v12 = vunpack.i.h.bf16 %v5290_v7  ;;  %v5291_v51 = vunpack.i.l.bf16 %v5290_v7  ;;  %vm8376_vm12 = vmmov %vm8375_vm14 }
 0x343   : > { %v5305_v0 = vpop.permute.xlu0 %5304  ;;  %v5296_v11 = vunpack.i.l.bf16 %v5295_v30  ;;  %v5297_v2 = vunpack.i.h.bf16 %v5295_v30  ;;  %vm8379_vm2 = vmmov %vm8376_vm12 }
 0x344   : > { %5539 = vrot.lane.b32.xlu1 %v5538_v35, %s6028_s25  ;;  %5549 = vrot.lane.b32.xlu0 %v5538_v35, %s6030_s29  ;;  %vm8380_vm3 = vmmov %vm8379_vm2 }
 0x345   : > { %v3195_v54 = vsel %vm608_vm1, %v7580_v16, %v5296_v11 }
 0x346   : > { %v5300_v31 = vpop.permute.xlu1 %5299 }
 0x347   : > { %v5310_v9 = vpop.permute.xlu0 %5309  ;;  %v5302_v1 = vunpack.i.h.bf16 %v5300_v31 }
 0x348   : > { %5554 = vrot.lane.b32.xlu1 %v5533_v48, %s6025_s14  ;;  %5559 = vrot.lane.b32.xlu0 %v5538_v35, %s6024_s30  ;;  %v5312_v61 = vunpack.i.h.bf16 %v5310_v9  ;;  %v5311_v10 = vunpack.i.l.bf16 %v5310_v9  ;;  %v3196_v35 = vsel %vm608_vm1, %v7590_v59, %v5297_v2 }
 0x349   : > { %v3212_v38 = vsel %vm2037_vm5, %v3196_v35, %v5302_v1 }
 0x34b   : > { %v5315_v15 = vpop.permute.xlu0 %5314 }
 0x34c   : > { %5564 = vrot.lane.b32.xlu1 %v5563_v22, %s6027_s24  ;;  %5574 = vrot.lane.b32.xlu0 %v5573_v53, %s6027_s24  ;;  %v5317_v63 = vunpack.i.h.bf16 %v5315_v15  ;;  %v5316_v55 = vunpack.i.l.bf16 %v5315_v15  ;;  %v5306_v22 = vunpack.i.l.bf16 %v5305_v0 }
 0x34e   : > { %v3194_v62 = vsel %vm608_vm1, %v7583_v44, %v5317_v63  ;;  %v3193_v60 = vsel %vm608_vm1, %v7604_v14, %v5316_v55  ;;  %v5307_v44 = vunpack.i.h.bf16 %v5305_v0 }
 0x34f   : > { %v5320_v42 = vpop.permute.xlu0 %5319 }
 0x350   : > { %5569 = vrot.lane.b32.xlu1 %v5573_v53, %s6023_s28  ;;  %5594 = vrot.lane.b32.xlu0 %v5593_v36, %s6029_s17  ;;  %v5322_v18 = vunpack.i.h.bf16 %v5320_v42  ;;  %v5321_v48 = vunpack.i.l.bf16 %v5320_v42  ;;  %v5301_v53 = vunpack.i.l.bf16 %v5300_v31 }
 0x352   : > { %v3209_v50 = vsel %vm2037_vm5, %v3193_v60, %v5321_v48  ;;  %v3210_v57 = vsel %vm2037_vm5, %v3194_v62, %v5322_v18 }
 0x353   : > { %v3225_v45 = vsel %vm2058_vm7, %v3209_v50, %v5291_v51  ;;  %v3226_v32 = vsel %vm2058_vm7, %v3210_v57, %v5292_v12 }
 0x354   : > { %5579 = vrot.lane.b32.xlu1 %v5578_v3, %s6029_s17  ;;  %5599 = vrot.lane.b32.xlu0 %v5598_v25, %s6030_s29  ;;  %v3241_v7 = vsel %vm2079_vm8, %v3225_v45, %v5306_v22  ;;  %v3242_v3 = vsel %vm2079_vm8, %v3226_v32, %v5307_v44 }
 0x355   : > { %v3258_v0 = vsel %vm2100_vm9, %v3242_v3, %v5312_v61 }
 0x358   : > { %5584 = vrot.lane.b32.xlu1 %v5593_v36, %s6026_s12  ;;  %v3211_v36 = vsel %vm2037_vm5, %v3195_v54, %v5301_v53 }
 0x35c   : > { %5589 = vrot.lane.b32.xlu1 %v5598_v25, %s6028_s25  ;;  %v3257_v25 = vsel %vm2100_vm9, %v3241_v7, %v5311_v10  ;;  %s8409_s25 = sshll.u32 %s6144_s15, 3 }
 0x35d   : > { %s8251_s13 = scalar_lea.vmem %s8323_s11, %s8409_s25 }
 0x35e   : > { %v7940_v56 = vpop.permute.xlu1 %5324  ;;  %v7942_v37 = vpop.permute.xlu0 %5329 }
 0x35f   : > { %v5327_v16 = vunpack.i.h.bf16 %v7940_v56  ;;  %v5326_v31 = vunpack.i.l.bf16 %v7940_v56 }
 0x360   : > { %5604 = vrot.lane.b32.xlu1 %v5603_v33, %s6030_s29 }
 0x362   : > { %v5335_v21 = vpop.permute.xlu1 %5334  ;;  %v5340_v58 = vpop.permute.xlu0 %5339 }
 0x363   : > { %v5337_v20 = vunpack.i.h.bf16 %v5335_v21  ;;  %v5336_v52 = vunpack.i.l.bf16 %v5335_v21  ;;  %v5341_v13 = vunpack.i.l.bf16 %v5340_v58  ;;  %v5342_v47 = vunpack.i.h.bf16 %v5340_v58 }
 0x365   : > { %v3228_v59 = vsel %vm2058_vm7, %v3212_v38, %v5337_v20  ;;  %v3227_v42 = vsel %vm2058_vm7, %v3211_v36, %v5336_v52  ;;  %v3273_v21 = vsel %vm2121_vm10, %v3257_v25, %v5341_v13  ;;  %v3274_v58 = vsel %vm2121_vm10, %v3258_v0, %v5342_v47 }
 0x366   : > { %v7946_v49 = vpop.permute.xlu1 %5344  ;;  %v7948_v4 = vpop.permute.xlu0 %5349 }
 0x367   : > { %v5347_v63 = vunpack.i.h.bf16 %v7946_v49  ;;  %v5346_v55 = vunpack.i.l.bf16 %v7946_v49  ;;  %v5352_v18 = vunpack.i.h.bf16 %v7948_v4  ;;  %v5351_v22 = vunpack.i.l.bf16 %v7948_v4 }
 0x36a   : > { %v7956_v41 = vpop.permute.xlu1 %5354  ;;  %v7958_v6 = vpop.permute.xlu0 %5364 }
 0x36e   : > { %v7962_v14 = vpop.permute.xlu1 %5359  ;;  %v7964_v8 = vpop.permute.xlu0 %5369 }
 0x372   : > { %v5375_v17 = vpop.permute.xlu1 %5374  ;;  %v5385_v26 = vpop.permute.xlu0 %5384 }
 0x373   : > { %v5377_v33 = vunpack.i.h.bf16 %v5375_v17  ;;  %v5376_v9 = vunpack.i.l.bf16 %v5375_v17  ;;  %v5387_v30 = vunpack.i.h.bf16 %v5385_v26  ;;  %v5386_v15 = vunpack.i.l.bf16 %v5385_v26 }
 0x375   : > { %v3244_v12 = vsel %vm2079_vm8, %v3228_v59, %v5377_v33  ;;  %v3243_v51 = vsel %vm2079_vm8, %v3227_v42, %v5376_v9  ;;  %v3289_v11 = vsel %vm8373_vm6, %v3273_v21, %v5386_v15  ;;  %v3290_v45 = vsel %vm8374_vm11, %v3274_v58, %v5387_v30  ;;  %vm8382_vm6 = vmmov %vm8381_vm4 }
 0x376   : > { %v5380_v48 = vpop.permute.xlu1 %5379  ;;  %v5390_v62 = vpop.permute.xlu0 %5389  ;;  %v5331_v59 = vunpack.i.l.bf16 %v7942_v37  ;;  %v5357_v42 = vunpack.i.h.bf16 %v7956_v41  ;;  %v5332_v58 = vunpack.i.h.bf16 %v7942_v37  ;;  %v5367_v37 = vunpack.i.h.bf16 %v7958_v6 }
 0x377   : > { %v5382_v60 = vunpack.i.h.bf16 %v5380_v48  ;;  %v5381_v50 = vunpack.i.l.bf16 %v5380_v48  ;;  %v5392_v57 = vunpack.i.h.bf16 %v5390_v62  ;;  %v5391_v56 = vunpack.i.l.bf16 %v5390_v62 }
 0x378   : > { %v5362_v48 = vunpack.i.h.bf16 %v7962_v14  ;;  %v5361_v62 = vunpack.i.l.bf16 %v7962_v14 }
 0x379   : > { %v3259_v32 = vsel %vm2100_vm9, %v3243_v51, %v5381_v50  ;;  %v3260_v49 = vsel %vm2100_vm9, %v3244_v12, %v5382_v60  ;;  %v3305_v2 = vsel %vm8375_vm14, %v3289_v11, %v5391_v56  ;;  %v3306_v44 = vsel %vm8376_vm12, %v3290_v45, %v5392_v57  ;;  %vm8383_vm14 = vmmov %vm8374_vm11 }
 0x37a   : > { %v3275_v53 = vsel %vm2121_vm10, %v3259_v32, %v5326_v31  ;;  %v3276_v1 = vsel %vm2121_vm10, %v3260_v49, %v5327_v16  ;;  %v3321_v54 = vpack.c.bf16 %v3306_v44, %v3305_v2  ;;  %v5395_v61 = vpop.permute.xlu1 %5394  ;;  %v5400_v7 = vpop.permute.xlu0 %5399  ;;  %v3200_v50 = vsel %vm608_vm1, %v7657_v29, %v5357_v42  ;;  %vm8384_vm12 = vmmov %vm8379_vm2 }
 0x37b   : > { %v3291_v3 = vsel %vm8377_vm13, %v3275_v53, %v5346_v55  ;;  %v3292_v10 = vsel %vm8378_vm15, %v3276_v1, %v5347_v63  ;;  %v5396_v17 = vunpack.i.l.bf16 %v5395_v61  ;;  %v5397_v26 = vunpack.i.h.bf16 %v5395_v61  ;;  %vm8385_vm13 = vmmov %vm8379_vm2 }
 0x37c   : > { %v3307_v20 = vsel %vm8379_vm2, %v3291_v3, %v5351_v22  ;;  %v3308_v52 = vsel %vm8380_vm3, %v3292_v10, %v5352_v18  ;;  %4715 = vmatprep.mubr.msk.bf16.mxu1 %vm8381_vm4, %v3321_v54  ;;  %v5401_v25 = vunpack.i.l.bf16 %v5400_v7  ;;  %v5402_v33 = vunpack.i.h.bf16 %v5400_v7  ;;  %vm8386_vm15 = vmmov %vm8381_vm4 }
 0x37d   : > { %v3322_v13 = vpack.c.bf16 %v3308_v52, %v3307_v20  ;;  %v3197_v0 = vsel %vm608_vm1, %v7676_v19, %v5396_v17  ;;  %v3198_v9 = vsel %vm608_vm1, %v7670_v28, %v5397_v26  ;;  %v5356_v19 = vunpack.i.l.bf16 %v7956_v41  ;;  %vm8387_vm2 = vmmov %vm8374_vm11 }
 0x37e   : > { %v8002_v4 = vpop.permute.xlu1 %5404  ;;  %v8004_v35 = vpop.permute.xlu0 %5409  ;;  %v3213_v31 = vsel %vm2037_vm5, %v3197_v0, %v5401_v25  ;;  %v3214_v21 = vsel %vm2037_vm5, %v3198_v9, %v5402_v33  ;;  %v5366_v18 = vunpack.i.l.bf16 %v7958_v6  ;;  %v5372_v57 = vunpack.i.h.bf16 %v7964_v8  ;;  %vm8388_vm3 = vmmov %vm8387_vm2 }
 0x37f   : > { %4716 = vmatmul.mubr.msk.bf16.vlgmr.msra.gmra.mrb[44].mxu1 %vm8382_vm6, %v3322_v13  ;;  %v3229_v63 = vsel %vm2058_vm7, %v3213_v31, %v5331_v59  ;;  %v3230_v60 = vsel %vm2058_vm7, %v3214_v21, %v5332_v58  ;;  %v3199_v41 = vsel %vm608_vm1, %v7663_v43, %v5356_v19  ;;  %v3216_v29 = vsel %vm2037_vm5, %v3200_v50, %v5362_v48  ;;  %vm8389_vm4 = vmmov %vm8384_vm12 }
 0x380   : > { %v3245_v12 = vsel %vm2079_vm8, %v3229_v63, %v5366_v18  ;;  %v3246_v14 = vsel %vm2079_vm8, %v3230_v60, %v5367_v37  ;;  %v3215_v2 = vsel %vm2037_vm5, %v3199_v41, %v5361_v62  ;;  %v5371_v6 = vunpack.i.l.bf16 %v7964_v8  ;;  %vm8390_vm6 = vmmov %vm8389_vm4 }
 0x381   : > { %v5407_v43 = vunpack.i.h.bf16 %v8002_v4  ;;  %v5406_v54 = vunpack.i.l.bf16 %v8002_v4  ;;  %v3262_v3 = vsel %vm2100_vm9, %v3246_v14, %v5372_v57 }
 0x382   : > { %v5415_v36 = vpop.permute.xlu1 %5414  ;;  %v5420_v47 = vpop.permute.xlu0 %5419  ;;  %v3261_v7 = vsel %vm2100_vm9, %v3245_v12, %v5371_v6 }
 0x383   : > { %v5417_v56 = vunpack.i.h.bf16 %v5415_v36  ;;  %v5416_v51 = vunpack.i.l.bf16 %v5415_v36  ;;  %v5422_v11 = vunpack.i.h.bf16 %v5420_v47  ;;  %v5421_v45 = vunpack.i.l.bf16 %v5420_v47 }
 0x385   : > { %v3232_v61 = vsel %vm2058_vm7, %v3216_v29, %v5417_v56  ;;  %v3231_v10 = vsel %vm2058_vm7, %v3215_v2, %v5416_v51  ;;  %v3277_v20 = vsel %vm2121_vm10, %v3261_v7, %v5421_v45  ;;  %v3278_v8 = vsel %vm2121_vm10, %v3262_v3, %v5422_v11 }
 0x386   : > { %v8006_v38 = vpop.permute.xlu1 %5424  ;;  %v8008_v16 = vpop.permute.xlu0 %5429 }
 0x387   : > { %v5427_v52 = vunpack.i.h.bf16 %v8006_v38  ;;  %v5426_v58 = vunpack.i.l.bf16 %v8006_v38  ;;  %v5432_v60 = vunpack.i.h.bf16 %v8008_v16  ;;  %v5431_v50 = vunpack.i.l.bf16 %v8008_v16 }
 0x38a   : > { %v8014_v30 = vpop.permute.xlu1 %5434  ;;  %v8016_v15 = vpop.permute.xlu0 %5444 }
 0x38e   : > { %v8025_v55 = vpop.permute.xlu1 %5439  ;;  %v8027_v28 = vpop.permute.xlu0 %5449 }
 0x392   : > { %v5455_v32 = vpop.permute.xlu1 %5454  ;;  %v5465_v49 = vpop.permute.xlu0 %5464 }
 0x393   : > { %v5457_v44 = vunpack.i.h.bf16 %v5455_v32  ;;  %v5456_v22 = vunpack.i.l.bf16 %v5455_v32  ;;  %v5467_v53 = vunpack.i.h.bf16 %v5465_v49  ;;  %v5466_v1 = vunpack.i.l.bf16 %v5465_v49 }
 0x395   : > { %v3247_v25 = vsel %vm2079_vm8, %v3231_v10, %v5456_v22  ;;  %v3248_v0 = vsel %vm2079_vm8, %v3232_v61, %v5457_v44  ;;  %v3293_v33 = vsel %vm8374_vm11, %v3277_v20, %v5466_v1  ;;  %v3294_v9 = vsel %vm8383_vm14, %v3278_v8, %v5467_v53  ;;  %vm8391_vm11 = vmmov %vm8386_vm15 }
 0x396   : > { %v5460_v13 = vpop.permute.xlu1 %5459  ;;  %v5470_v36 = vpop.permute.xlu0 %5469  ;;  %v5411_v1 = vunpack.i.l.bf16 %v8004_v35  ;;  %v5436_v61 = vunpack.i.l.bf16 %v8014_v30  ;;  %v5441_v10 = vunpack.i.l.bf16 %v8025_v55  ;;  %vm8392_vm14 = vmmov %vm8387_vm2 }
 0x397   : > { %v5462_v47 = vunpack.i.h.bf16 %v5460_v13  ;;  %v5461_v17 = vunpack.i.l.bf16 %v5460_v13  ;;  %v5472_v26 = vunpack.i.h.bf16 %v5470_v36  ;;  %v5471_v4 = vunpack.i.l.bf16 %v5470_v36 }
 0x398   : > { %v5447_v36 = vunpack.i.h.bf16 %v8016_v15 }
 0x399   : > { %v3263_v31 = vsel %vm2100_vm9, %v3247_v25, %v5461_v17  ;;  %v3264_v59 = vsel %vm2100_vm9, %v3248_v0, %v5462_v47  ;;  %v3309_v42 = vsel %vm8384_vm12, %v3293_v33, %v5471_v4  ;;  %v3310_v21 = vsel %vm8385_vm13, %v3294_v9, %v5472_v26  ;;  %vm8393_vm12 = vmmov %vm8387_vm2 }
 0x39a   : > { %v3279_v19 = vsel %vm2121_vm10, %v3263_v31, %v5406_v54  ;;  %v3280_v63 = vsel %vm2121_vm10, %v3264_v59, %v5407_v43  ;;  %v3323_v18 = vpack.c.bf16 %v3310_v21, %v3309_v42  ;;  %v5475_v48 = vpop.permute.xlu1 %5474  ;;  %v5480_v62 = vpop.permute.xlu0 %5479  ;;  %v5437_v54 = vunpack.i.h.bf16 %v8014_v30  ;;  %vm8394_vm13 = vmmov %vm8389_vm4 }
 0x39b   : > { %v3295_v37 = vsel %vm8387_vm2, %v3279_v19, %v5426_v58  ;;  %v3296_v41 = vsel %vm8388_vm3, %v3280_v63, %v5427_v52  ;;  %v5476_v16 = vunpack.i.l.bf16 %v5475_v48  ;;  %v5477_v14 = vunpack.i.h.bf16 %v5475_v48  ;;  %vm8396_vm2 = vmmov %vm8391_vm11 }
 0x39c   : > { %4719 = vmatprep.mubr.msk.bf16.mxu1 %vm8386_vm15, %v3323_v18  ;;  %v3311_v57 = vsel %vm8389_vm4, %v3295_v37, %v5431_v50  ;;  %v3312_v38 = vsel %vm8390_vm6, %v3296_v41, %v5432_v60  ;;  %v5481_v32 = vunpack.i.l.bf16 %v5480_v62  ;;  %v5482_v6 = vunpack.i.h.bf16 %v5480_v62  ;;  %vm8395_vm15 = vmmov %vm8389_vm4 }
 0x39d   : > { %v3324_v56 = vpack.c.bf16 %v3312_v38, %v3311_v57  ;;  %v3201_v29 = vsel %vm608_vm1, %v7778_v24, %v5476_v16  ;;  %v3202_v43 = vsel %vm608_vm1, %v7762_v23, %v5477_v14  ;;  %v5412_v24 = vunpack.i.h.bf16 %v8004_v35  ;;  %vm8397_vm4 = vmmov %vm8388_vm3 }
 0x39e   : > { %v8071_v12 = vpop.permute.xlu1 %5484  ;;  %v8073_v51 = vpop.permute.xlu0 %5489  ;;  %v3217_v44 = vsel %vm2037_vm5, %v3201_v29, %v5481_v32  ;;  %v3218_v7 = vsel %vm2037_vm5, %v3202_v43, %v5482_v6  ;;  %v5446_v23 = vunpack.i.l.bf16 %v8016_v15  ;;  %v5442_v52 = vunpack.i.h.bf16 %v8025_v55 }
 0x39f   : > { %4720 = vmatmul.mubr.msk.bf16.gmra.mrb[48].mxu1 %vm8391_vm11, %v3324_v56  ;;  %v3233_v3 = vsel %vm2058_vm7, %v3217_v44, %v5411_v1  ;;  %v3234_v13 = vsel %vm2058_vm7, %v3218_v7, %v5412_v24  ;;  %v3204_v30 = vsel %vm608_vm1, %v7755_v40, %v5437_v54  ;;  %v3203_v35 = vsel %vm608_vm1, %v7765_v46, %v5436_v61  ;;  %vm8398_vm11 = vmmov %vm8390_vm6 }
 0x3a0   : > { %v3249_v47 = vsel %vm2079_vm8, %v3233_v3, %v5446_v23  ;;  %v5451_v17 = vunpack.i.l.bf16 %v8027_v28  ;;  %v3219_v0 = vsel %vm2037_vm5, %v3203_v35, %v5441_v10  ;;  %v5452_v55 = vunpack.i.h.bf16 %v8027_v28 }
 0x3a1   : > { %v3250_v9 = vsel %vm2079_vm8, %v3234_v13, %v5447_v36  ;;  %v3220_v46 = vsel %vm2037_vm5, %v3204_v30, %v5442_v52  ;;  %v5487_v15 = vunpack.i.h.bf16 %v8071_v12  ;;  %v5486_v59 = vunpack.i.l.bf16 %v8071_v12 }
 0x3a2   : > { %v5495_v11 = vpop.permute.xlu1 %5494  ;;  %v5500_v45 = vpop.permute.xlu0 %5499  ;;  %v3265_v42 = vsel %vm2100_vm9, %v3249_v47, %v5451_v17  ;;  %v3266_v48 = vsel %vm2100_vm9, %v3250_v9, %v5452_v55  ;;  %v5492_v30 = vunpack.i.h.bf16 %v8073_v51  ;;  %v5491_v35 = vunpack.i.l.bf16 %v8073_v51 }
 0x3a3   : > { %v5497_v26 = vunpack.i.h.bf16 %v5495_v11  ;;  %v5496_v4 = vunpack.i.l.bf16 %v5495_v11  ;;  %v5501_v25 = vunpack.i.l.bf16 %v5500_v45  ;;  %v5502_v33 = vunpack.i.h.bf16 %v5500_v45 }
 0x3a5   : > { %v3235_v18 = vsel %vm2058_vm7, %v3219_v0, %v5496_v4  ;;  %v3236_v28 = vsel %vm2058_vm7, %v3220_v46, %v5497_v26  ;;  %v3281_v62 = vsel %vm2121_vm10, %v3265_v42, %v5501_v25  ;;  %v3282_v60 = vsel %vm2121_vm10, %v3266_v48, %v5502_v33 }
 0x3a6   : > { %v8076_v49 = vpop.permute.xlu1 %5504  ;;  %v8078_v2 = vpop.permute.xlu0 %5509 }
 0x3a7   : > { %v5507_v50 = vunpack.i.h.bf16 %v8076_v49  ;;  %v5506_v37 = vunpack.i.l.bf16 %v8076_v49  ;;  %v5512_v41 = vunpack.i.h.bf16 %v8078_v2  ;;  %v5511_v1 = vunpack.i.l.bf16 %v8078_v2 }
 0x3aa   : > { %v8085_v22 = vpop.permute.xlu1 %5514  ;;  %v8087_v53 = vpop.permute.xlu0 %5524 }
 0x3ab   : > { %v5527_v9 = vunpack.i.h.bf16 %v8087_v53 }
 0x3ae   : > { %v8097_v20 = vpop.permute.xlu1 %5519  ;;  %v8099_v8 = vpop.permute.xlu0 %5529 }
 0x3b2   : > { %v5535_v40 = vpop.permute.xlu1 %5534  ;;  %v5545_v31 = vpop.permute.xlu0 %5544 }
 0x3b3   : > { %v5537_v21 = vunpack.i.h.bf16 %v5535_v40  ;;  %v5536_v58 = vunpack.i.l.bf16 %v5535_v40  ;;  %v5547_v19 = vunpack.i.h.bf16 %v5545_v31  ;;  %v5546_v63 = vunpack.i.l.bf16 %v5545_v31 }
 0x3b4   : > { %v5526_v40 = vunpack.i.l.bf16 %v8087_v53 }
 0x3b5   : > { %v3251_v16 = vsel %vm2079_vm8, %v3235_v18, %v5536_v58  ;;  %v3252_v14 = vsel %vm2079_vm8, %v3236_v28, %v5537_v21  ;;  %v3297_v32 = vsel %vm8392_vm14, %v3281_v62, %v5546_v63  ;;  %v3298_v29 = vsel %vm8393_vm12, %v3282_v60, %v5547_v19  ;;  %vm8399_vm14 = vmmov %vm8396_vm2 }
 0x3b6   : > { %v5540_v57 = vpop.permute.xlu1 %5539  ;;  %v5550_v38 = vpop.permute.xlu0 %5549  ;;  %vm8400_vm12 = vmmov %vm8388_vm3 }
 0x3b7   : > { %v5542_v56 = vunpack.i.h.bf16 %v5540_v57  ;;  %v5541_v12 = vunpack.i.l.bf16 %v5540_v57  ;;  %v5552_v11 = vunpack.i.h.bf16 %v5550_v38  ;;  %v5551_v45 = vunpack.i.l.bf16 %v5550_v38 }
 0x3b8   : > { %v5517_v38 = vunpack.i.h.bf16 %v8085_v22 }
 0x3b9   : > { %v3267_v6 = vsel %vm2100_vm9, %v3251_v16, %v5541_v12  ;;  %v3268_v49 = vsel %vm2100_vm9, %v3252_v14, %v5542_v56  ;;  %v3313_v43 = vsel %vm8394_vm13, %v3297_v32, %v5551_v45  ;;  %v3314_v44 = vsel %vm8395_vm15, %v3298_v29, %v5552_v11  ;;  %vm8401_vm13 = vmmov %vm8388_vm3 }
 0x3ba   : > { %v3283_v54 = vsel %vm2121_vm10, %v3267_v6, %v5486_v59  ;;  %v3284_v61 = vsel %vm2121_vm10, %v3268_v49, %v5487_v15  ;;  %v3325_v7 = vpack.c.bf16 %v3314_v44, %v3313_v43  ;;  %v5555_v24 = vpop.permute.xlu1 %5554  ;;  %v5560_v3 = vpop.permute.xlu0 %5559  ;;  %v5532_v15 = vunpack.i.h.bf16 %v8099_v8  ;;  %vm8402_vm15 = vmmov %vm8390_vm6 }
 0x3bb   : > { %v5557_v23 = vunpack.i.h.bf16 %v5555_v24  ;;  %v5556_v10 = vunpack.i.l.bf16 %v5555_v24  ;;  %v5562_v52 = vunpack.i.h.bf16 %v5560_v3  ;;  %v5561_v13 = vunpack.i.l.bf16 %v5560_v3 }
 0x3bc   : > { %4723 = vmatprep.mubr.msk.bf16.mxu1 %vm8396_vm2, %v3325_v7  ;;  %v3299_v36 = vsel %vm8388_vm3, %v3283_v54, %v5506_v37  ;;  %v3300_v2 = vsel %vm8397_vm4, %v3284_v61, %v5507_v50  ;;  %v5531_v59 = vunpack.i.l.bf16 %v8099_v8  ;;  %v5516_v56 = vunpack.i.l.bf16 %v8085_v22  ;;  %vm8403_vm2 = vmmov %vm8390_vm6 }
 0x3bd   : > { %v3206_v47 = vsel %vm608_vm1, %v7852_v27, %v5557_v23  ;;  %v3205_v17 = vsel %vm608_vm1, %v7867_v5, %v5556_v10  ;;  %v3315_v26 = vsel %vm8390_vm6, %v3299_v36, %v5511_v1  ;;  %v3316_v4 = vsel %vm8398_vm11, %v3300_v2, %v5512_v41  ;;  %vm8404_vm3 = vmmov %vm8399_vm14 }
 0x3be   : > { %v3222_v25 = vsel %vm2037_vm5, %v3206_v47, %v5562_v52  ;;  %v3221_v51 = vsel %vm2037_vm5, %v3205_v17, %v5561_v13  ;;  %v5565_v0 = vpop.permute.xlu1 %5564  ;;  %v5575_v55 = vpop.permute.xlu0 %5574  ;;  %v3326_v33 = vpack.c.bf16 %v3316_v4, %v3315_v26  ;;  %v5522_v45 = vunpack.i.h.bf16 %v8097_v20  ;;  %vm8406_vm6 = vmmov %vm8403_vm2 }
 0x3bf   : > { %v3237_v27 = vsel %vm2058_vm7, %v3221_v51, %v5491_v35  ;;  %v3238_v31 = vsel %vm2058_vm7, %v3222_v25, %v5492_v30  ;;  %v5577_v58 = vunpack.i.h.bf16 %v5575_v55  ;;  %v5576_v19 = vunpack.i.l.bf16 %v5575_v55  ;;  %vm8408_vm11 = vmmov %vm8404_vm3 }
 0x3c0   : > { %4724 = vmatmul.mubr.msk.bf16.gmra.mrb[52].mxu1 %vm8399_vm14, %v3326_v33  ;;  %v3253_v5 = vsel %vm2079_vm8, %v3237_v27, %v5526_v40  ;;  %v3254_v46 = vsel %vm2079_vm8, %v3238_v31, %v5527_v9  ;;  %v5521_v16 = vunpack.i.l.bf16 %v8097_v20  ;;  %v3208_v44 = vsel %vm608_vm1, %v7846_v34, %v5517_v38  ;;  %v4539_v33 = vld [vmem:[%s8321_s9 + $0x4] sm:$0x3]  ;;  %v8198_v40 = vld [vmem:[%s8320_s8 + $0x1] ss:$0 sm:$0xff] }
 0x3c1   : > { %v3269_v53 = vsel %vm2100_vm9, %v3253_v5, %v5531_v59  ;;  %v3270_v63 = vsel %vm2100_vm9, %v3254_v46, %v5532_v15  ;;  %v3207_v22 = vsel %vm608_vm1, %v7855_v39, %v5516_v56  ;;  %v3224_v54 = vsel %vm2037_vm5, %v3208_v44, %v5522_v45  ;;  %4839 = vmatprep.subr.msk.bf16.mxu0 %vm633_vm0, %v4539_v33 }
 0x3c2   : > { %v5570_v42 = vpop.permute.xlu1 %5569  ;;  %v5595_v21 = vpop.permute.xlu0 %5594  ;;  %v3285_v60 = vsel %vm2121_vm10, %v3269_v53, %v5576_v19  ;;  %v3286_v50 = vsel %vm2121_vm10, %v3270_v63, %v5577_v58  ;;  %v3223_v1 = vsel %vm2037_vm5, %v3207_v22, %v5521_v16  ;;  %v5567_v23 = vunpack.i.h.bf16 %v5565_v0 }
 0x3c3   : > { %v5597_v18 = vunpack.i.h.bf16 %v5595_v21  ;;  %v5596_v28 = vunpack.i.l.bf16 %v5595_v21  ;;  %v5572_v29 = vunpack.i.h.bf16 %v5570_v42  ;;  %v5571_v6 = vunpack.i.l.bf16 %v5570_v42 }
 0x3c4   : > { %v5566_v10 = vunpack.i.l.bf16 %v5565_v0  ;;  %v3975_v9 = vsel %vm633_vm0, %v4539_v33, 0 }
 0x3c5   : > { %v3301_v8 = vsel %vm8400_vm12, %v3285_v60, %v5596_v28  ;;  %v3302_v57 = vsel %vm8401_vm13, %v3286_v50, %v5597_v18  ;;  %v3239_v20 = vsel %vm2058_vm7, %v3223_v1, %v5571_v6  ;;  %v3240_v7 = vsel %vm2058_vm7, %v3224_v54, %v5572_v29  ;;  %vm8405_vm7 = vmmov %vm8397_vm4  ;;  %4768 = vmatpush3.bf16.msra.mxu0 %v3975_v9 }
 0x3c6   : > { %v5580_v48 = vpop.permute.xlu1 %5579  ;;  %v5600_v62 = vpop.permute.xlu0 %5599 }
 0x3c7   : > { %v5602_v37 = vunpack.i.h.bf16 %v5600_v62  ;;  %v5601_v41 = vunpack.i.l.bf16 %v5600_v62  ;;  %v5582_v13 = vunpack.i.h.bf16 %v5580_v48  ;;  %v5581_v30 = vunpack.i.l.bf16 %v5580_v48 }
 0x3c9   : > { %v3317_v12 = vsel %vm8402_vm15, %v3301_v8, %v5601_v41  ;;  %v3318_v11 = vsel %vm8403_vm2, %v3302_v57, %v5602_v37  ;;  %v8205_v8 = vstv %s6127_s26 }
 0x3ca   : > { %v3327_v14 = vpack.c.bf16 %v3318_v11, %v3317_v12  ;;  %v5585_v32 = vpop.permute.xlu1 %5584  ;;  %v3587_v57 = vadd.s32 1, %v8205_v8  ;;  %vm3602_vm14 = vcmp.lt.s32.totalorder %v8205_v8, 16 }
 0x3cb   : > { %v5587_v49 = vunpack.i.h.bf16 %v5585_v32  ;;  %v5586_v43 = vunpack.i.l.bf16 %v5585_v32 }
 0x3cc   : > { %4727 = vmatprep.mubr.msk.bf16.mxu1 %vm8404_vm3, %v3327_v14  ;;  %vm3595_vm0 = vcmp.ge.s32.totalorder %v3587_v57, 0 }
 0x3cd   : > { %v3255_v52 = vsel %vm2079_vm8, %v3239_v20, %v5586_v43  ;;  %v3256_v34 = vsel %vm2079_vm8, %v3240_v7, %v5587_v49  ;;  %vm8407_vm8 = vmmov %vm8403_vm2 }
 0x3ce   : > { %v5590_v61 = vpop.permute.xlu1 %5589 }
 0x3cf   : > { %v5592_v24 = vunpack.i.h.bf16 %v5590_v61  ;;  %v5591_v3 = vunpack.i.l.bf16 %v5590_v61 }
 0x3d1   : > { %v3271_v39 = vsel %vm2100_vm9, %v3255_v52, %v5591_v3  ;;  %v3272_v35 = vsel %vm2100_vm9, %v3256_v34, %v5592_v24  ;;  %vm3603_vm9 = vcmp.lt.s32.totalorder %v3587_v57, 16 }
 0x3d2   : > { %v3287_v36 = vsel %vm2121_vm10, %v3271_v39, %v5566_v10  ;;  %v3288_v2 = vsel %vm2121_vm10, %v3272_v35, %v5567_v23  ;;  %v5605_v47 = vpop.permute.xlu1 %5604  ;;  %vm3594_vm10 = vcmp.ge.s32.totalorder %v8205_v8, 0  ;;  %vm3611_vm12 = vmand %vm3595_vm0, %vm3603_vm9 }
 0x3d3   : > { %v5607_v17 = vunpack.i.h.bf16 %v5605_v47  ;;  %v5606_v26 = vunpack.i.l.bf16 %v5605_v47  ;;  %v3303_v4 = vsel %vm8405_vm7, %v3287_v36, %v5581_v30  ;;  %v3304_v25 = vsel %vm8397_vm4, %v3288_v2, %v5582_v13  ;;  %vm3610_vm13 = vmand %vm3594_vm10, %vm3602_vm14 }
 0x3d5   : > { %v3319_v51 = vsel %vm8406_vm6, %v3303_v4, %v5606_v26  ;;  %v3320_v0 = vsel %vm8407_vm8, %v3304_v25, %v5607_v17  ;;  %v3589_v4 = vadd.s32 3, %v8205_v8  ;;  %v3588_v25 = vadd.s32 2, %v8205_v8 }
 0x3d6   : > { %v3328_v55 = vpack.c.bf16 %v3320_v0, %v3319_v51 }
 0x3d7   : > { %vm3597_vm15 = vcmp.ge.s32.totalorder %v3589_v4, 0  ;;  %vm3605_vm2 = vcmp.lt.s32.totalorder %v3589_v4, 16  ;;  %vm3596_vm3 = vcmp.ge.s32.totalorder %v3588_v25, 0  ;;  %vm3604_vm7 = vcmp.lt.s32.totalorder %v3588_v25, 16 }
 0x3d8   : > { %4728 = vmatmul.mubr.msk.bf16.gmra.mrb[56].mxu1 %vm8408_vm11, %v3328_v55  ;;  %vm3613_vm4 = vmand %vm3597_vm15, %vm3605_vm2 }
 0x3d9   : > { %vm3612_vm6 = vmand %vm3596_vm3, %vm3604_vm7 }
 0x452   : > { %v4717_v27 = vpop.f32.mrb[44].mxu1 }
 0x453   : > { %v3420_v31 = vadd.f32 %v4717_v27, %v8198_v40  ;;  %v3411_v5 = vpop.f32.mrb[45].mxu1 }
 0x454   : > { %v3412_v46 = vadd.f32 %v8198_v40, %v3411_v5  ;;  %v4718_v15 = vpop.f32.mrb[46].mxu1 }
 0x455   : > { %v4507_v59 = vmul.f32 -1.442695, %v3420_v31  ;;  %v3423_v42 = vadd.f32 %v4718_v15, %v8198_v40  ;;  %v3414_v21 = vpop.f32.mrb[47].mxu1 }
 0x456   : > { %v4505_v58 = vmul.f32 -1.442695, %v3412_v46  ;;  %v3415_v19 = vadd.f32 %v8198_v40, %v3414_v21 }
 0x457   : > { %5854 = vpow2.f32 %v4507_v59  ;;  %v4508_v53 = vmul.f32 -1.442695, %v3423_v42 }
 0x458   : > { %5856 = vpow2.f32 %v4505_v58  ;;  %v4506_v63 = vmul.f32 -1.442695, %v3415_v19 }
 0x459   : > { %5858 = vpow2.f32 %v4508_v53 }
 0x45a   : > { %5860 = vpow2.f32 %v4506_v63 }
 0x461   : > { %v5855_v18 = vpop.eup %5854 }
 0x462   : > { %v5857_v28 = vpop.eup %5856  ;;  %v3524_v48 = vadd.f32 1.0, %v5855_v18 }
 0x463   : > { %v5859_v62 = vpop.eup %5858  ;;  %v3522_v60 = vadd.f32 1.0, %v5857_v28 }
 0x464   : > { %v5861_v50 = vpop.eup %5860  ;;  %5862 = vrcp.f32 %v3524_v48  ;;  %v3525_v37 = vadd.f32 1.0, %v5859_v62 }
 0x465   : > { %5864 = vrcp.f32 %v3522_v60  ;;  %v3523_v41 = vadd.f32 1.0, %v5861_v50 }
 0x466   : > { %5866 = vrcp.f32 %v3525_v37 }
 0x467   : > { %5868 = vrcp.f32 %v3523_v41 }
 0x46e   : > { %v5863_v38 = vpop.eup %5862 }
 0x46f   : > { %v5865_v56 = vpop.eup %5864  ;;  %v3572_v12 = vmul.f32 %v5863_v38, %v3420_v31 }
 0x470   : > { %v5867_v11 = vpop.eup %5866  ;;  %v3570_v45 = vmul.f32 %v5865_v56, %v3412_v46 }
 0x471   : > { %v5869_v16 = vpop.eup %5868  ;;  %v3573_v14 = vmul.f32 %v5867_v11, %v3423_v42  ;;  %v3636_v29 = vsel %vm3611_vm12, %v3572_v12, 0.0 }
 0x472   : > { %v3571_v32 = vmul.f32 %v5869_v16, %v3415_v19  ;;  %v3634_v49 = vsel %vm3610_vm13, %v3570_v45, 0.0  ;;  %v4721_v1 = vpop.f32.mrb[48].mxu1 }
 0x473   : > { %v3637_v6 = vsel %vm3611_vm12, %v3573_v14, 0.0  ;;  %v3436_v54 = vadd.f32 %v4721_v1, %v8198_v40  ;;  %v3427_v61 = vpop.f32.mrb[49].mxu1 }
 0x474   : > { %v3943_v43 = vpack.c.bf16 %v3637_v6, %v3636_v29  ;;  %v3635_v44 = vsel %vm3610_vm13, %v3571_v32, 0.0  ;;  %v3428_v20 = vadd.f32 %v8198_v40, %v3427_v61  ;;  %v4722_v7 = vpop.f32.mrb[50].mxu1  ;;  %v3591_v29 = vadd.s32 5, %v8205_v8 }
 0x475   : > { %v3942_v22 = vpack.c.bf16 %v3635_v44, %v3634_v49  ;;  %v4511_v24 = vmul.f32 -1.442695, %v3436_v54  ;;  %v3439_v3 = vadd.f32 %v4722_v7, %v8198_v40  ;;  %v3430_v23 = vpop.f32.mrb[51].mxu1  ;;  %v3590_v6 = vadd.s32 4, %v8205_v8 }
 0x476   : > { %v4509_v10 = vmul.f32 -1.442695, %v3428_v20  ;;  %v3431_v52 = vadd.f32 %v8198_v40, %v3430_v23  ;;  %vm3599_vm8 = vcmp.ge.s32.totalorder %v3591_v29, 0  ;;  %vm3607_vm11 = vcmp.lt.s32.totalorder %v3591_v29, 16 }
 0x477   : > { %4769 = vmatprep.mubr.msk.bf16.mxu0 %vm608_vm1, %v3942_v22  ;;  %5870 = vpow2.f32 %v4511_v24  ;;  %v4512_v34 = vmul.f32 -1.442695, %v3439_v3  ;;  %vm3598_vm0 = vcmp.ge.s32.totalorder %v3590_v6, 0  ;;  %vm3606_vm9 = vcmp.lt.s32.totalorder %v3590_v6, 16  ;;  %vm3615_vm10 = vmand %vm3599_vm8, %vm3607_vm11 }
 0x478   : > { %4770 = vmatmul.mubr.msk.bf16.vlgmr.msra.gmra.mrb[16].mxu0 %vm608_vm1, %v3943_v43  ;;  %5872 = vpow2.f32 %v4509_v10  ;;  %v4510_v13 = vmul.f32 -1.442695, %v3431_v52  ;;  %vm3614_vm14 = vmand %vm3598_vm0, %vm3606_vm9 }
 0x479   : > { %5874 = vpow2.f32 %v4512_v34 }
 0x47a   : > { %5876 = vpow2.f32 %v4510_v13 }
 0x481   : > { %v5871_v30 = vpop.eup %5870 }
 0x482   : > { %v5873_v39 = vpop.eup %5872  ;;  %v3528_v35 = vadd.f32 1.0, %v5871_v30 }
 0x483   : > { %v5875_v36 = vpop.eup %5874  ;;  %v3526_v2 = vadd.f32 1.0, %v5873_v39 }
 0x484   : > { %v5877_v47 = vpop.eup %5876  ;;  %5878 = vrcp.f32 %v3528_v35  ;;  %v3529_v17 = vadd.f32 1.0, %v5875_v36 }
 0x485   : > { %5880 = vrcp.f32 %v3526_v2  ;;  %v3527_v26 = vadd.f32 1.0, %v5877_v47 }
 0x486   : > { %5882 = vrcp.f32 %v3529_v17 }
 0x487   : > { %5884 = vrcp.f32 %v3527_v26 }
 0x48e   : > { %v5879_v51 = vpop.eup %5878 }
 0x48f   : > { %v5881_v0 = vpop.eup %5880  ;;  %v3576_v55 = vmul.f32 %v5879_v51, %v3436_v54 }
 0x490   : > { %v5883_v33 = vpop.eup %5882  ;;  %v3574_v9 = vmul.f32 %v5881_v0, %v3428_v20 }
 0x491   : > { %v5885_v27 = vpop.eup %5884  ;;  %v3577_v31 = vmul.f32 %v5883_v33, %v3439_v3  ;;  %v3640_v46 = vsel %vm3613_vm4, %v3576_v55, 0.0 }
 0x492   : > { %v3575_v5 = vmul.f32 %v5885_v27, %v3431_v52  ;;  %v3638_v42 = vsel %vm3612_vm6, %v3574_v9, 0.0 }
 0x493   : > { %v3641_v15 = vsel %vm3613_vm4, %v3577_v31, 0.0  ;;  %v4725_v59 = vpop.f32.mrb[52].mxu1 }
 0x494   : > { %v3945_v21 = vpack.c.bf16 %v3641_v15, %v3640_v46  ;;  %v3639_v58 = vsel %vm3612_vm6, %v3575_v5, 0.0  ;;  %v3452_v19 = vadd.f32 %v4725_v59, %v8198_v40  ;;  %v3443_v53 = vpop.f32.mrb[53].mxu1  ;;  %v3593_v5 = vadd.s32 7, %v8205_v8 }
 0x495   : > { %v3944_v63 = vpack.c.bf16 %v3639_v58, %v3638_v42  ;;  %v3444_v18 = vadd.f32 %v8198_v40, %v3443_v53  ;;  %v4726_v28 = vpop.f32.mrb[54].mxu1  ;;  %v3592_v46 = vadd.s32 6, %v8205_v8 }
 0x496   : > { %v4515_v48 = vmul.f32 -1.442695, %v3452_v19  ;;  %v3455_v62 = vadd.f32 %v4726_v28, %v8198_v40  ;;  %v3446_v60 = vpop.f32.mrb[55].mxu1  ;;  %vm3601_vm12 = vcmp.ge.s32.totalorder %v3593_v5, 0  ;;  %vm3609_vm13 = vcmp.lt.s32.totalorder %v3593_v5, 16 }
 0x497   : > { %v4513_v50 = vmul.f32 -1.442695, %v3444_v18  ;;  %v3447_v37 = vadd.f32 %v8198_v40, %v3446_v60  ;;  %4773 = vmatprep.mubr.msk.bf16.mxu0 %vm608_vm1, %v3944_v63  ;;  %vm3600_vm15 = vcmp.ge.s32.totalorder %v3592_v46, 0  ;;  %vm3608_vm2 = vcmp.lt.s32.totalorder %v3592_v46, 16  ;;  %vm3617_vm3 = vmand %vm3601_vm12, %vm3609_vm13 }
 0x498   : > { %5886 = vpow2.f32 %v4515_v48  ;;  %v4516_v41 = vmul.f32 -1.442695, %v3455_v62  ;;  %4774 = vmatmul.mubr.msk.bf16.gmra.mrb[20].mxu0 %vm608_vm1, %v3945_v21  ;;  %vm3616_vm7 = vmand %vm3600_vm15, %vm3608_vm2 }
 0x499   : > { %5888 = vpow2.f32 %v4513_v50  ;;  %v4514_v57 = vmul.f32 -1.442695, %v3447_v37  ;;  %v8240_v50 = vld [vmem:[%s8322_s10] ss:$0 sm:$0xff] }
 0x49a   : > { %5890 = vpow2.f32 %v4516_v41 }
 0x49b   : > { %5892 = vpow2.f32 %v4514_v57 }
 0x4a2   : > { %v5887_v38 = vpop.eup %5886 }
 0x4a3   : > { %v5889_v56 = vpop.eup %5888  ;;  %v3532_v12 = vadd.f32 1.0, %v5887_v38 }
 0x4a4   : > { %v5891_v11 = vpop.eup %5890  ;;  %v3530_v45 = vadd.f32 1.0, %v5889_v56 }
 0x4a5   : > { %v5893_v16 = vpop.eup %5892  ;;  %5894 = vrcp.f32 %v3532_v12  ;;  %v3533_v14 = vadd.f32 1.0, %v5891_v11 }
 0x4a6   : > { %5896 = vrcp.f32 %v3530_v45  ;;  %v3531_v32 = vadd.f32 1.0, %v5893_v16 }
 0x4a7   : > { %5898 = vrcp.f32 %v3533_v14 }
 0x4a8   : > { %5900 = vrcp.f32 %v3531_v32 }
 0x4ab   : > { %v4729_v49 = vpop.f32.mrb[56].mxu1 }
 0x4ac   : > { %v3468_v43 = vadd.f32 %v4729_v49, %v8198_v40  ;;  %v3459_v44 = vpop.f32.mrb[57].mxu1 }
 0x4ad   : > { %v3460_v22 = vadd.f32 %v8198_v40, %v3459_v44  ;;  %v4730_v1 = vpop.f32.mrb[58].mxu1 }
 0x4ae   : > { %v4519_v54 = vmul.f32 -1.442695, %v3468_v43  ;;  %v3471_v61 = vadd.f32 %v4730_v1, %v8198_v40  ;;  %v3462_v20 = vpop.f32.mrb[59].mxu1 }
 0x4af   : > { %v5895_v7 = vpop.eup %5894  ;;  %v4517_v24 = vmul.f32 -1.442695, %v3460_v22  ;;  %v3463_v3 = vadd.f32 %v8198_v40, %v3462_v20 }
 0x4b0   : > { %v5897_v23 = vpop.eup %5896  ;;  %v3580_v10 = vmul.f32 %v5895_v7, %v3452_v19  ;;  %5902 = vpow2.f32 %v4519_v54  ;;  %v4520_v52 = vmul.f32 -1.442695, %v3471_v61 }
 0x4b1   : > { %v5899_v34 = vpop.eup %5898  ;;  %v3578_v13 = vmul.f32 %v5897_v23, %v3444_v18  ;;  %5904 = vpow2.f32 %v4517_v24  ;;  %v4518_v30 = vmul.f32 -1.442695, %v3463_v3 }
 0x4b2   : > { %v5901_v39 = vpop.eup %5900  ;;  %v3581_v35 = vmul.f32 %v5899_v34, %v3455_v62  ;;  %5906 = vpow2.f32 %v4520_v52  ;;  %v3644_v2 = vsel %vm3615_vm10, %v3580_v10, 0.0 }
 0x4b3   : > { %v3579_v36 = vmul.f32 %v5901_v39, %v3447_v37  ;;  %5908 = vpow2.f32 %v4518_v30  ;;  %v3642_v17 = vsel %vm3614_vm14, %v3578_v13, 0.0 }
 0x4b4   : > { %v3645_v47 = vsel %vm3615_vm10, %v3581_v35, 0.0 }
 0x4b5   : > { %v3947_v40 = vpack.c.bf16 %v3645_v47, %v3644_v2  ;;  %v3643_v26 = vsel %vm3614_vm14, %v3579_v36, 0.0 }
 0x4b6   : > { %v3946_v4 = vpack.c.bf16 %v3643_v26, %v3642_v17 }
 0x4b8   : > { %4777 = vmatprep.mubr.msk.bf16.mxu0 %vm608_vm1, %v3946_v4 }
 0x4b9   : > { %4778 = vmatmul.mubr.msk.bf16.gmra.mrb[24].mxu0 %vm608_vm1, %v3947_v40 }
 0x4ba   : > { %v5903_v25 = vpop.eup %5902 }
 0x4bb   : > { %v5905_v51 = vpop.eup %5904  ;;  %v3536_v0 = vadd.f32 1.0, %v5903_v25 }
 0x4bc   : > { %v5907_v55 = vpop.eup %5906  ;;  %v3534_v33 = vadd.f32 1.0, %v5905_v51 }
 0x4bd   : > { %v5909_v9 = vpop.eup %5908  ;;  %5910 = vrcp.f32 %v3536_v0  ;;  %v3537_v27 = vadd.f32 1.0, %v5907_v55 }
 0x4be   : > { %5912 = vrcp.f32 %v3534_v33  ;;  %v3535_v31 = vadd.f32 1.0, %v5909_v9 }
 0x4bf   : > { %5914 = vrcp.f32 %v3537_v27 }
 0x4c0   : > { %5916 = vrcp.f32 %v3535_v31 }
 0x4c7   : > { %v5911_v15 = vpop.eup %5910 }
 0x4c8   : > { %v5913_v59 = vpop.eup %5912  ;;  %v3584_v42 = vmul.f32 %v5911_v15, %v3468_v43 }
 0x4c9   : > { %v5915_v21 = vpop.eup %5914  ;;  %v3582_v58 = vmul.f32 %v5913_v59, %v3460_v22 }
 0x4ca   : > { %v5917_v19 = vpop.eup %5916  ;;  %v3585_v53 = vmul.f32 %v5915_v21, %v3471_v61  ;;  %v3648_v18 = vsel %vm3617_vm3, %v3584_v42, 0.0 }
 0x4cb   : > { %v3583_v63 = vmul.f32 %v5917_v19, %v3463_v3  ;;  %v3646_v48 = vsel %vm3616_vm7, %v3582_v58, 0.0 }
 0x4cc   : > { %v3649_v28 = vsel %vm3617_vm3, %v3585_v53, 0.0 }
 0x4cd   : > { %v3949_v62 = vpack.c.bf16 %v3649_v28, %v3648_v18  ;;  %v3647_v60 = vsel %vm3616_vm7, %v3583_v63, 0.0 }
 0x4ce   : > { %v3948_v8 = vpack.c.bf16 %v3647_v60, %v3646_v48 }
 0x4d0   : > { %4781 = vmatprep.mubr.msk.bf16.mxu0 %vm608_vm1, %v3948_v8 }
 0x4d1   : > { %4782 = vmatmul.mubr.msk.bf16.gmra.mrb[28].mxu0 %vm608_vm1, %v3949_v62 }
 0x54b   : > { %v4771_v37 = vpop.f32.mrb[16].mxu0 }
 0x54c   : > { %v4785_v41 = vadd.f32 %v4771_v37, %v8240_v50  ;;  %v4011_v57 = vpop.f32.mrb[17].mxu0 }
 0x54d   : > { %v4786_v38 = vadd.f32 %v8240_v50, %v4011_v57  ;;  %v4772_v56 = vpop.f32.mrb[18].mxu0 }
 0x54e   : > { %v4550_v12 = vmul.f32 -1.442695, %v4785_v41  ;;  %v4787_v11 = vadd.f32 %v4772_v56, %v8240_v50  ;;  %v4014_v45 = vpop.f32.mrb[19].mxu0 }
 0x54f   : > { %v4548_v16 = vmul.f32 -1.442695, %v4786_v38  ;;  %v4788_v14 = vadd.f32 %v8240_v50, %v4014_v45 }
 0x550   : > { %5918 = vpow2.f32 %v4550_v12  ;;  %v4551_v32 = vmul.f32 -1.442695, %v4787_v11 }
 0x551   : > { %5920 = vpow2.f32 %v4548_v16  ;;  %v4549_v29 = vmul.f32 -1.442695, %v4788_v14 }
 0x552   : > { %5922 = vpow2.f32 %v4551_v32 }
 0x553   : > { %5924 = vpow2.f32 %v4549_v29 }
 0x55a   : > { %v5919_v6 = vpop.eup %5918 }
 0x55b   : > { %v5921_v49 = vpop.eup %5920  ;;  %v4140_v43 = vadd.f32 1.0, %v5919_v6 }
 0x55c   : > { %v5923_v44 = vpop.eup %5922  ;;  %v4138_v22 = vadd.f32 1.0, %v5921_v49 }
 0x55d   : > { %v5925_v1 = vpop.eup %5924  ;;  %5926 = vrcp.f32 %v4140_v43  ;;  %v4141_v54 = vadd.f32 1.0, %v5923_v44 }
 0x55e   : > { %5928 = vrcp.f32 %v4138_v22  ;;  %v4139_v61 = vadd.f32 1.0, %v5925_v1 }
 0x55f   : > { %5930 = vrcp.f32 %v4141_v54 }
 0x560   : > { %5932 = vrcp.f32 %v4139_v61 }
 0x567   : > { %v5927_v20 = vpop.eup %5926 }
 0x568   : > { %v5929_v7 = vpop.eup %5928  ;;  %v4188_v24 = vmul.f32 %v5927_v20, %v4785_v41 }
 0x569   : > { %v5931_v3 = vpop.eup %5930  ;;  %v4186_v23 = vmul.f32 %v5929_v7, %v4786_v38 }
 0x56a   : > { %v5933_v10 = vpop.eup %5932  ;;  %4204 = vst.msk [vmem:[%s8251_s13 + $0x10] sm:$0xff] %vm2037_vm5, %v4188_v24  ;;  %v4189_v52 = vmul.f32 %v5931_v3, %v4787_v11 }
 0x56b   : > { %4202 = vst.msk [vmem:[%s8251_s13] sm:$0xff] %vm2037_vm5, %v4186_v23  ;;  %v4187_v34 = vmul.f32 %v5933_v10, %v4788_v14  ;;  %v4775_v13 = vpop.f32.mrb[20].mxu0 }
 0x56c   : > { %4205 = vst.msk [vmem:[%s8251_s13 + $0x18] sm:$0xff] %vm2037_vm5, %v4189_v52  ;;  %v4789_v30 = vadd.f32 %v4775_v13, %v8240_v50  ;;  %v4027_v39 = vpop.f32.mrb[21].mxu0 }
 0x56d   : > { %4203 = vst.msk [vmem:[%s8251_s13 + $0x8] sm:$0xff] %vm2037_vm5, %v4187_v34  ;;  %v4790_v35 = vadd.f32 %v8240_v50, %v4027_v39  ;;  %v4776_v36 = vpop.f32.mrb[22].mxu0 }
 0x56e   : > { %v4554_v2 = vmul.f32 -1.442695, %v4789_v30  ;;  %v4791_v47 = vadd.f32 %v4776_v36, %v8240_v50  ;;  %v4030_v17 = vpop.f32.mrb[23].mxu0 }
 0x56f   : > { %v4552_v40 = vmul.f32 -1.442695, %v4790_v35  ;;  %v4792_v26 = vadd.f32 %v8240_v50, %v4030_v17 }
 0x570   : > { %5934 = vpow2.f32 %v4554_v2  ;;  %v4555_v4 = vmul.f32 -1.442695, %v4791_v47 }
 0x571   : > { %5936 = vpow2.f32 %v4552_v40  ;;  %v4553_v25 = vmul.f32 -1.442695, %v4792_v26 }
 0x572   : > { %5938 = vpow2.f32 %v4555_v4 }
 0x573   : > { %5940 = vpow2.f32 %v4553_v25 }
 0x57a   : > { %v5935_v51 = vpop.eup %5934 }
 0x57b   : > { %v5937_v0 = vpop.eup %5936  ;;  %v4144_v55 = vadd.f32 1.0, %v5935_v51 }
 0x57c   : > { %v5939_v33 = vpop.eup %5938  ;;  %v4142_v9 = vadd.f32 1.0, %v5937_v0 }
 0x57d   : > { %v5941_v27 = vpop.eup %5940  ;;  %5942 = vrcp.f32 %v4144_v55  ;;  %v4145_v31 = vadd.f32 1.0, %v5939_v33 }
 0x57e   : > { %5944 = vrcp.f32 %v4142_v9  ;;  %v4143_v5 = vadd.f32 1.0, %v5941_v27 }
 0x57f   : > { %5946 = vrcp.f32 %v4145_v31 }
 0x580   : > { %5948 = vrcp.f32 %v4143_v5 }
 0x587   : > { %v5943_v46 = vpop.eup %5942 }
 0x588   : > { %v5945_v15 = vpop.eup %5944  ;;  %v4192_v59 = vmul.f32 %v5943_v46, %v4789_v30 }
 0x589   : > { %v5947_v42 = vpop.eup %5946  ;;  %v4190_v21 = vmul.f32 %v5945_v15, %v4790_v35 }
 0x58a   : > { %v5949_v58 = vpop.eup %5948  ;;  %4208 = vst.msk [vmem:[%s8251_s13 + $0x30] sm:$0xff] %vm2037_vm5, %v4192_v59  ;;  %v4193_v19 = vmul.f32 %v5947_v42, %v4791_v47 }
 0x58b   : > { %4206 = vst.msk [vmem:[%s8251_s13 + $0x20] sm:$0xff] %vm2037_vm5, %v4190_v21  ;;  %v4191_v53 = vmul.f32 %v5949_v58, %v4792_v26 }
 0x58c   : > { %4209 = vst.msk [vmem:[%s8251_s13 + $0x38] sm:$0xff] %vm2037_vm5, %v4193_v19  ;;  %v4779_v63 = vpop.f32.mrb[24].mxu0 }
 0x58d   : > { %4207 = vst.msk [vmem:[%s8251_s13 + $0x28] sm:$0xff] %vm2037_vm5, %v4191_v53  ;;  %v4793_v18 = vadd.f32 %v4779_v63, %v8240_v50  ;;  %v4043_v28 = vpop.f32.mrb[25].mxu0 }
 0x58e   : > { %v4794_v48 = vadd.f32 %v8240_v50, %v4043_v28  ;;  %v4780_v62 = vpop.f32.mrb[26].mxu0 }
 0x58f   : > { %v4558_v60 = vmul.f32 -1.442695, %v4793_v18  ;;  %v4795_v8 = vadd.f32 %v4780_v62, %v8240_v50  ;;  %v4046_v37 = vpop.f32.mrb[27].mxu0 }
 0x590   : > { %v4556_v41 = vmul.f32 -1.442695, %v4794_v48  ;;  %v4796_v57 = vadd.f32 %v8240_v50, %v4046_v37 }
 0x591   : > { %5950 = vpow2.f32 %v4558_v60  ;;  %v4559_v38 = vmul.f32 -1.442695, %v4795_v8 }
 0x592   : > { %5952 = vpow2.f32 %v4556_v41  ;;  %v4557_v56 = vmul.f32 -1.442695, %v4796_v57 }
 0x593   : > { %5954 = vpow2.f32 %v4559_v38 }
 0x594   : > { %5956 = vpow2.f32 %v4557_v56 }
 0x59b   : > { %v5951_v12 = vpop.eup %5950 }
 0x59c   : > { %v5953_v11 = vpop.eup %5952  ;;  %v4148_v45 = vadd.f32 1.0, %v5951_v12 }
 0x59d   : > { %v5955_v16 = vpop.eup %5954  ;;  %v4146_v14 = vadd.f32 1.0, %v5953_v11 }
 0x59e   : > { %v5957_v32 = vpop.eup %5956  ;;  %5958 = vrcp.f32 %v4148_v45  ;;  %v4149_v29 = vadd.f32 1.0, %v5955_v16 }
 0x59f   : > { %5960 = vrcp.f32 %v4146_v14  ;;  %v4147_v6 = vadd.f32 1.0, %v5957_v32 }
 0x5a0   : > { %5962 = vrcp.f32 %v4149_v29 }
 0x5a1   : > { %5964 = vrcp.f32 %v4147_v6 }
 0x5a4   : > { %v4783_v49 = vpop.f32.mrb[28].mxu0 }
 0x5a5   : > { %v4797_v43 = vadd.f32 %v4783_v49, %v8240_v50  ;;  %v4059_v44 = vpop.f32.mrb[29].mxu0 }
 0x5a6   : > { %v4798_v22 = vadd.f32 %v8240_v50, %v4059_v44  ;;  %v4784_v1 = vpop.f32.mrb[30].mxu0 }
 0x5a7   : > { %v4562_v54 = vmul.f32 -1.442695, %v4797_v43  ;;  %v4799_v61 = vadd.f32 %v4784_v1, %v8240_v50  ;;  %v4062_v20 = vpop.f32.mrb[31].mxu0 }
 0x5a8   : > { %v5959_v7 = vpop.eup %5958  ;;  %v4560_v24 = vmul.f32 -1.442695, %v4798_v22  ;;  %v4800_v3 = vadd.f32 %v8240_v50, %v4062_v20 }
 0x5a9   : > { %v5961_v23 = vpop.eup %5960  ;;  %v4196_v10 = vmul.f32 %v5959_v7, %v4793_v18  ;;  %5966 = vpow2.f32 %v4562_v54  ;;  %v4563_v52 = vmul.f32 -1.442695, %v4799_v61 }
 0x5aa   : > { %v5963_v34 = vpop.eup %5962  ;;  %v4194_v13 = vmul.f32 %v5961_v23, %v4794_v48  ;;  %5968 = vpow2.f32 %v4560_v24  ;;  %v4561_v30 = vmul.f32 -1.442695, %v4800_v3 }
 0x5ab   : > { %v5965_v39 = vpop.eup %5964  ;;  %4212 = vst.msk [vmem:[%s8251_s13 + $0x50] sm:$0xff] %vm2037_vm5, %v4196_v10  ;;  %v4197_v35 = vmul.f32 %v5963_v34, %v4795_v8  ;;  %5970 = vpow2.f32 %v4563_v52 }
 0x5ac   : > { %4210 = vst.msk [vmem:[%s8251_s13 + $0x40] sm:$0xff] %vm2037_vm5, %v4194_v13  ;;  %v4195_v36 = vmul.f32 %v5965_v39, %v4796_v57  ;;  %5972 = vpow2.f32 %v4561_v30 }
 0x5ad   : > { %4213 = vst.msk [vmem:[%s8251_s13 + $0x58] sm:$0xff] %vm2037_vm5, %v4197_v35 }
 0x5ae   : > { %4211 = vst.msk [vmem:[%s8251_s13 + $0x48] sm:$0xff] %vm2037_vm5, %v4195_v36 }
 0x5b3   : > { %v5967_v50 = vpop.eup %5966 }
 0x5b4   : > { %v5969_v2 = vpop.eup %5968  ;;  %v4152_v47 = vadd.f32 1.0, %v5967_v50 }
 0x5b5   : > { %v5971_v17 = vpop.eup %5970  ;;  %v4150_v40 = vadd.f32 1.0, %v5969_v2 }
 0x5b6   : > { %v5973_v26 = vpop.eup %5972  ;;  %5974 = vrcp.f32 %v4152_v47  ;;  %v4153_v4 = vadd.f32 1.0, %v5971_v17 }
 0x5b7   : > { %5976 = vrcp.f32 %v4150_v40  ;;  %v4151_v25 = vadd.f32 1.0, %v5973_v26 }
 0x5b8   : > { %5978 = vrcp.f32 %v4153_v4 }
 0x5b9   : > { %5980 = vrcp.f32 %v4151_v25 }
 0x5c0   : > { %v5975_v51 = vpop.eup %5974 }
 0x5c1   : > { %v5977_v0 = vpop.eup %5976  ;;  %v4200_v55 = vmul.f32 %v5975_v51, %v4797_v43 }
 0x5c2   : > { %v5979_v33 = vpop.eup %5978  ;;  %v4198_v9 = vmul.f32 %v5977_v0, %v4798_v22 }
 0x5c3   : > { %v5981_v27 = vpop.eup %5980  ;;  %4216 = vst.msk [vmem:[%s8251_s13 + $0x70] sm:$0xff] %vm2037_vm5, %v4200_v55  ;;  %v4201_v31 = vmul.f32 %v5979_v33, %v4799_v61 }
 0x5c4   : > { %4214 = vst.msk [vmem:[%s8251_s13 + $0x60] sm:$0xff] %vm2037_vm5, %v4198_v9  ;;  %v4199_v5 = vmul.f32 %v5981_v27, %v4800_v3 }
 0x5c5   : > { %4217 = vst.msk [vmem:[%s8251_s13 + $0x78] sm:$0xff] %vm2037_vm5, %v4201_v31 }
 0x5c6   : > { %4215 = vst.msk [vmem:[%s8251_s13 + $0x68] sm:$0xff] %vm2037_vm5, %v4199_v5 }
 0x5c7 PF: > { %s21_s21 = sadd.s32 1, %s6021_s21   ;;  %s8410_s17 = smov %s6013_s19 }
 0x5c8   : > { %p18_p11 = scmp.ge.s32.totalorder %s21_s21, 6   ;;  %s8411_s18 = smov %s6017_s20 }
 0x5c9   : > { %s8412_s19 = smov %s8415_s22  ;;  %s8413_s20 = smov %s8419_s23 }
 0x5ca   :  { %20 = sbr.rel (!%p18_p11) target bundleno = 3 (0x3), region = 104 }

</bundles_post_ra>
